<compile_context>
chip_gen: v7x
topology: tpu7x:2x2x1
jax: 0.10.0
libtpu: 0.0.40
codegen_flags: <defaults>
</compile_context>

<pallas_src>
import jax
import jax.numpy as jnp
from jax import lax
from jax.experimental import pallas as pl
from jax.experimental.pallas import tpu as pltpu

# Model hyper-parameters fixed by DanQ.__init__
CIN = 5          # embedding dim / conv in_channels
COUT = 320       # conv out_channels
K = 26           # conv kernel size
POOL = 13        # maxpool kernel == stride
H = 320          # LSTM hidden size
NUM_DIR = 2      # bidirectional
LIN1_OUT = 925   # Linear1 out_features
LIN1_PAD = 1024  # lane-dense padded hidden width for the head
HEAD_BK = 2048   # reduction (din) tile for the head matmul

_VMEM_LIMIT = 32 * 1024 * 1024  # <=32 MiB: safe headroom on v7x (64 MiB VMEM)


def _cdiv(a, b):
    return (a + b - 1) // b


def _round_up(a, b):
    return _cdiv(a, b) * b


def _pick_batch_tile(b, cap=8):
    for cand in range(min(b, cap), 0, -1):
        if b % cand == 0:
            return cand
    return 1


# ---------------------------------------------------------------------------
# Kernel 1: Conv1d (im2col built in-kernel) + ReLU + MaxPool1d(13, 13)
#   batch is folded into the matmul M dimension (bb*Lt rows per grid step).
# ---------------------------------------------------------------------------
def conv_relu_pool_kernel(emb_ref, w_ref, b_ref, out_ref, patch_ref):
    # emb_ref:   (bb, L, CIN)  f32
    # w_ref:     (K*CIN, COUT) bf16   w_mat[k*CIN + c, o] == torch_w[o, c, k]
    # b_ref:     (1, COUT)     f32
    # out_ref:   (bb, T, COUT) f32, T = Lout // POOL
    # patch_ref: (bb, T*POOL, K*CIN) f32 scratch (im2col buffer, VMEM only)
    bb, t_out, cout = out_ref.shape
    lt = t_out * POOL
    e = emb_ref[...]                                     # whole tile in VMEM
    # In-kernel im2col: patch[b, t, k*CIN + c] = e[b, t + k, c]
    for k in range(K):
        patch_ref[:, :, k * CIN:(k + 1) * CIN] = e[:, k:k + lt, :]
    p = patch_ref[...].reshape(bb * lt, K * CIN).astype(jnp.bfloat16)
    y = jnp.dot(p, w_ref[...], preferred_element_type=jnp.float32) + b_ref[...]
    y = jnp.maximum(y, 0.0)                              # (bb*lt, COUT)
    y = y.reshape(bb * t_out, POOL, cout)
    out_ref[...] = jnp.max(y, axis=1).reshape(bb, t_out, cout)


def conv_relu_pool(emb, conv_w, conv_b, t_out):
    batch, seq_len, cin = emb.shape
    kc, cout = conv_w.shape
    bb = _pick_batch_tile(batch)
    return pl.pallas_call(
        conv_relu_pool_kernel,
        out_shape=jax.ShapeDtypeStruct((batch, t_out, cout), jnp.float32),
        grid=(batch // bb,),
        in_specs=[
            pl.BlockSpec((bb, seq_len, cin), lambda i: (i, 0, 0)),
            pl.BlockSpec((kc, cout), lambda i: (0, 0)),
            pl.BlockSpec((1, cout), lambda i: (0, 0)),
        ],
        out_specs=pl.BlockSpec((bb, t_out, cout), lambda i: (i, 0, 0)),
        scratch_shapes=[pltpu.VMEM((bb, t_out * POOL, kc), jnp.float32)],
        compiler_params=pltpu.CompilerParams(
            dimension_semantics=("parallel",),
            vmem_limit_bytes=_VMEM_LIMIT),
    )(emb, conv_w, conv_b)


# ---------------------------------------------------------------------------
# Kernel 2: fused bidirectional LSTM layer (PyTorch gate order i, f, g, o)
#   - gate-packed weights: Wih_cat (Din, 8H) = [fwd 4H | bwd 4H], Whh (H, 4H)
#   - x @ Wih (+ combined bias) precomputed for all T steps in one matmul
#   - backward direction indexed as time T-1-t; output written concatenated
#     (T, B, 2H) so no flips/concats are needed in glue.
# ---------------------------------------------------------------------------
def bilstm_layer_kernel(x_ref, wih_ref, whh_f_ref, whh_b_ref, b_ref, out_ref,
                        xp_scr, hf_scr, cf_scr, hb_scr, cb_scr):
    # x_ref:   (T, B, Din) f32        wih_ref: (Din, 8H) bf16
    # whh_*:   (H, 4H) bf16           b_ref:   (1, 8H) f32 (b_ih + b_hh, [f|b])
    # out_ref: (T, B, 2H) f32
    # xp_scr:  (T, B, 8H) f32; h*/c* scratch: (B, H) f32
    T, bsz, din = x_ref.shape
    H4 = 4 * H

    # Hoisted input projection (one big MXU matmul) with bias folded in.
    x2 = x_ref[...].reshape(T * bsz, din).astype(jnp.bfloat16)
    xp = jnp.dot(x2, wih_ref[...], preferred_element_type=jnp.float32) + b_ref[...]
    xp_scr[...] = xp.reshape(T, bsz, 2 * H4)

    hf_scr[...] = jnp.zeros_like(hf_scr)
    cf_scr[...] = jnp.zeros_like(cf_scr)
    hb_scr[...] = jnp.zeros_like(hb_scr)
    cb_scr[...] = jnp.zeros_like(cb_scr)

    whh_f = whh_f_ref[...]   # hoisted weight loads
    whh_b = whh_b_ref[...]

    def cell(xp_t, h_prev, c_prev, whh):
        # Single packed recurrent matmul; gates split from the (B, 4H) result.
        g = xp_t + jnp.dot(h_prev.astype(jnp.bfloat16), whh,
                           preferred_element_type=jnp.float32)
        i_g = jax.nn.sigmoid(g[:, 0:H])
        f_g = jax.nn.sigmoid(g[:, H:2 * H])
        g_g = jnp.tanh(g[:, 2 * H:3 * H])
        o_g = jax.nn.sigmoid(g[:, 3 * H:4 * H])
        c_new = f_g * c_prev + i_g * g_g
        h_new = o_g * jnp.tanh(c_new)
        return h_new, c_new

    def step(t, carry):
        # forward direction at time t
        xp_t = xp_scr[t]                                   # (B, 8H)
        hf, cf = cell(xp_t[:, 0:H4], hf_scr[...], cf_scr[...], whh_f)
        hf_scr[...] = hf
        cf_scr[...] = cf
        out_ref[t, :, 0:H] = hf
        # backward direction at time T-1-t
        tb = T - 1 - t
        xp_tb = xp_scr[tb]
        hb, cb = cell(xp_tb[:, H4:2 * H4], hb_scr[...], cb_scr[...], whh_b)
        hb_scr[...] = hb
        cb_scr[...] = cb
        out_ref[tb, :, H:2 * H] = hb
        return carry

    # Partial unroll so EUP/VPU work of step t overlaps step t+1's matmul push.
    lax.fori_loop(0, T, step, 0, unroll=(True if T <= 8 else 2))


def bilstm_layer(x_tbd, wih_cat, whh_f, whh_b, b_cat):
    T, bsz, din = x_tbd.shape
    return pl.pallas_call(
        bilstm_layer_kernel,
        out_shape=jax.ShapeDtypeStruct((T, bsz, NUM_DIR * H), jnp.float32),
        grid=(1,),
        in_specs=[
            pl.BlockSpec((T, bsz, din), lambda i: (0, 0, 0)),
            pl.BlockSpec((din, 2 * 4 * H), lambda i: (0, 0)),
            pl.BlockSpec((H, 4 * H), lambda i: (0, 0)),
            pl.BlockSpec((H, 4 * H), lambda i: (0, 0)),
            pl.BlockSpec((1, 2 * 4 * H), lambda i: (0, 0)),
        ],
        out_specs=pl.BlockSpec((T, bsz, NUM_DIR * H), lambda i: (0, 0, 0)),
        scratch_shapes=[
            pltpu.VMEM((T, bsz, 2 * 4 * H), jnp.float32),   # xproj
            pltpu.VMEM((bsz, H), jnp.float32),              # h fwd
            pltpu.VMEM((bsz, H), jnp.float32),              # c fwd
            pltpu.VMEM((bsz, H), jnp.float32),              # h bwd
            pltpu.VMEM((bsz, H), jnp.float32),              # c bwd
        ],
        compiler_params=pltpu.CompilerParams(
            dimension_semantics=("arbitrary",),
            vmem_limit_bytes=_VMEM_LIMIT),
    )(x_tbd, wih_cat, whh_f, whh_b, b_cat)


# ---------------------------------------------------------------------------
# Kernel 3: fused head — Linear1 + ReLU (features), Linear2 (logits)
#   k-tiled over the (large) reduction dim with an f32 VMEM accumulator;
#   hidden width padded 925 -> 1024 and logits padded to a 128 multiple
#   for lane-dense stores (the pads are zero-weights; sliced off in glue).
# ---------------------------------------------------------------------------
def head_kernel(x_ref, w1_ref, b1_ref, w2_ref, b2_ref, feat_ref, out_ref, acc_ref):
    k = pl.program_id(0)

    @pl.when(k == 0)
    def _():
        acc_ref[...] = jnp.zeros_like(acc_ref)

    acc_ref[...] += jnp.dot(x_ref[...], w1_ref[...],
                            preferred_element_type=jnp.float32)

    @pl.when(k == pl.num_programs(0) - 1)
    def _():
        hid = jnp.maximum(acc_ref[...] + b1_ref[...], 0.0)
        feat_ref[...] = hid
        out_ref[...] = jnp.dot(hid.astype(w2_ref.dtype), w2_ref[...],
                               preferred_element_type=jnp.float32) + b2_ref[...]


def head(x_pad_bf16, w1p, b1p, w2p, b2p):
    bsz, din_p = x_pad_bf16.shape
    d1p = w1p.shape[1]
    nclsp = w2p.shape[1]
    assert din_p % HEAD_BK == 0
    nk = din_p // HEAD_BK
    return pl.pallas_call(
        head_kernel,
        out_shape=(jax.ShapeDtypeStruct((bsz, d1p), jnp.float32),
                   jax.ShapeDtypeStruct((bsz, nclsp), jnp.float32)),
        grid=(nk,),
        in_specs=[
            pl.BlockSpec((bsz, HEAD_BK), lambda kk: (0, kk)),
            pl.BlockSpec((HEAD_BK, d1p), lambda kk: (kk, 0)),
            pl.BlockSpec((1, d1p), lambda kk: (0, 0)),
            pl.BlockSpec((d1p, nclsp), lambda kk: (0, 0)),
            pl.BlockSpec((1, nclsp), lambda kk: (0, 0)),
        ],
        out_specs=(pl.BlockSpec((bsz, d1p), lambda kk: (0, 0)),
                   pl.BlockSpec((bsz, nclsp), lambda kk: (0, 0))),
        scratch_shapes=[pltpu.VMEM((bsz, d1p), jnp.float32)],
        compiler_params=pltpu.CompilerParams(
            dimension_semantics=("arbitrary",),
            vmem_limit_bytes=_VMEM_LIMIT),
    )(x_pad_bf16, w1p, b1p, w2p, b2p)


# ---------------------------------------------------------------------------
# Parameter construction (deterministic, synthetic)
# ---------------------------------------------------------------------------
def init_params(key, t_out, nclass):
    ks = jax.random.split(key, 16)
    s = 0.05
    p = {}
    p["emb"] = s * jax.random.normal(ks[0], (5, CIN), jnp.float32)
    # conv_w[k*CIN + c, o] == torch Conv1d weight[o, c, k]
    p["conv_w"] = (s * jax.random.normal(ks[1], (K * CIN, COUT), jnp.float32)
                   ).astype(jnp.bfloat16)
    p["conv_b"] = s * jax.random.normal(ks[2], (1, COUT), jnp.float32)

    # LSTM: gate-packed (PyTorch order i,f,g,o along 4H). When importing real
    # weights: wih_cat[:, :4H] = W_ih_fwd.T, [:, 4H:] = W_ih_bwd.T, and the
    # combined bias b_cat = (b_ih + b_hh) for fwd then bwd.
    lstm = []
    kidx = 3
    for layer in range(2):
        din = H if layer == 0 else NUM_DIR * H
        wih_cat = (s * jax.random.normal(ks[kidx], (din, 2 * 4 * H), jnp.float32)
                   ).astype(jnp.bfloat16); kidx += 1
        whh_f = (s * jax.random.normal(ks[kidx], (H, 4 * H), jnp.float32)
                 ).astype(jnp.bfloat16); kidx += 1
        whh_b = (s * jax.random.normal(ks[kidx], (H, 4 * H), jnp.float32)
                 ).astype(jnp.bfloat16); kidx += 1
        b_cat = s * jax.random.normal(ks[kidx], (1, 2 * 4 * H), jnp.float32); kidx += 1
        lstm.append((wih_cat, whh_f, whh_b, b_cat))
    p["lstm"] = lstm

    # Note: original module uses Linear1(640*151, 925); with our small sequence
    # length the flattened LSTM output is 640*t_out wide, so Linear1 adapts.
    din1 = NUM_DIR * H * t_out
    din1_p = _round_up(din1, HEAD_BK)
    ncls_p = _round_up(nclass, 128)
    w1 = s * jax.random.normal(ks[kidx], (din1, LIN1_OUT), jnp.float32); kidx += 1
    b1 = s * jax.random.normal(ks[kidx], (1, LIN1_OUT), jnp.float32); kidx += 1
    w2 = s * jax.random.normal(ks[kidx], (LIN1_OUT, nclass), jnp.float32); kidx += 1
    b2 = s * jax.random.normal(ks[kidx], (1, nclass), jnp.float32)
    # Zero-padded to lane-dense / k-tile-friendly shapes (pads are inert).
    p["w1p"] = (jnp.zeros((din1_p, LIN1_PAD), jnp.float32)
                .at[:din1, :LIN1_OUT].set(w1)).astype(jnp.bfloat16)
    p["b1p"] = jnp.zeros((1, LIN1_PAD), jnp.float32).at[:, :LIN1_OUT].set(b1)
    p["w2p"] = (jnp.zeros((LIN1_PAD, ncls_p), jnp.float32)
                .at[:LIN1_OUT, :nclass].set(w2)).astype(jnp.bfloat16)
    p["b2p"] = jnp.zeros((1, ncls_p), jnp.float32).at[:, :nclass].set(b2)
    p["nclass"] = nclass
    return p


# ---------------------------------------------------------------------------
# Full forward pass (glue in plain JAX, heavy compute in Pallas)
# ---------------------------------------------------------------------------
def danq_forward(params, tokens):
    batch, seq_len = tokens.shape
    lout = seq_len - K + 1
    t_out = lout // POOL

    # Embedding lookup (glue), channels-last (B, L, CIN).
    emb = jnp.take(params["emb"], tokens, axis=0)

    # Conv1d + ReLU + MaxPool1d(13, 13); im2col built in-kernel.   [Pallas]
    feat = conv_relu_pool(emb, params["conv_w"], params["conv_b"], t_out)  # (B, T, 320)
    # TODO(synk): Dropout(p=0.2) and inter-layer LSTM dropout(p=0.5) are identity (eval).

    # 2-layer bidirectional LSTM, both directions fused per layer.  [Pallas]
    x = jnp.transpose(feat, (1, 0, 2))                     # (T, B, 320), time-major
    for layer in range(2):
        wih_cat, whh_f, whh_b, b_cat = params["lstm"][layer]
        x = bilstm_layer(x, wih_cat, whh_f, whh_b, b_cat)  # (T, B, 640) = [fwd | bwd]

    out_btd = jnp.transpose(x, (1, 0, 2))                  # (B, T, 640)
    x_flat = out_btd.reshape(batch, t_out * NUM_DIR * H)   # == view(-1, 640*T)

    # Fused head: Linear1 + ReLU (features) and Linear2 (logits).   [Pallas]
    din1 = x_flat.shape[1]
    din1_p = params["w1p"].shape[0]
    x_pad = (jnp.zeros((batch, din1_p), jnp.float32)
             .at[:, :din1].set(x_flat)).astype(jnp.bfloat16)
    feat_p, logits_p = head(x_pad, params["w1p"], params["b1p"],
                            params["w2p"], params["b2p"])
    x_feat = feat_p[:, :LIN1_OUT]
    logits = logits_p[:, :params["nclass"]]
    return x_feat, logits, None


if __name__ == "__main__":
    B, L, NCLASS = 2, 77, 10                 # L=77 -> conv out 52 -> pooled T=4
    key = jax.random.PRNGKey(0)
    k_tok, k_par = jax.random.split(key)
    tokens = jax.random.randint(k_tok, (B, L), 0, 5, dtype=jnp.int32)
    t_out = (L - K + 1) // POOL
    params = init_params(k_par, t_out, NCLASS)

    x_feat, logits, _ = danq_forward(params, tokens)
    jax.block_until_ready((x_feat, logits))

    assert x_feat.shape == (B, LIN1_OUT), x_feat.shape
    assert logits.shape == (B, NCLASS), logits.shape
    assert bool(jnp.all(jnp.isfinite(x_feat))) and bool(jnp.all(jnp.isfinite(logits)))
    print("KERNEL_OK")
</pallas_src>

<mosaic_0001>
module attributes {stable_mosaic.version = 11 : i64} {
  func.func @conv_relu_pool_kernel(%arg0: i32, %arg1: memref<2x77x5xf32, #tpu.memory_space<vmem>>, %arg2: memref<130x320xbf16, #tpu.memory_space<vmem>>, %arg3: memref<1x320xf32, #tpu.memory_space<vmem>>, %arg4: memref<2x4x320xf32, #tpu.memory_space<vmem>>, %arg5: memref<2x52x130xf32, #tpu.memory_space<vmem>>) attributes {dimension_semantics = [#tpu.dimension_semantics<parallel>], iteration_bounds = array<i64: 1>, scalar_prefetch = 0 : i64, scratch_operands = 1 : i64, tpu.core_type = #tpu.core_type<tc>, window_params = [{transform_indices = @transform_0, window_bounds = array<i64: 2, 77, 5>}, {pipeline_mode = #tpu.pipeline_mode<synchronous>, transform_indices = @transform_1, window_bounds = array<i64: 130, 320>}, {pipeline_mode = #tpu.pipeline_mode<synchronous>, transform_indices = @transform_2, window_bounds = array<i64: 1, 320>}, {transform_indices = @transform_3, window_bounds = array<i64: 2, 4, 320>}]} {
    %c0 = arith.constant 0 : index
    %c0_0 = arith.constant 0 : index
    %c0_1 = arith.constant 0 : index
    %0 = vector.load %arg1[%c0, %c0_0, %c0_1] : memref<2x77x5xf32, #tpu.memory_space<vmem>>, vector<2x77x5xf32>
    %1 = vector.extract_strided_slice %0 {offsets = [0, 0, 0], sizes = [2, 52, 5], strides = [1, 1, 1]} : vector<2x77x5xf32> to vector<2x52x5xf32>
    %c0_2 = arith.constant 0 : index
    %c0_3 = arith.constant 0 : index
    %c0_4 = arith.constant 0 : index
    %2 = vector.load %arg5[%c0_2, %c0_3, %c0_4] : memref<2x52x130xf32, #tpu.memory_space<vmem>>, vector<2x52x5xf32>
    tpu.vector_store %arg5[%c0_2, %c0_3, %c0_4], %1 {strides = array<i32>} : memref<2x52x130xf32, #tpu.memory_space<vmem>>, vector<2x52x5xf32>,
    %3 = vector.extract_strided_slice %0 {offsets = [0, 1, 0], sizes = [2, 52, 5], strides = [1, 1, 1]} : vector<2x77x5xf32> to vector<2x52x5xf32>
    %c0_5 = arith.constant 0 : index
    %c0_6 = arith.constant 0 : index
    %c5 = arith.constant 5 : index
    %4 = vector.load %arg5[%c0_5, %c0_6, %c5] : memref<2x52x130xf32, #tpu.memory_space<vmem>>, vector<2x52x5xf32>
    tpu.vector_store %arg5[%c0_5, %c0_6, %c5], %3 {strides = array<i32>} : memref<2x52x130xf32, #tpu.memory_space<vmem>>, vector<2x52x5xf32>,
    %5 = vector.extract_strided_slice %0 {offsets = [0, 2, 0], sizes = [2, 52, 5], strides = [1, 1, 1]} : vector<2x77x5xf32> to vector<2x52x5xf32>
    %c0_7 = arith.constant 0 : index
    %c0_8 = arith.constant 0 : index
    %c10 = arith.constant 10 : index
    %6 = vector.load %arg5[%c0_7, %c0_8, %c10] : memref<2x52x130xf32, #tpu.memory_space<vmem>>, vector<2x52x5xf32>
    tpu.vector_store %arg5[%c0_7, %c0_8, %c10], %5 {strides = array<i32>} : memref<2x52x130xf32, #tpu.memory_space<vmem>>, vector<2x52x5xf32>,
    %7 = vector.extract_strided_slice %0 {offsets = [0, 3, 0], sizes = [2, 52, 5], strides = [1, 1, 1]} : vector<2x77x5xf32> to vector<2x52x5xf32>
    %c0_9 = arith.constant 0 : index
    %c0_10 = arith.constant 0 : index
    %c15 = arith.constant 15 : index
    %8 = vector.load %arg5[%c0_9, %c0_10, %c15] : memref<2x52x130xf32, #tpu.memory_space<vmem>>, vector<2x52x5xf32>
    tpu.vector_store %arg5[%c0_9, %c0_10, %c15], %7 {strides = array<i32>} : memref<2x52x130xf32, #tpu.memory_space<vmem>>, vector<2x52x5xf32>,
    %9 = vector.extract_strided_slice %0 {offsets = [0, 4, 0], sizes = [2, 52, 5], strides = [1, 1, 1]} : vector<2x77x5xf32> to vector<2x52x5xf32>
    %c0_11 = arith.constant 0 : index
    %c0_12 = arith.constant 0 : index
    %c20 = arith.constant 20 : index
    %10 = vector.load %arg5[%c0_11, %c0_12, %c20] : memref<2x52x130xf32, #tpu.memory_space<vmem>>, vector<2x52x5xf32>
    tpu.vector_store %arg5[%c0_11, %c0_12, %c20], %9 {strides = array<i32>} : memref<2x52x130xf32, #tpu.memory_space<vmem>>, vector<2x52x5xf32>,
    %11 = vector.extract_strided_slice %0 {offsets = [0, 5, 0], sizes = [2, 52, 5], strides = [1, 1, 1]} : vector<2x77x5xf32> to vector<2x52x5xf32>
    %c0_13 = arith.constant 0 : index
    %c0_14 = arith.constant 0 : index
    %c25 = arith.constant 25 : index
    %12 = vector.load %arg5[%c0_13, %c0_14, %c25] : memref<2x52x130xf32, #tpu.memory_space<vmem>>, vector<2x52x5xf32>
    tpu.vector_store %arg5[%c0_13, %c0_14, %c25], %11 {strides = array<i32>} : memref<2x52x130xf32, #tpu.memory_space<vmem>>, vector<2x52x5xf32>,
    %13 = vector.extract_strided_slice %0 {offsets = [0, 6, 0], sizes = [2, 52, 5], strides = [1, 1, 1]} : vector<2x77x5xf32> to vector<2x52x5xf32>
    %c0_15 = arith.constant 0 : index
    %c0_16 = arith.constant 0 : index
    %c30 = arith.constant 30 : index
    %14 = vector.load %arg5[%c0_15, %c0_16, %c30] : memref<2x52x130xf32, #tpu.memory_space<vmem>>, vector<2x52x5xf32>
    tpu.vector_store %arg5[%c0_15, %c0_16, %c30], %13 {strides = array<i32>} : memref<2x52x130xf32, #tpu.memory_space<vmem>>, vector<2x52x5xf32>,
    %15 = vector.extract_strided_slice %0 {offsets = [0, 7, 0], sizes = [2, 52, 5], strides = [1, 1, 1]} : vector<2x77x5xf32> to vector<2x52x5xf32>
    %c0_17 = arith.constant 0 : index
    %c0_18 = arith.constant 0 : index
    %c35 = arith.constant 35 : index
    %16 = vector.load %arg5[%c0_17, %c0_18, %c35] : memref<2x52x130xf32, #tpu.memory_space<vmem>>, vector<2x52x5xf32>
    tpu.vector_store %arg5[%c0_17, %c0_18, %c35], %15 {strides = array<i32>} : memref<2x52x130xf32, #tpu.memory_space<vmem>>, vector<2x52x5xf32>,
    %17 = vector.extract_strided_slice %0 {offsets = [0, 8, 0], sizes = [2, 52, 5], strides = [1, 1, 1]} : vector<2x77x5xf32> to vector<2x52x5xf32>
    %c0_19 = arith.constant 0 : index
    %c0_20 = arith.constant 0 : index
    %c40 = arith.constant 40 : index
    %18 = vector.load %arg5[%c0_19, %c0_20, %c40] : memref<2x52x130xf32, #tpu.memory_space<vmem>>, vector<2x52x5xf32>
    tpu.vector_store %arg5[%c0_19, %c0_20, %c40], %17 {strides = array<i32>} : memref<2x52x130xf32, #tpu.memory_space<vmem>>, vector<2x52x5xf32>,
    %19 = vector.extract_strided_slice %0 {offsets = [0, 9, 0], sizes = [2, 52, 5], strides = [1, 1, 1]} : vector<2x77x5xf32> to vector<2x52x5xf32>
    %c0_21 = arith.constant 0 : index
    %c0_22 = arith.constant 0 : index
    %c45 = arith.constant 45 : index
    %20 = vector.load %arg5[%c0_21, %c0_22, %c45] : memref<2x52x130xf32, #tpu.memory_space<vmem>>, vector<2x52x5xf32>
    tpu.vector_store %arg5[%c0_21, %c0_22, %c45], %19 {strides = array<i32>} : memref<2x52x130xf32, #tpu.memory_space<vmem>>, vector<2x52x5xf32>,
    %21 = vector.extract_strided_slice %0 {offsets = [0, 10, 0], sizes = [2, 52, 5], strides = [1, 1, 1]} : vector<2x77x5xf32> to vector<2x52x5xf32>
    %c0_23 = arith.constant 0 : index
    %c0_24 = arith.constant 0 : index
    %c50 = arith.constant 50 : index
    %22 = vector.load %arg5[%c0_23, %c0_24, %c50] : memref<2x52x130xf32, #tpu.memory_space<vmem>>, vector<2x52x5xf32>
    tpu.vector_store %arg5[%c0_23, %c0_24, %c50], %21 {strides = array<i32>} : memref<2x52x130xf32, #tpu.memory_space<vmem>>, vector<2x52x5xf32>,
    %23 = vector.extract_strided_slice %0 {offsets = [0, 11, 0], sizes = [2, 52, 5], strides = [1, 1, 1]} : vector<2x77x5xf32> to vector<2x52x5xf32>
    %c0_25 = arith.constant 0 : index
    %c0_26 = arith.constant 0 : index
    %c55 = arith.constant 55 : index
    %24 = vector.load %arg5[%c0_25, %c0_26, %c55] : memref<2x52x130xf32, #tpu.memory_space<vmem>>, vector<2x52x5xf32>
    tpu.vector_store %arg5[%c0_25, %c0_26, %c55], %23 {strides = array<i32>} : memref<2x52x130xf32, #tpu.memory_space<vmem>>, vector<2x52x5xf32>,
    %25 = vector.extract_strided_slice %0 {offsets = [0, 12, 0], sizes = [2, 52, 5], strides = [1, 1, 1]} : vector<2x77x5xf32> to vector<2x52x5xf32>
    %c0_27 = arith.constant 0 : index
    %c0_28 = arith.constant 0 : index
    %c60 = arith.constant 60 : index
    %26 = vector.load %arg5[%c0_27, %c0_28, %c60] : memref<2x52x130xf32, #tpu.memory_space<vmem>>, vector<2x52x5xf32>
    tpu.vector_store %arg5[%c0_27, %c0_28, %c60], %25 {strides = array<i32>} : memref<2x52x130xf32, #tpu.memory_space<vmem>>, vector<2x52x5xf32>,
    %27 = vector.extract_strided_slice %0 {offsets = [0, 13, 0], sizes = [2, 52, 5], strides = [1, 1, 1]} : vector<2x77x5xf32> to vector<2x52x5xf32>
    %c0_29 = arith.constant 0 : index
    %c0_30 = arith.constant 0 : index
    %c65 = arith.constant 65 : index
    %28 = vector.load %arg5[%c0_29, %c0_30, %c65] : memref<2x52x130xf32, #tpu.memory_space<vmem>>, vector<2x52x5xf32>
    tpu.vector_store %arg5[%c0_29, %c0_30, %c65], %27 {strides = array<i32>} : memref<2x52x130xf32, #tpu.memory_space<vmem>>, vector<2x52x5xf32>,
    %29 = vector.extract_strided_slice %0 {offsets = [0, 14, 0], sizes = [2, 52, 5], strides = [1, 1, 1]} : vector<2x77x5xf32> to vector<2x52x5xf32>
    %c0_31 = arith.constant 0 : index
    %c0_32 = arith.constant 0 : index
    %c70 = arith.constant 70 : index
    %30 = vector.load %arg5[%c0_31, %c0_32, %c70] : memref<2x52x130xf32, #tpu.memory_space<vmem>>, vector<2x52x5xf32>
    tpu.vector_store %arg5[%c0_31, %c0_32, %c70], %29 {strides = array<i32>} : memref<2x52x130xf32, #tpu.memory_space<vmem>>, vector<2x52x5xf32>,
    %31 = vector.extract_strided_slice %0 {offsets = [0, 15, 0], sizes = [2, 52, 5], strides = [1, 1, 1]} : vector<2x77x5xf32> to vector<2x52x5xf32>
    %c0_33 = arith.constant 0 : index
    %c0_34 = arith.constant 0 : index
    %c75 = arith.constant 75 : index
    %32 = vector.load %arg5[%c0_33, %c0_34, %c75] : memref<2x52x130xf32, #tpu.memory_space<vmem>>, vector<2x52x5xf32>
    tpu.vector_store %arg5[%c0_33, %c0_34, %c75], %31 {strides = array<i32>} : memref<2x52x130xf32, #tpu.memory_space<vmem>>, vector<2x52x5xf32>,
    %33 = vector.extract_strided_slice %0 {offsets = [0, 16, 0], sizes = [2, 52, 5], strides = [1, 1, 1]} : vector<2x77x5xf32> to vector<2x52x5xf32>
    %c0_35 = arith.constant 0 : index
    %c0_36 = arith.constant 0 : index
    %c80 = arith.constant 80 : index
    %34 = vector.load %arg5[%c0_35, %c0_36, %c80] : memref<2x52x130xf32, #tpu.memory_space<vmem>>, vector<2x52x5xf32>
    tpu.vector_store %arg5[%c0_35, %c0_36, %c80], %33 {strides = array<i32>} : memref<2x52x130xf32, #tpu.memory_space<vmem>>, vector<2x52x5xf32>,
    %35 = vector.extract_strided_slice %0 {offsets = [0, 17, 0], sizes = [2, 52, 5], strides = [1, 1, 1]} : vector<2x77x5xf32> to vector<2x52x5xf32>
    %c0_37 = arith.constant 0 : index
    %c0_38 = arith.constant 0 : index
    %c85 = arith.constant 85 : index
    %36 = vector.load %arg5[%c0_37, %c0_38, %c85] : memref<2x52x130xf32, #tpu.memory_space<vmem>>, vector<2x52x5xf32>
    tpu.vector_store %arg5[%c0_37, %c0_38, %c85], %35 {strides = array<i32>} : memref<2x52x130xf32, #tpu.memory_space<vmem>>, vector<2x52x5xf32>,
    %37 = vector.extract_strided_slice %0 {offsets = [0, 18, 0], sizes = [2, 52, 5], strides = [1, 1, 1]} : vector<2x77x5xf32> to vector<2x52x5xf32>
    %c0_39 = arith.constant 0 : index
    %c0_40 = arith.constant 0 : index
    %c90 = arith.constant 90 : index
    %38 = vector.load %arg5[%c0_39, %c0_40, %c90] : memref<2x52x130xf32, #tpu.memory_space<vmem>>, vector<2x52x5xf32>
    tpu.vector_store %arg5[%c0_39, %c0_40, %c90], %37 {strides = array<i32>} : memref<2x52x130xf32, #tpu.memory_space<vmem>>, vector<2x52x5xf32>,
    %39 = vector.extract_strided_slice %0 {offsets = [0, 19, 0], sizes = [2, 52, 5], strides = [1, 1, 1]} : vector<2x77x5xf32> to vector<2x52x5xf32>
    %c0_41 = arith.constant 0 : index
    %c0_42 = arith.constant 0 : index
    %c95 = arith.constant 95 : index
    %40 = vector.load %arg5[%c0_41, %c0_42, %c95] : memref<2x52x130xf32, #tpu.memory_space<vmem>>, vector<2x52x5xf32>
    tpu.vector_store %arg5[%c0_41, %c0_42, %c95], %39 {strides = array<i32>} : memref<2x52x130xf32, #tpu.memory_space<vmem>>, vector<2x52x5xf32>,
    %41 = vector.extract_strided_slice %0 {offsets = [0, 20, 0], sizes = [2, 52, 5], strides = [1, 1, 1]} : vector<2x77x5xf32> to vector<2x52x5xf32>
    %c0_43 = arith.constant 0 : index
    %c0_44 = arith.constant 0 : index
    %c100 = arith.constant 100 : index
    %42 = vector.load %arg5[%c0_43, %c0_44, %c100] : memref<2x52x130xf32, #tpu.memory_space<vmem>>, vector<2x52x5xf32>
    tpu.vector_store %arg5[%c0_43, %c0_44, %c100], %41 {strides = array<i32>} : memref<2x52x130xf32, #tpu.memory_space<vmem>>, vector<2x52x5xf32>,
    %43 = vector.extract_strided_slice %0 {offsets = [0, 21, 0], sizes = [2, 52, 5], strides = [1, 1, 1]} : vector<2x77x5xf32> to vector<2x52x5xf32>
    %c0_45 = arith.constant 0 : index
    %c0_46 = arith.constant 0 : index
    %c105 = arith.constant 105 : index
    %44 = vector.load %arg5[%c0_45, %c0_46, %c105] : memref<2x52x130xf32, #tpu.memory_space<vmem>>, vector<2x52x5xf32>
    tpu.vector_store %arg5[%c0_45, %c0_46, %c105], %43 {strides = array<i32>} : memref<2x52x130xf32, #tpu.memory_space<vmem>>, vector<2x52x5xf32>,
    %45 = vector.extract_strided_slice %0 {offsets = [0, 22, 0], sizes = [2, 52, 5], strides = [1, 1, 1]} : vector<2x77x5xf32> to vector<2x52x5xf32>
    %c0_47 = arith.constant 0 : index
    %c0_48 = arith.constant 0 : index
    %c110 = arith.constant 110 : index
    %46 = vector.load %arg5[%c0_47, %c0_48, %c110] : memref<2x52x130xf32, #tpu.memory_space<vmem>>, vector<2x52x5xf32>
    tpu.vector_store %arg5[%c0_47, %c0_48, %c110], %45 {strides = array<i32>} : memref<2x52x130xf32, #tpu.memory_space<vmem>>, vector<2x52x5xf32>,
    %47 = vector.extract_strided_slice %0 {offsets = [0, 23, 0], sizes = [2, 52, 5], strides = [1, 1, 1]} : vector<2x77x5xf32> to vector<2x52x5xf32>
    %c0_49 = arith.constant 0 : index
    %c0_50 = arith.constant 0 : index
    %c115 = arith.constant 115 : index
    %48 = vector.load %arg5[%c0_49, %c0_50, %c115] : memref<2x52x130xf32, #tpu.memory_space<vmem>>, vector<2x52x5xf32>
    tpu.vector_store %arg5[%c0_49, %c0_50, %c115], %47 {strides = array<i32>} : memref<2x52x130xf32, #tpu.memory_space<vmem>>, vector<2x52x5xf32>,
    %49 = vector.extract_strided_slice %0 {offsets = [0, 24, 0], sizes = [2, 52, 5], strides = [1, 1, 1]} : vector<2x77x5xf32> to vector<2x52x5xf32>
    %c0_51 = arith.constant 0 : index
    %c0_52 = arith.constant 0 : index
    %c120 = arith.constant 120 : index
    %50 = vector.load %arg5[%c0_51, %c0_52, %c120] : memref<2x52x130xf32, #tpu.memory_space<vmem>>, vector<2x52x5xf32>
    tpu.vector_store %arg5[%c0_51, %c0_52, %c120], %49 {strides = array<i32>} : memref<2x52x130xf32, #tpu.memory_space<vmem>>, vector<2x52x5xf32>,
    %51 = vector.extract_strided_slice %0 {offsets = [0, 25, 0], sizes = [2, 52, 5], strides = [1, 1, 1]} : vector<2x77x5xf32> to vector<2x52x5xf32>
    %c0_53 = arith.constant 0 : index
    %c0_54 = arith.constant 0 : index
    %c125 = arith.constant 125 : index
    %52 = vector.load %arg5[%c0_53, %c0_54, %c125] : memref<2x52x130xf32, #tpu.memory_space<vmem>>, vector<2x52x5xf32>
    tpu.vector_store %arg5[%c0_53, %c0_54, %c125], %51 {strides = array<i32>} : memref<2x52x130xf32, #tpu.memory_space<vmem>>, vector<2x52x5xf32>,
    %c0_55 = arith.constant 0 : index
    %c0_56 = arith.constant 0 : index
    %c0_57 = arith.constant 0 : index
    %53 = vector.load %arg5[%c0_55, %c0_56, %c0_57] : memref<2x52x130xf32, #tpu.memory_space<vmem>>, vector<2x52x130xf32>
    %54 = vector.shape_cast %53 : vector<2x52x130xf32> to vector<104x130xf32>
    %55 = arith.truncf %54 : vector<104x130xf32> to vector<104x130xbf16>
    %c0_58 = arith.constant 0 : index
    %c0_59 = arith.constant 0 : index
    %56 = vector.load %arg2[%c0_58, %c0_59] : memref<130x320xbf16, #tpu.memory_space<vmem>>, vector<130x320xbf16>
    %cst = arith.constant dense<0.000000e+00> : vector<104x320xf32>
    %57 = tpu.matmul %55, %56, %cst {dimension_numbers = #tpu.dot_dimension_numbers<[1], [0], [0], [1], [0, 0, 1, 1], [], []>} : vector<104x130xbf16>, vector<130x320xbf16>, vector<104x320xf32> -> vector<104x320xf32>
    %c0_60 = arith.constant 0 : index
    %c0_61 = arith.constant 0 : index
    %58 = vector.load %arg3[%c0_60, %c0_61] : memref<1x320xf32, #tpu.memory_space<vmem>>, vector<1x320xf32>
    %59 = vector.broadcast %58 : vector<1x320xf32> to vector<104x320xf32>
    %60 = arith.addf %57, %59 : vector<104x320xf32>
    %cst_62 = arith.constant 0.000000e+00 : f32
    %61 = vector.broadcast %cst_62 : f32 to vector<104x320xf32>
    %62 = arith.maximumf %60, %61 : vector<104x320xf32>
    %63 = vector.shape_cast %62 : vector<104x320xf32> to vector<8x13x320xf32>
    %cst_63 = arith.constant dense<0xFF800000> : vector<8x320xf32>
    %64 = vector.multi_reduction <maximumf>, %63, %cst_63 [1] : vector<8x13x320xf32> to vector<8x320xf32>
    %65 = vector.shape_cast %64 : vector<8x320xf32> to vector<2x4x320xf32>
    %c0_64 = arith.constant 0 : index
    %c0_65 = arith.constant 0 : index
    %c0_66 = arith.constant 0 : index
    %66 = vector.load %arg4[%c0_64, %c0_65, %c0_66] : memref<2x4x320xf32, #tpu.memory_space<vmem>>, vector<2x4x320xf32>
    tpu.vector_store %arg4[%c0_64, %c0_65, %c0_66], %65 {strides = array<i32>} : memref<2x4x320xf32, #tpu.memory_space<vmem>>, vector<2x4x320xf32>,
    return
  }
  func.func @transform_0(%arg0: i32) -> (i32, i32, i32) {
    %c0_i32 = arith.constant 0 : i32
    %c0_i32_0 = arith.constant 0 : i32
    %c0_i32_1 = arith.constant 0 : i32
    return %arg0, %c0_i32, %c0_i32_0 : i32, i32, i32
  }
  func.func @transform_1(%arg0: i32) -> (i32, i32) {
    %c0_i32 = arith.constant 0 : i32
    %c0_i32_0 = arith.constant 0 : i32
    %c0_i32_1 = arith.constant 0 : i32
    return %c0_i32, %c0_i32_0 : i32, i32
  }
  func.func @transform_2(%arg0: i32) -> (i32, i32) {
    %c0_i32 = arith.constant 0 : i32
    %c0_i32_0 = arith.constant 0 : i32
    %c0_i32_1 = arith.constant 0 : i32
    return %c0_i32, %c0_i32_0 : i32, i32
  }
  func.func @transform_3(%arg0: i32) -> (i32, i32, i32) {
    %c0_i32 = arith.constant 0 : i32
    %c0_i32_0 = arith.constant 0 : i32
    %c0_i32_1 = arith.constant 0 : i32
    return %arg0, %c0_i32, %c0_i32_0 : i32, i32, i32
  }
}

</mosaic_0001>

<bundles_post_ra>
// kernel: tpu_custom_call.1
= control target key start
LH: loop header
LB: loop body
LE: loop exit
PB: predicated region body
PF: predicated region fallthrough
CT: control target
= control target key end

     0   :  { %8 = vsyncpa [#allocation4], 0  ;;  %s7198_s0 = inlined_call_operand.vmem [shape: f32[2,77,5], index: 0, kind: input, shape index: {}]   ;;  %s7199_s1 = inlined_call_operand.hbm [shape: bf16[130,320], index: 1, kind: input, shape index: {}]   ;;  %s7200_s2 = inlined_call_operand.vmem [shape: f32[1,320], index: 2, kind: input, shape index: {}]   ;;  %s7201_s3 = inlined_call_operand.hbm [shape: f32[2,4,320], index: 3, kind: output, shape index: {}]  }
   0x1   :  { %9 = vsyncpa [#allocation5], 0  ;;  %s4842_s12 = smov [#allocation3]   ;;  %s4794_s16 = scalar_lea.hbm %s7199_s1, 3264 }
   0x2   :  { %s17_s13 = sshll.u32 %s4842_s12, 4  ;;  %p4795_p0 = scmp.ne.s32.totalorder %s7199_s1, %s4794_s16  ;;  %s18_s13 = int_to_ptr.vmem [resolvable:$true] %s17_s13 }
   0x3   :  { %p4798_p1 = scmp.lt.u32.totalorder %s4794_s16, %s7199_s1 }
   0x5   :  { %p4800_p2 = pnand %p4798_p1, %p4795_p0 }
   0x7   :  { %4803 = shalt.err (!%p4800_p2)
}
   0x8   :  { %s4804_s21 = scalar_lea.vmem %s18_s13, 3264  ;;  %p4809_p4 = scmp.lt.s32.totalorder %s18_s13, %s18_s13 }
   0x9   :  { %p4805_p3 = scmp.ne.s32.totalorder %s18_s13, %s4804_s21  ;;  %p4810_p5 = scmp.lt.s32.totalorder %s4804_s21, %s4804_s21 }
   0xb   :  { %p4811_p6 = por %p4810_p5, %p4809_p4 }
   0xd   :  { %p4812_p7 = pnand %p4811_p6, %p4805_p3 }
   0xf   :  { %4815 = shalt.err (!%p4812_p7)
}
  0x10   :  { %s4843_s22 = smov 192   ;;  %s4844_s23 = smov 12  }
  0x11   :  { %23 = dma.hbm_to_vmem [thread:$0]  %s7199_s1, 3264, %s18_s13, [#allocation4], %s4843_s22, %s4843_s22, %s4844_s23  }
  0x12   :  { %4838 = dma.done.wait [#allocation4], 3264  }
  0x13   :  { %4839 = vsyncadd [#allocation4], 4294964032  ;;  %vm50_vm0 = vcmask 39936   ;;  %v4911_v0 = vld [vmem:[%s7198_s0 + $0x10] sm:$0xff]  ;;  %v4916_v1 = vld [vmem:[%s7198_s0 + $0x18] sm:$0xff]  ;;  %vm7289_vm1 = vcmask 1046528  }
  0x14   :  { %v4921_v2 = vld [vmem:[%s7198_s0] sm:$0xff]  ;;  %v84_v3 = vrot.slane %v4911_v0, 1  ;;  %v86_v4 = vrot.slane %v4916_v1, 1  ;;  %v4928_v5 = vld [vmem:[%s7198_s0 + $0x8] sm:$0xff]  ;;  %53 = vst.msk [vmem:[#allocation2 + $0x20] sm:$0xff] %vm50_vm0, %v4911_v0  ;;  %54 = vst.msk [vmem:[#allocation2 + $0x30] sm:$0xff] %vm50_vm0, %v4916_v1 }
  0x15   :  { %v81_v6 = vrot.slane %v4921_v2, 1  ;;  %v4934_v7 = vld [vmem:[%s7198_s0 + $0x20] sm:$0xff]  ;;  %v4939_v8 = vld [vmem:[%s7198_s0 + $0x28] sm:$0xff]  ;;  %51 = vst.msk [vmem:[#allocation2] sm:$0xff] %vm50_vm0, %v4921_v2  ;;  %v82_v9 = vrot.slane %v4928_v5, 1  ;;  %v4952_v11 = vld [vmem:[%s7198_s0 + $0x30] sm:$0xff] }
  0x16   :  { %v88_v10 = vrot.slane %v4934_v7, 1  ;;  %v4957_v12 = vld [vmem:[%s7198_s0 + $0x50] sm:$0xff]  ;;  %v4962_v13 = vld [vmem:[%s7198_s0 + $0x58] sm:$0xff]  ;;  %52 = vst.msk [vmem:[#allocation2 + $0x10] sm:$0xff] %vm50_vm0, %v4928_v5  ;;  %55 = vst.msk [vmem:[#allocation2 + $0x40] sm:$0xff] %vm50_vm0, %v4934_v7  ;;  %v4971_v14 = vsel %vm7289_vm1, %v84_v3, %v86_v4  ;;  %s4845_s24 = smov 5  }
  0x17   :  { %56 = vst.msk [vmem:[#allocation2 + $0x50] sm:$0xff] %vm50_vm0, %v4939_v8  ;;  %v4976_v15 = vld [vmem:[%s7198_s0 + $0x60] sm:$0xff]  ;;  %v4981_v16 = vld [vmem:[%s7198_s0 + $0x68] sm:$0xff]  ;;  %v4986_v17 = vld [vmem:[%s7198_s0 + $0x70] sm:$0xff]  ;;  %111 = vrot.lane.b32.xlu1 %v4971_v14, %s4845_s24  ;;  %v83_v18 = vsel %vm7289_vm1, %v81_v6, %v82_v9  ;;  %v90_v21 = vrot.slane %v4939_v8, 1  ;;  %v5012_v22 = vrot.slane %v4952_v11, 1  ;;  %v5017_v23 = vsel %vm7289_vm1, %v82_v9, %v84_v3 }
  0x18   :  { %59 = vst.msk [vmem:[#allocation2 + $0x70] sm:$0xff] %vm50_vm0, %v4957_v12  ;;  %60 = vst.msk [vmem:[#allocation2 + $0x80] sm:$0xff] %vm50_vm0, %v4962_v13  ;;  %v4998_v19 = vld [vmem:[%s7198_s0 + $0x78] sm:$0xff]  ;;  %107 = vrot.lane.b32.xlu0 %v83_v18, %s4845_s24  ;;  %v5008_v20 = vsel %vm7289_vm1, %v86_v4, %v88_v10  ;;  %v94_v25 = vrot.slane %v4957_v12, 1  ;;  %v95_v26 = vrot.slane %v4962_v13, 1  ;;  %v97_v29 = vrot.slane %v4976_v15, 1 }
  0x19   :  { %61 = vst.msk [vmem:[#allocation2 + $0x90] sm:$0xff] %vm50_vm0, %v4976_v15  ;;  %62 = vst.msk [vmem:[#allocation2 + $0xa0] sm:$0xff] %vm50_vm0, %v4981_v16  ;;  %v5025_v24 = vsel %vm7289_vm1, %v90_v21, %v5012_v22  ;;  %v5030_v27 = vsel %vm7289_vm1, %v88_v10, %v90_v21  ;;  %v99_v30 = vrot.slane %v4981_v16, 1  ;;  %v101_v32 = vrot.slane %v4986_v17, 1  ;;  %v5053_v35 = vld [vmem:[%s7198_s0 + $0x80] sm:$0xff]  ;;  %s4846_s29 = smov 10  }
  0x1a   :  { %63 = vst.msk [vmem:[#allocation2 + $0xb0] sm:$0xff] %vm50_vm0, %v4986_v17  ;;  %64 = vst.msk [vmem:[#allocation2 + $0xc0] sm:$0xff] %vm50_vm0, %v4998_v19  ;;  %v96_v28 = vsel %vm7289_vm1, %v94_v25, %v95_v26  ;;  %v103_v33 = vrot.slane %v4998_v19, 1  ;;  %v5048_v34 = vsel %vm7289_vm1, %v95_v26, %v97_v29  ;;  %v5066_v38 = vrot.slane %v5053_v35, 1  ;;  %s4847_s30 = smov 15   ;;  %s4848_s4 = smov 20  }
  0x1b   :  { %113 = vrot.lane.b32.xlu1 %v5008_v20, %s4845_s24  ;;  %v5043_v31 = vsel %vm7289_vm1, %v97_v29, %v99_v30  ;;  %v5063_v37 = vsel %vm7289_vm1, %v99_v30, %v101_v32  ;;  %v167_v39 = vrot.slane %v4928_v5, 2  ;;  %v169_v40 = vrot.slane %v4911_v0, 2  ;;  %s4849_s1 = smov 25   ;;  %s4850_s9 = smov 30  }
  0x1c   :  { %109 = vrot.lane.b32.xlu0 %v5017_v23, %s4845_s24  ;;  %v5060_v36 = vsel %vm7289_vm1, %v101_v32, %v103_v33  ;;  %v5076_v41 = vsel %vm7289_vm1, %v103_v33, %v5066_v38  ;;  %vm7283_vm2 = vcmask 1045504   ;;  %v166_v42 = vrot.slane %v4921_v2, 2  ;;  %s4851_s10 = smov 35   ;;  %s4852_s11 = smov 40  }
  0x1d   :  { %v5084_v43 = vsel %vm7283_vm2, %v167_v39, %v169_v40  ;;  %v171_v44 = vrot.slane %v4916_v1, 2  ;;  %v173_v45 = vrot.slane %v4934_v7, 2  ;;  %vm57_vm3 = vcmask 35840   ;;  %s4853_s12 = smov 45   ;;  %s4854_s13 = smov 50  }
  0x1e   :  { %v168_v46 = vsel %vm7283_vm2, %v166_v42, %v167_v39  ;;  %58 = vst.msk [vmem:[#allocation2 + $0x60] sm:$0xf] %vm57_vm3, %v4952_v11  ;;  %65 = vst.msk [vmem:[#allocation2 + $0xd0] sm:$0xf] %vm57_vm3, %v5053_v35  ;;  %v175_v48 = vrot.slane %v4939_v8, 2  ;;  %v5099_v49 = vrot.slane %v4952_v11, 2 }
  0x1f   :  { %117 = vrot.lane.b32.xlu1 %v5025_v24, %s4845_s24  ;;  %v5095_v47 = vsel %vm7283_vm2, %v171_v44, %v173_v45  ;;  %v5102_v50 = vsel %vm7283_vm2, %v169_v40, %v171_v44  ;;  %v179_v52 = vrot.slane %v4957_v12, 2  ;;  %v180_v53 = vrot.slane %v4962_v13, 2  ;;  %s4855_s14 = smov 55   ;;  %s4856_s15 = smov 60  }
  0x20   :  { %115 = vrot.lane.b32.xlu0 %v5030_v27, %s4845_s24  ;;  %v5110_v51 = vsel %vm7283_vm2, %v175_v48, %v5099_v49  ;;  %v5115_v54 = vsel %vm7283_vm2, %v173_v45, %v175_v48  ;;  %v182_v56 = vrot.slane %v4976_v15, 2  ;;  %v184_v57 = vrot.slane %v4981_v16, 2  ;;  %s4857_s16 = smov 65   ;;  %s4858_s17 = smov 70  }
  0x21   :  { %v181_v55 = vsel %vm7283_vm2, %v179_v52, %v180_v53  ;;  %v186_v59 = vrot.slane %v4986_v17, 2  ;;  %v188_v60 = vrot.slane %v4998_v19, 2  ;;  %v5146_v3 = vrot.slane %v5053_v35, 2  ;;  %s4859_s18 = smov 75   ;;  %s4860_s19 = smov 80  }
  0x22   :  { %v5128_v58 = vsel %vm7283_vm2, %v182_v56, %v184_v57  ;;  %v5133_v61 = vsel %vm7283_vm2, %v180_v53, %v182_v56  ;;  %v252_v4 = vrot.slane %v4928_v5, 3  ;;  %v254_v6 = vrot.slane %v4911_v0, 3  ;;  %s4861_s20 = smov 85   ;;  %s4862_s21 = smov 90  }
  0x23   :  { %121 = vrot.lane.b32.xlu1 %v96_v28, %s4845_s24  ;;  %v5140_v62 = vsel %vm7283_vm2, %v186_v59, %v188_v60  ;;  %v5143_v63 = vsel %vm7283_vm2, %v184_v57, %v186_v59  ;;  %v5156_v9 = vsel %vm7283_vm2, %v188_v60, %v5146_v3  ;;  %vm7285_vm4 = vcmask 1044480   ;;  %s4865_s25 = smov 100   ;;  %s4866_s26 = smov 105  }
  0x24   :  { %119 = vrot.lane.b32.xlu0 %v5012_v22, %s4845_s24  ;;  %v251_v10 = vrot.slane %v4921_v2, 3  ;;  %v5164_v18 = vsel %vm7285_vm4, %v252_v4, %v254_v6  ;;  %v256_v21 = vrot.slane %v4916_v1, 3  ;;  %v258_v25 = vrot.slane %v4934_v7, 3  ;;  %s4867_s27 = smov 110   ;;  %s4868_s28 = smov 115  }
  0x25   :  { %v260_v29 = vrot.slane %v4939_v8, 3  ;;  %v5177_v30 = vrot.slane %v4952_v11, 3  ;;  %v264_v39 = vrot.slane %v4957_v12, 3  ;;  %v265_v40 = vrot.slane %v4962_v13, 3 }
  0x26   :  { %v253_v26 = vsel %vm7285_vm4, %v251_v10, %v252_v4  ;;  %v5173_v28 = vsel %vm7285_vm4, %v256_v21, %v258_v25  ;;  %v5180_v32 = vsel %vm7285_vm4, %v254_v6, %v256_v21  ;;  %v267_v45 = vrot.slane %v4976_v15, 3 }
  0x27   :  { %125 = vrot.lane.b32.xlu1 %v5043_v31, %s4845_s24  ;;  %v5188_v33 = vsel %vm7285_vm4, %v260_v29, %v5177_v30  ;;  %v5193_v42 = vsel %vm7285_vm4, %v258_v25, %v260_v29  ;;  %v266_v44 = vsel %vm7285_vm4, %v264_v39, %v265_v40  ;;  %v271_v52 = vrot.slane %v4986_v17, 3 }
  0x28   :  { %123 = vrot.lane.b32.xlu0 %v5048_v34, %s4845_s24  ;;  %v273_v53 = vrot.slane %v4998_v19, 3  ;;  %v5224_v59 = vrot.slane %v5053_v35, 3  ;;  %v337_v60 = vrot.slane %v4928_v5, 4  ;;  %v339_v4 = vrot.slane %v4911_v0, 4 }
  0x29   :  { %vm7286_vm5 = vcmask 1043456   ;;  %v336_v10 = vrot.slane %v4921_v2, 4  ;;  %v341_v25 = vrot.slane %v4916_v1, 4  ;;  %vm7284_vm6 = vcmask 1042432  }
  0x2a   :  { %v5218_v56 = vsel %vm7285_vm4, %v271_v52, %v273_v53  ;;  %v5234_v6 = vsel %vm7285_vm4, %v273_v53, %v5224_v59  ;;  %v5242_v21 = vsel %vm7286_vm5, %v337_v60, %v339_v4  ;;  %v350_v53 = vrot.slane %v4962_v13, 4 }
  0x2b   :  { %129 = vrot.lane.b32.xlu1 %v5060_v36, %s4845_s24  ;;  %7306 = vst [vmem:[#allocation9_spill] sm:$0xff] %v5242_v21  ;;  %v338_v29 = vsel %vm7286_vm5, %v336_v10, %v337_v60  ;;  %v352_v10 = vrot.slane %v4976_v15, 4  ;;  %vm149_vm7 = vcmask 80936   ;;  %vm156_vm8 = vcmask 76840  }
  0x2c   :  { %127 = vrot.lane.b32.xlu0 %v5063_v37, %s4845_s24  ;;  %vm7288_vm9 = vcmask 1041408   ;;  %vm234_vm10 = vcmask 121936   ;;  %vm241_vm11 = vcmask 117840   ;;  %vm7287_vm12 = vcmask 1040384  }
  0x2d   :  { %vm319_vm13 = vcmask 162936   ;;  %vm326_vm14 = vcmask 158840   ;;  %vm404_vm15 = vcmask 203936   ;;  %vm411_vm0 = vcmask 199840  }
  0x2e   :  { %vm495_vm3 = vcmask 244936  }
  0x2f   :  { %133 = vrot.lane.b32.xlu1 %v5066_v38, %s4845_s24 }
  0x30   :  { %131 = vrot.lane.b32.xlu0 %v5076_v41, %s4845_s24  ;;  %s4863_s24 = smov 95  }
  0x33   :  { %194 = vrot.lane.b32.xlu1 %v5084_v43, %s4846_s29 }
  0x34   :  { %192 = vrot.lane.b32.xlu0 %v168_v46, %s4846_s29  ;;  %v269_v46 = vrot.slane %v4981_v16, 3 }
  0x36   :  { %v5206_v48 = vsel %vm7285_vm4, %v267_v45, %v269_v46  ;;  %v5221_v57 = vsel %vm7285_vm4, %v269_v46, %v271_v52  ;;  %v349_v52 = vrot.slane %v4957_v12, 4 }
  0x37   :  { %198 = vrot.lane.b32.xlu1 %v5095_v47, %s4846_s29 }
  0x38   :  { %196 = vrot.lane.b32.xlu0 %v5102_v50, %s4846_s29 }
  0x3b   :  { %202 = vrot.lane.b32.xlu1 %v5110_v51, %s4846_s29 }
  0x3c   :  { %200 = vrot.lane.b32.xlu0 %v5115_v54, %s4846_s29 }
  0x3f   :  { %206 = vrot.lane.b32.xlu1 %v181_v55, %s4846_s29  ;;  %v5211_v55 = vsel %vm7285_vm4, %v265_v40, %v267_v45  ;;  %v345_v40 = vrot.slane %v4939_v8, 4  ;;  %v5258_v45 = vsel %vm7286_vm5, %v339_v4, %v341_v25  ;;  %v351_v4 = vsel %vm7286_vm5, %v349_v52, %v350_v53 }
  0x40   :  { %204 = vrot.lane.b32.xlu0 %v5099_v49, %s4846_s29  ;;  %7309 = vst [vmem:[#allocation12_spill] sm:$0xff] %v5258_v45 }
  0x43   :  { %210 = vrot.lane.b32.xlu1 %v5128_v58, %s4846_s29 }
  0x44   :  { %208 = vrot.lane.b32.xlu0 %v5133_v61, %s4846_s29 }
  0x47   :  { %214 = vrot.lane.b32.xlu1 %v5140_v62, %s4846_s29 }
  0x48   :  { %212 = vrot.lane.b32.xlu0 %v5143_v63, %s4846_s29 }
  0x4b   :  { %218 = vrot.lane.b32.xlu1 %v5146_v3, %s4846_s29 }
  0x4c   :  { %216 = vrot.lane.b32.xlu0 %v5156_v9, %s4846_s29  ;;  %s4869_s29 = smov 120  }
  0x4f   :  { %279 = vrot.lane.b32.xlu1 %v5164_v18, %s4847_s30 }
  0x50   :  { %277 = vrot.lane.b32.xlu0 %v253_v26, %s4847_s30  ;;  %v343_v26 = vrot.slane %v4934_v7, 4 }
  0x52   :  { %v5251_v39 = vsel %vm7286_vm5, %v341_v25, %v343_v26  ;;  %v5271_v60 = vsel %vm7286_vm5, %v343_v26, %v345_v40  ;;  %v354_v25 = vrot.slane %v4981_v16, 4 }
  0x53   :  { %283 = vrot.lane.b32.xlu1 %v5173_v28, %s4847_s30  ;;  %7307 = vst [vmem:[#allocation10_spill] sm:$0xff] %v5251_v39  ;;  %7311 = vst [vmem:[#allocation14_spill] sm:$0xff] %v5271_v60 }
  0x54   :  { %281 = vrot.lane.b32.xlu0 %v5180_v32, %s4847_s30  ;;  %v5284_v26 = vsel %vm7286_vm5, %v352_v10, %v354_v25 }
  0x55   :  { %7312 = vst [vmem:[#allocation15_spill] sm:$0xff] %v5284_v26 }
  0x57   :  { %287 = vrot.lane.b32.xlu1 %v5188_v33, %s4847_s30 }
  0x58   :  { %285 = vrot.lane.b32.xlu0 %v5193_v42, %s4847_s30 }
  0x5b   :  { %291 = vrot.lane.b32.xlu1 %v266_v44, %s4847_s30  ;;  %v5255_v44 = vrot.slane %v4952_v11, 4 }
  0x5c   :  { %289 = vrot.lane.b32.xlu0 %v5177_v30, %s4847_s30 }
  0x5d   :  { %7308 = vst [vmem:[#allocation11_spill] sm:$0xff] %v5255_v44  ;;  %v5266_v46 = vsel %vm7286_vm5, %v345_v40, %v5255_v44  ;;  %v358_v40 = vrot.slane %v4998_v19, 4 }
  0x5e   :  { %7310 = vst [vmem:[#allocation13_spill] sm:$0xff] %v5266_v46 }
  0x5f   :  { %295 = vrot.lane.b32.xlu1 %v5206_v48, %s4847_s30 }
  0x60   :  { %293 = vrot.lane.b32.xlu0 %v5211_v55, %s4847_s30 }
  0x63   :  { %299 = vrot.lane.b32.xlu1 %v5218_v56, %s4847_s30 }
  0x64   :  { %297 = vrot.lane.b32.xlu0 %v5221_v57, %s4847_s30 }
  0x67   :  { %303 = vrot.lane.b32.xlu1 %v5224_v59, %s4847_s30 }
  0x68   :  { %301 = vrot.lane.b32.xlu0 %v5234_v6, %s4847_s30  ;;  %s4870_s30 = smov 125  }
  0x6b   :  { %364 = vrot.lane.b32.xlu1 %v5242_v21, %s4848_s4 }
  0x6c   :  { %362 = vrot.lane.b32.xlu0 %v338_v29, %s4848_s4  ;;  %v356_v29 = vrot.slane %v4986_v17, 4 }
  0x6e   :  { %v5296_v52 = vsel %vm7286_vm5, %v356_v29, %v358_v40 }
  0x6f   :  { %368 = vrot.lane.b32.xlu1 %v5251_v39, %s4848_s4  ;;  %7314 = vst [vmem:[#allocation17_spill] sm:$0xff] %v5296_v52 }
  0x70   :  { %366 = vrot.lane.b32.xlu0 %v5258_v45, %s4848_s4 }
  0x73   :  { %372 = vrot.lane.b32.xlu1 %v5266_v46, %s4848_s4  ;;  %v5289_v46 = vsel %vm7286_vm5, %v350_v53, %v352_v10  ;;  %v424_v53 = vrot.slane %v4928_v5, 5  ;;  %v426_v10 = vrot.slane %v4911_v0, 5 }
  0x74   :  { %370 = vrot.lane.b32.xlu0 %v5271_v60, %s4848_s4  ;;  %7313 = vst [vmem:[#allocation16_spill] sm:$0xff] %v5289_v46 }
  0x77   :  { %376 = vrot.lane.b32.xlu1 %v351_v4, %s4848_s4  ;;  %v5299_v4 = vsel %vm7286_vm5, %v354_v25, %v356_v29  ;;  %v423_v25 = vrot.slane %v4921_v2, 5  ;;  %v5320_v29 = vsel %vm7284_vm6, %v424_v53, %v426_v10 }
  0x78   :  { %374 = vrot.lane.b32.xlu0 %v5255_v44, %s4848_s4  ;;  %7315 = vst [vmem:[#allocation18_spill] sm:$0xff] %v5299_v4  ;;  %v5302_v44 = vrot.slane %v5053_v35, 4  ;;  %7318 = vst [vmem:[#allocation21_spill] sm:$0xff] %v5320_v29 }
  0x7a   :  { %7316 = vst [vmem:[#allocation19_spill] sm:$0xff] %v5302_v44 }
  0x7b   :  { %380 = vrot.lane.b32.xlu1 %v5284_v26, %s4848_s4  ;;  %v425_v26 = vsel %vm7284_vm6, %v423_v25, %v424_v53  ;;  %v5340_v25 = vld [vmem:[%s7198_s0 + $0x38] sm:$0xff] }
  0x7c   :  { %378 = vrot.lane.b32.xlu0 %v5289_v46, %s4848_s4  ;;  %v5312_v46 = vsel %vm7286_vm5, %v358_v40, %v5302_v44  ;;  %v7229_v21 = vrot.slane %v5340_v25, 5 }
  0x7d   :  { %7317 = vst [vmem:[#allocation20_spill] sm:$0xff] %v5312_v46 }
  0x7f   :  { %384 = vrot.lane.b32.xlu1 %v5296_v52, %s4848_s4  ;;  %v430_v52 = vrot.slane %v4934_v7, 5 }
  0x80   :  { %382 = vrot.lane.b32.xlu0 %v5299_v4, %s4848_s4  ;;  %v428_v4 = vrot.slane %v4916_v1, 5 }
  0x82   :  { %v5329_v40 = vsel %vm7284_vm6, %v428_v4, %v430_v52  ;;  %v5334_v39 = vsel %vm7284_vm6, %v426_v10, %v428_v4  ;;  %v438_v4 = vrot.slane %v4957_v12, 5 }
  0x83   :  { %388 = vrot.lane.b32.xlu1 %v5302_v44, %s4848_s4  ;;  %7319 = vst [vmem:[#allocation22_spill] sm:$0xff] %v5329_v40  ;;  %v434_v44 = vrot.slane %v4952_v11, 5  ;;  %7320 = vst [vmem:[#allocation23_spill] sm:$0xff] %v5334_v39 }
  0x84   :  { %386 = vrot.lane.b32.xlu0 %v5312_v46, %s4848_s4  ;;  %v432_v46 = vrot.slane %v4939_v8, 5 }
  0x87   :  { %455 = vrot.lane.b32.xlu1 %v5320_v29, %s4849_s1  ;;  %v5353_v29 = vsel %vm7284_vm6, %v430_v52, %v432_v46 }
  0x88   :  { %453 = vrot.lane.b32.xlu0 %v425_v26, %s4849_s1  ;;  %v5348_v26 = vsel %vm7284_vm6, %v432_v46, %v434_v44  ;;  %7322 = vst [vmem:[#allocation25_spill] sm:$0xff] %v5353_v29  ;;  %v443_v46 = vrot.slane %v4981_v16, 5 }
  0x89   :  { %v112_v60 = vpop.permute.xlu1 %111  ;;  %7321 = vst [vmem:[#allocation24_spill] sm:$0xff] %v5348_v26 }
  0x8a   :  { %152 = vst.msk [vmem:[#allocation2 + $0x20] sm:$0xff] %vm149_vm7, %v112_v60  ;;  %v108_v53 = vpop.permute.xlu0 %107  ;;  %v439_v60 = vrot.slane %v4962_v13, 5 }
  0x8b   :  { %150 = vst.msk [vmem:[#allocation2] sm:$0xff] %vm149_vm7, %v108_v53  ;;  %459 = vrot.lane.b32.xlu1 %v5329_v40, %s4849_s1 }
  0x8c   :  { %457 = vrot.lane.b32.xlu0 %v5334_v39, %s4849_s1  ;;  %v440_v40 = vsel %vm7284_vm6, %v438_v4, %v439_v60  ;;  %v441_v39 = vrot.slane %v4976_v15, 5 }
  0x8d   :  { %v114_v10 = vpop.permute.xlu1 %113 }
  0x8e   :  { %153 = vst.msk [vmem:[#allocation2 + $0x30] sm:$0xff] %vm149_vm7, %v114_v10  ;;  %v110_v53 = vpop.permute.xlu0 %109  ;;  %v5368_v10 = vsel %vm7284_vm6, %v434_v44, %v7229_v21  ;;  %v5376_v4 = vsel %vm7284_vm6, %v441_v39, %v443_v46  ;;  %v5381_v21 = vsel %vm7284_vm6, %v439_v60, %v441_v39  ;;  %v449_v39 = vrot.slane %v5053_v35, 5 }
  0x8f   :  { %151 = vst.msk [vmem:[#allocation2 + $0x10] sm:$0xff] %vm149_vm7, %v110_v53  ;;  %463 = vrot.lane.b32.xlu1 %v5348_v26, %s4849_s1  ;;  %7323 = vst [vmem:[#allocation26_spill] sm:$0xff] %v5368_v10  ;;  %v445_v26 = vrot.slane %v4986_v17, 5 }
  0x90   :  { %461 = vrot.lane.b32.xlu0 %v5353_v29, %s4849_s1  ;;  %7324 = vst [vmem:[#allocation27_spill] sm:$0xff] %v5376_v4  ;;  %v447_v29 = vrot.slane %v4998_v19, 5  ;;  %7325 = vst [vmem:[#allocation28_spill] sm:$0xff] %v5381_v21 }
  0x91   :  { %v118_v52 = vpop.permute.xlu1 %117  ;;  %v5400_v45 = vsel %vm7284_vm6, %v443_v46, %v445_v26 }
  0x92   :  { %155 = vst.msk [vmem:[#allocation2 + $0x50] sm:$0xff] %vm149_vm7, %v118_v52  ;;  %v116_v53 = vpop.permute.xlu0 %115  ;;  %v5386_v52 = vld [vmem:[%s7198_s0 + $0x88] sm:$0xff]  ;;  %7327 = vst [vmem:[#allocation30_spill] sm:$0xff] %v5400_v45 }
  0x93   :  { %154 = vst.msk [vmem:[#allocation2 + $0x40] sm:$0xff] %vm149_vm7, %v116_v53  ;;  %467 = vrot.lane.b32.xlu1 %v440_v40, %s4849_s1  ;;  %v5395_v53 = vsel %vm7284_vm6, %v445_v26, %v447_v29  ;;  %v7237_v60 = vrot.slane %v5386_v52, 5  ;;  %v515_v26 = vrot.slane %v4911_v0, 6 }
  0x94   :  { %465 = vrot.lane.b32.xlu0 %v5368_v10, %s4849_s1  ;;  %7326 = vst [vmem:[#allocation29_spill] sm:$0xff] %v5395_v53 }
  0x95   :  { %v122_v44 = vpop.permute.xlu1 %121 }
  0x96   :  { %158 = vst.msk [vmem:[#allocation2 + $0x70] sm:$0xff] %vm149_vm7, %v122_v44  ;;  %v120_v40 = vpop.permute.xlu0 %119 }
  0x97   :  { %157 = vst.msk [vmem:[#allocation2 + $0x60] sm:$0xf] %vm156_vm8, %v120_v40  ;;  %471 = vrot.lane.b32.xlu1 %v5376_v4, %s4849_s1  ;;  %v5411_v40 = vsel %vm7284_vm6, %v449_v39, %v7237_v60 }
  0x98   :  { %469 = vrot.lane.b32.xlu0 %v5381_v21, %s4849_s1  ;;  %7328 = vst [vmem:[#allocation31_spill] sm:$0xff] %v5411_v40  ;;  %v513_v21 = vrot.slane %v4928_v5, 6 }
  0x99   :  { %v126_v10 = vpop.permute.xlu1 %125 }
  0x9a   :  { %160 = vst.msk [vmem:[#allocation2 + $0x90] sm:$0xff] %vm149_vm7, %v126_v10  ;;  %v124_v44 = vpop.permute.xlu0 %123  ;;  %v5416_v10 = vsel %vm7284_vm6, %v447_v29, %v449_v39  ;;  %v5426_v60 = vsel %vm7288_vm9, %v513_v21, %v515_v26  ;;  %v517_v29 = vrot.slane %v4916_v1, 6  ;;  %v519_v39 = vrot.slane %v4934_v7, 6 }
  0x9b   :  { %159 = vst.msk [vmem:[#allocation2 + $0x80] sm:$0xff] %vm149_vm7, %v124_v44  ;;  %475 = vrot.lane.b32.xlu1 %v5395_v53, %s4849_s1  ;;  %7329 = vst [vmem:[#allocation32_spill] sm:$0xff] %v5416_v10  ;;  %v512_v44 = vrot.slane %v4921_v2, 6 }
  0x9c   :  { %473 = vrot.lane.b32.xlu0 %v5400_v45, %s4849_s1  ;;  %7330 = vst [vmem:[#allocation33_spill] sm:$0xff] %v5426_v60 }
  0x9d   :  { %v130_v46 = vpop.permute.xlu1 %129  ;;  %v514_v4 = vsel %vm7288_vm9, %v512_v44, %v513_v21 }
  0x9e   :  { %162 = vst.msk [vmem:[#allocation2 + $0xb0] sm:$0xff] %vm149_vm7, %v130_v46  ;;  %v128_v53 = vpop.permute.xlu0 %127 }
  0x9f   :  { %161 = vst.msk [vmem:[#allocation2 + $0xa0] sm:$0xff] %vm149_vm7, %v128_v53  ;;  %479 = vrot.lane.b32.xlu1 %v5411_v40, %s4849_s1  ;;  %v5437_v53 = vsel %vm7288_vm9, %v517_v29, %v519_v39  ;;  %v523_v40 = vrot.slane %v4952_v11, 6 }
  0xa0   :  { %477 = vrot.lane.b32.xlu0 %v5416_v10, %s4849_s1  ;;  %7331 = vst [vmem:[#allocation34_spill] sm:$0xff] %v5437_v53  ;;  %v521_v10 = vrot.slane %v4939_v8, 6 }
  0xa1   :  { %v134_v45 = vpop.permute.xlu1 %133 }
  0xa2   :  { %164 = vst.msk [vmem:[#allocation2 + $0xd0] sm:$0xf] %vm156_vm8, %v134_v45  ;;  %v132_v46 = vpop.permute.xlu0 %131  ;;  %v5442_v45 = vsel %vm7288_vm9, %v515_v26, %v517_v29  ;;  %v5456_v29 = vsel %vm7288_vm9, %v519_v39, %v521_v10  ;;  %vm584_vm8 = vcmask 285936  }
  0xa3   :  { %163 = vst.msk [vmem:[#allocation2 + $0xc0] sm:$0xff] %vm149_vm7, %v132_v46  ;;  %544 = vrot.lane.b32.xlu1 %v5426_v60, %s4850_s9  ;;  %7332 = vst [vmem:[#allocation35_spill] sm:$0xff] %v5442_v45  ;;  %v527_v46 = vrot.slane %v4957_v12, 6  ;;  %v528_v60 = vrot.slane %v4962_v13, 6  ;;  %vm502_vm7 = vcmask 240840  }
  0xa4   :  { %542 = vrot.lane.b32.xlu0 %v514_v4, %s4850_s9  ;;  %v5451_v4 = vsel %vm7288_vm9, %v521_v10, %v523_v40  ;;  %7334 = vst [vmem:[#allocation37_spill] sm:$0xff] %v5456_v29  ;;  %v532_v10 = vrot.slane %v4981_v16, 6 }
  0xa5   :  { %v195_v21 = vpop.permute.xlu1 %194  ;;  %7333 = vst [vmem:[#allocation36_spill] sm:$0xff] %v5451_v4 }
  0xa6   :  { %236 = vst.msk [vmem:[#allocation2 + $0x10] sm:$0xff] %vm234_vm10, %v195_v21  ;;  %v193_v44 = vpop.permute.xlu0 %192  ;;  %v7255_v21 = vrot.slane %v5340_v25, 6 }
  0xa7   :  { %235 = vst.msk [vmem:[#allocation2] sm:$0xff] %vm234_vm10, %v193_v44  ;;  %548 = vrot.lane.b32.xlu1 %v5437_v53, %s4850_s9  ;;  %v529_v53 = vsel %vm7288_vm9, %v527_v46, %v528_v60 }
  0xa8   :  { %546 = vrot.lane.b32.xlu0 %v5442_v45, %s4850_s9  ;;  %v530_v45 = vrot.slane %v4976_v15, 6 }
  0xa9   :  { %v199_v26 = vpop.permute.xlu1 %198 }
  0xaa   :  { %238 = vst.msk [vmem:[#allocation2 + $0x30] sm:$0xff] %vm234_vm10, %v199_v26  ;;  %v197_v44 = vpop.permute.xlu0 %196  ;;  %v5471_v26 = vsel %vm7288_vm9, %v523_v40, %v7255_v21  ;;  %v5479_v46 = vsel %vm7288_vm9, %v530_v45, %v532_v10  ;;  %v5484_v21 = vsel %vm7288_vm9, %v528_v60, %v530_v45 }
  0xab   :  { %237 = vst.msk [vmem:[#allocation2 + $0x20] sm:$0xff] %vm234_vm10, %v197_v44  ;;  %552 = vrot.lane.b32.xlu1 %v5451_v4, %s4850_s9  ;;  %7335 = vst [vmem:[#allocation38_spill] sm:$0xff] %v5471_v26  ;;  %v534_v4 = vrot.slane %v4986_v17, 6 }
  0xac   :  { %550 = vrot.lane.b32.xlu0 %v5456_v29, %s4850_s9  ;;  %7336 = vst [vmem:[#allocation39_spill] sm:$0xff] %v5479_v46  ;;  %v536_v29 = vrot.slane %v4998_v19, 6  ;;  %7337 = vst [vmem:[#allocation40_spill] sm:$0xff] %v5484_v21 }
  0xad   :  { %v203_v39 = vpop.permute.xlu1 %202  ;;  %v5498_v45 = vsel %vm7288_vm9, %v532_v10, %v534_v4 }
  0xae   :  { %240 = vst.msk [vmem:[#allocation2 + $0x50] sm:$0xff] %vm234_vm10, %v203_v39  ;;  %v201_v44 = vpop.permute.xlu0 %200  ;;  %7339 = vst [vmem:[#allocation42_spill] sm:$0xff] %v5498_v45 }
  0xaf   :  { %239 = vst.msk [vmem:[#allocation2 + $0x40] sm:$0xff] %vm234_vm10, %v201_v44  ;;  %556 = vrot.lane.b32.xlu1 %v529_v53, %s4850_s9  ;;  %v5493_v53 = vsel %vm7288_vm9, %v534_v4, %v536_v29  ;;  %v538_v44 = vrot.slane %v5053_v35, 6  ;;  %v604_v4 = vrot.slane %v4911_v0, 7 }
  0xb0   :  { %554 = vrot.lane.b32.xlu0 %v5471_v26, %s4850_s9  ;;  %7338 = vst [vmem:[#allocation41_spill] sm:$0xff] %v5493_v53  ;;  %v7261_v26 = vrot.slane %v5386_v52, 6 }
  0xb1   :  { %v207_v40 = vpop.permute.xlu1 %206 }
  0xb2   :  { %243 = vst.msk [vmem:[#allocation2 + $0x70] sm:$0xff] %vm234_vm10, %v207_v40  ;;  %v205_v39 = vpop.permute.xlu0 %204 }
  0xb3   :  { %242 = vst.msk [vmem:[#allocation2 + $0x60] sm:$0xf] %vm241_vm11, %v205_v39  ;;  %560 = vrot.lane.b32.xlu1 %v5479_v46, %s4850_s9  ;;  %v5509_v39 = vsel %vm7288_vm9, %v538_v44, %v7261_v26  ;;  %v617_v46 = vrot.slane %v4962_v13, 7 }
  0xb4   :  { %558 = vrot.lane.b32.xlu0 %v5484_v21, %s4850_s9  ;;  %7340 = vst [vmem:[#allocation43_spill] sm:$0xff] %v5509_v39  ;;  %v602_v21 = vrot.slane %v4928_v5, 7 }
  0xb5   :  { %v211_v60 = vpop.permute.xlu1 %210 }
  0xb6   :  { %245 = vst.msk [vmem:[#allocation2 + $0x90] sm:$0xff] %vm234_vm10, %v211_v60  ;;  %v209_v40 = vpop.permute.xlu0 %208  ;;  %v5514_v60 = vsel %vm7288_vm9, %v536_v29, %v538_v44  ;;  %v5524_v26 = vsel %vm7287_vm12, %v602_v21, %v604_v4  ;;  %v606_v29 = vrot.slane %v4916_v1, 7  ;;  %v608_v44 = vrot.slane %v4934_v7, 7 }
  0xb7   :  { %244 = vst.msk [vmem:[#allocation2 + $0x80] sm:$0xff] %vm234_vm10, %v209_v40  ;;  %564 = vrot.lane.b32.xlu1 %v5493_v53, %s4850_s9  ;;  %7341 = vst [vmem:[#allocation44_spill] sm:$0xff] %v5514_v60  ;;  %v601_v40 = vrot.slane %v4921_v2, 7 }
  0xb8   :  { %562 = vrot.lane.b32.xlu0 %v5498_v45, %s4850_s9 }
  0xb9   :  { %v215_v10 = vpop.permute.xlu1 %214  ;;  %v603_v2 = vsel %vm7287_vm12, %v601_v40, %v602_v21 }
  0xba   :  { %247 = vst.msk [vmem:[#allocation2 + $0xb0] sm:$0xff] %vm234_vm10, %v215_v10  ;;  %v213_v53 = vpop.permute.xlu0 %212 }
  0xbb   :  { %246 = vst.msk [vmem:[#allocation2 + $0xa0] sm:$0xff] %vm234_vm10, %v213_v53  ;;  %568 = vrot.lane.b32.xlu1 %v5509_v39, %s4850_s9  ;;  %v5535_v53 = vsel %vm7287_vm12, %v606_v29, %v608_v44  ;;  %v612_v39 = vrot.slane %v4952_v11, 7 }
  0xbc   :  { %566 = vrot.lane.b32.xlu0 %v5514_v60, %s4850_s9  ;;  %7342 = vst [vmem:[#allocation45_spill] sm:$0xff] %v5535_v53  ;;  %v610_v60 = vrot.slane %v4939_v8, 7 }
  0xbd   :  { %v219_v45 = vpop.permute.xlu1 %218 }
  0xbe   :  { %249 = vst.msk [vmem:[#allocation2 + $0xd0] sm:$0xf] %vm241_vm11, %v219_v45  ;;  %v217_v10 = vpop.permute.xlu0 %216  ;;  %v5540_v45 = vsel %vm7287_vm12, %v604_v4, %v606_v29  ;;  %v5554_v29 = vsel %vm7287_vm12, %v608_v44, %v610_v60  ;;  %vm673_vm11 = vcmask 326936  }
  0xbf   :  { %248 = vst.msk [vmem:[#allocation2 + $0xc0] sm:$0xff] %vm234_vm10, %v217_v10  ;;  %633 = vrot.lane.b32.xlu1 %v5524_v26, %s4851_s10  ;;  %v616_v10 = vrot.slane %v4957_v12, 7  ;;  %7344 = vst [vmem:[#allocation47_spill] sm:$0xff] %v5554_v29  ;;  %vm591_vm10 = vcmask 281840  }
  0xc0   :  { %631 = vrot.lane.b32.xlu0 %v603_v2, %s4851_s10  ;;  %v5549_v2 = vsel %vm7287_vm12, %v610_v60, %v612_v39  ;;  %v621_v60 = vrot.slane %v4981_v16, 7 }
  0xc1   :  { %v280_v21 = vpop.permute.xlu1 %279  ;;  %7343 = vst [vmem:[#allocation46_spill] sm:$0xff] %v5549_v2  ;;  %v618_v12 = vsel %vm7287_vm12, %v616_v10, %v617_v46 }
  0xc2   :  { %321 = vst.msk [vmem:[#allocation2 + $0x10] sm:$0xff] %vm319_vm13, %v280_v21  ;;  %v278_v40 = vpop.permute.xlu0 %277  ;;  %v7276_v21 = vrot.slane %v5340_v25, 7 }
  0xc3   :  { %320 = vst.msk [vmem:[#allocation2] sm:$0xff] %vm319_vm13, %v278_v40  ;;  %637 = vrot.lane.b32.xlu1 %v5535_v53, %s4851_s10  ;;  %v619_v53 = vrot.slane %v4976_v15, 7 }
  0xc4   :  { %635 = vrot.lane.b32.xlu0 %v5540_v45, %s4851_s10 }
  0xc5   :  { %v284_v4 = vpop.permute.xlu1 %283  ;;  %v5577_v10 = vsel %vm7287_vm12, %v619_v53, %v621_v60 }
  0xc6   :  { %323 = vst.msk [vmem:[#allocation2 + $0x30] sm:$0xff] %vm319_vm13, %v284_v4  ;;  %v282_v40 = vpop.permute.xlu0 %281  ;;  %v5569_v4 = vsel %vm7287_vm12, %v612_v39, %v7276_v21  ;;  %v5582_v21 = vsel %vm7287_vm12, %v617_v46, %v619_v53 }
  0xc7   :  { %322 = vst.msk [vmem:[#allocation2 + $0x20] sm:$0xff] %vm319_vm13, %v282_v40  ;;  %641 = vrot.lane.b32.xlu1 %v5549_v2, %s4851_s10  ;;  %7345 = vst [vmem:[#allocation48_spill] sm:$0xff] %v5569_v4  ;;  %v623_v2 = vrot.slane %v4986_v17, 7 }
  0xc8   :  { %639 = vrot.lane.b32.xlu0 %v5554_v29, %s4851_s10  ;;  %v625_v29 = vrot.slane %v4998_v19, 7  ;;  %7346 = vst [vmem:[#allocation49_spill] sm:$0xff] %v5582_v21 }
  0xc9   :  { %v288_v44 = vpop.permute.xlu1 %287  ;;  %v5596_v53 = vsel %vm7287_vm12, %v621_v60, %v623_v2 }
  0xca   :  { %325 = vst.msk [vmem:[#allocation2 + $0x50] sm:$0xff] %vm319_vm13, %v288_v44  ;;  %v286_v40 = vpop.permute.xlu0 %285 }
  0xcb   :  { %324 = vst.msk [vmem:[#allocation2 + $0x40] sm:$0xff] %vm319_vm13, %v286_v40  ;;  %645 = vrot.lane.b32.xlu1 %v618_v12, %s4851_s10  ;;  %v5591_v12 = vsel %vm7287_vm12, %v623_v2, %v625_v29  ;;  %v627_v40 = vrot.slane %v5053_v35, 7 }
  0xcc   :  { %643 = vrot.lane.b32.xlu0 %v5569_v4, %s4851_s10  ;;  %v7280_v4 = vrot.slane %v5386_v52, 7 }
  0xcd   :  { %v292_v39 = vpop.permute.xlu1 %291  ;;  %v5610_v2 = vsel %vm7287_vm12, %v625_v29, %v627_v40 }
  0xce   :  { %328 = vst.msk [vmem:[#allocation2 + $0x70] sm:$0xff] %vm319_vm13, %v292_v39  ;;  %v290_v44 = vpop.permute.xlu0 %289 }
  0xcf   :  { %327 = vst.msk [vmem:[#allocation2 + $0x60] sm:$0xf] %vm326_vm14, %v290_v44  ;;  %649 = vrot.lane.b32.xlu1 %v5577_v10, %s4851_s10  ;;  %v5607_v44 = vsel %vm7287_vm12, %v627_v40, %v7280_v4  ;;  %v4760_v4 = vld [vmem:[#allocation3 + $0x1c] ss:$12 sps:$4 sm:$0xff]  }
  0xd0   :  { %647 = vrot.lane.b32.xlu0 %v5582_v21, %s4851_s10 }
  0xd1   :  { %v296_v46 = vpop.permute.xlu1 %295 }
  0xd2   :  { %330 = vst.msk [vmem:[#allocation2 + $0x90] sm:$0xff] %vm319_vm13, %v296_v46  ;;  %v294_v39 = vpop.permute.xlu0 %293 }
  0xd3   :  { %329 = vst.msk [vmem:[#allocation2 + $0x80] sm:$0xff] %vm319_vm13, %v294_v39  ;;  %653 = vrot.lane.b32.xlu1 %v5591_v12, %s4851_s10 }
  0xd4   :  { %651 = vrot.lane.b32.xlu0 %v5596_v53, %s4851_s10 }
  0xd5   :  { %v300_v21 = vpop.permute.xlu1 %299 }
  0xd6   :  { %332 = vst.msk [vmem:[#allocation2 + $0xb0] sm:$0xff] %vm319_vm13, %v300_v21  ;;  %v298_v60 = vpop.permute.xlu0 %297 }
  0xd7   :  { %331 = vst.msk [vmem:[#allocation2 + $0xa0] sm:$0xff] %vm319_vm13, %v298_v60  ;;  %657 = vrot.lane.b32.xlu1 %v5607_v44, %s4851_s10 }
  0xd8   :  { %655 = vrot.lane.b32.xlu0 %v5610_v2, %s4851_s10 }
  0xd9   :  { %v304_v46 = vpop.permute.xlu1 %303 }
  0xda   :  { %334 = vst.msk [vmem:[#allocation2 + $0xd0] sm:$0xf] %vm326_vm14, %v304_v46  ;;  %v302_v39 = vpop.permute.xlu0 %301  ;;  %vm731_vm14 = vcmask 367936  }
  0xdb   :  { %333 = vst.msk [vmem:[#allocation2 + $0xc0] sm:$0xff] %vm319_vm13, %v302_v39  ;;  %691 = vrot.lane.b32.xlu1 %v4911_v0, %s4852_s11  ;;  %vm680_vm13 = vcmask 322840  }
  0xdc   :  { %689 = vrot.lane.b32.xlu0 %v4928_v5, %s4852_s11 }
  0xdd   :  { %v365_v29 = vpop.permute.xlu1 %364 }
  0xde   :  { %406 = vst.msk [vmem:[#allocation2 + $0x10] sm:$0xff] %vm404_vm15, %v365_v29  ;;  %v363_v21 = vpop.permute.xlu0 %362 }
  0xdf   :  { %405 = vst.msk [vmem:[#allocation2] sm:$0xff] %vm404_vm15, %v363_v21  ;;  %695 = vrot.lane.b32.xlu1 %v4934_v7, %s4852_s11 }
  0xe0   :  { %693 = vrot.lane.b32.xlu0 %v4916_v1, %s4852_s11 }
  0xe1   :  { %v369_v40 = vpop.permute.xlu1 %368 }
  0xe2   :  { %408 = vst.msk [vmem:[#allocation2 + $0x30] sm:$0xff] %vm404_vm15, %v369_v40  ;;  %v367_v60 = vpop.permute.xlu0 %366 }
  0xe3   :  { %407 = vst.msk [vmem:[#allocation2 + $0x20] sm:$0xff] %vm404_vm15, %v367_v60  ;;  %699 = vrot.lane.b32.xlu1 %v4952_v11, %s4852_s11 }
  0xe4   :  { %697 = vrot.lane.b32.xlu0 %v4939_v8, %s4852_s11 }
  0xe5   :  { %v373_v5 = vpop.permute.xlu1 %372 }
  0xe6   :  { %410 = vst.msk [vmem:[#allocation2 + $0x50] sm:$0xff] %vm404_vm15, %v373_v5  ;;  %v371_v46 = vpop.permute.xlu0 %370 }
  0xe7   :  { %409 = vst.msk [vmem:[#allocation2 + $0x40] sm:$0xff] %vm404_vm15, %v371_v46  ;;  %703 = vrot.lane.b32.xlu1 %v4962_v13, %s4852_s11 }
  0xe8   :  { %701 = vrot.lane.b32.xlu0 %v5340_v25, %s4852_s11 }
  0xe9   :  { %v377_v39 = vpop.permute.xlu1 %376 }
  0xea   :  { %413 = vst.msk [vmem:[#allocation2 + $0x70] sm:$0xff] %vm404_vm15, %v377_v39  ;;  %v375_v29 = vpop.permute.xlu0 %374  ;;  %v5667_v39 = vrot.slane %v5340_v25, 1 }
  0xeb   :  { %412 = vst.msk [vmem:[#allocation2 + $0x60] sm:$0xf] %vm411_vm0, %v375_v29  ;;  %707 = vrot.lane.b32.xlu1 %v4981_v16, %s4852_s11 }
  0xec   :  { %705 = vrot.lane.b32.xlu0 %v4976_v15, %s4852_s11 }
  0xed   :  { %v381_v21 = vpop.permute.xlu1 %380 }
  0xee   :  { %415 = vst.msk [vmem:[#allocation2 + $0x90] sm:$0xff] %vm404_vm15, %v381_v21  ;;  %v379_v13 = vpop.permute.xlu0 %378 }
  0xef   :  { %414 = vst.msk [vmem:[#allocation2 + $0x80] sm:$0xff] %vm404_vm15, %v379_v13  ;;  %711 = vrot.lane.b32.xlu1 %v4998_v19, %s4852_s11  ;;  %v5678_v13 = vsel %vm7289_vm1, %v5012_v22, %v5667_v39 }
  0xf0   :  { %709 = vrot.lane.b32.xlu0 %v4986_v17, %s4852_s11 }
  0xf1   :  { %v385_v40 = vpop.permute.xlu1 %384 }
  0xf2   :  { %417 = vst.msk [vmem:[#allocation2 + $0xb0] sm:$0xff] %vm404_vm15, %v385_v40  ;;  %v383_v60 = vpop.permute.xlu0 %382 }
  0xf3   :  { %416 = vst.msk [vmem:[#allocation2 + $0xa0] sm:$0xff] %vm404_vm15, %v383_v60  ;;  %715 = vrot.lane.b32.xlu1 %v5386_v52, %s4852_s11 }
  0xf4   :  { %713 = vrot.lane.b32.xlu0 %v5053_v35, %s4852_s11 }
  0xf5   :  { %v389_v5 = vpop.permute.xlu1 %388 }
  0xf6   :  { %419 = vst.msk [vmem:[#allocation2 + $0xd0] sm:$0xf] %vm411_vm0, %v389_v5  ;;  %v387_v46 = vpop.permute.xlu0 %386  ;;  %vm793_vm0 = vcmask 408936  }
  0xf7   :  { %418 = vst.msk [vmem:[#allocation2 + $0xc0] sm:$0xff] %vm404_vm15, %v387_v46  ;;  %753 = vrot.lane.b32.xlu1 %v4971_v14, %s4853_s12  ;;  %vm738_vm15 = vcmask 363840  }
  0xf8   :  { %751 = vrot.lane.b32.xlu0 %v5017_v23, %s4853_s12 }
  0xf9   :  { %v456_v29 = vpop.permute.xlu1 %455 }
  0xfa   :  { %497 = vst.msk [vmem:[#allocation2 + $0x10] sm:$0xff] %vm495_vm3, %v456_v29  ;;  %v454_v21 = vpop.permute.xlu0 %453 }
  0xfb   :  { %496 = vst.msk [vmem:[#allocation2] sm:$0xff] %vm495_vm3, %v454_v21  ;;  %757 = vrot.lane.b32.xlu1 %v5030_v27, %s4853_s12  ;;  %v5699_v21 = vrot.slane %v5386_v52, 1 }
  0xfc   :  { %755 = vrot.lane.b32.xlu0 %v5008_v20, %s4853_s12 }
  0xfd   :  { %v460_v23 = vpop.permute.xlu1 %459 }
  0xfe   :  { %499 = vst.msk [vmem:[#allocation2 + $0x30] sm:$0xff] %vm495_vm3, %v460_v23  ;;  %v458_v40 = vpop.permute.xlu0 %457 }
  0xff   :  { %498 = vst.msk [vmem:[#allocation2 + $0x20] sm:$0xff] %vm495_vm3, %v458_v40  ;;  %761 = vrot.lane.b32.xlu1 %v5678_v13, %s4853_s12  ;;  %v5710_v40 = vsel %vm7289_vm1, %v5066_v38, %v5699_v21  ;;  %v5725_v38 = vrot.slane %v5340_v25, 2 }
 0x100   :  { %759 = vrot.lane.b32.xlu0 %v5025_v24, %s4853_s12 }
 0x101   :  { %v464_v60 = vpop.permute.xlu1 %463 }
 0x102   :  { %501 = vst.msk [vmem:[#allocation2 + $0x50] sm:$0xff] %vm495_vm3, %v464_v60  ;;  %v462_v5 = vpop.permute.xlu0 %461 }
 0x103   :  { %500 = vst.msk [vmem:[#allocation2 + $0x40] sm:$0xff] %vm495_vm3, %v462_v5  ;;  %765 = vrot.lane.b32.xlu1 %v5048_v34, %s4853_s12 }
 0x104   :  { %763 = vrot.lane.b32.xlu0 %v5667_v39, %s4853_s12 }
 0x105   :  { %v468_v22 = vpop.permute.xlu1 %467 }
 0x106   :  { %504 = vst.msk [vmem:[#allocation2 + $0x70] sm:$0xff] %vm495_vm3, %v468_v22  ;;  %v466_v46 = vpop.permute.xlu0 %465 }
 0x107   :  { %503 = vst.msk [vmem:[#allocation2 + $0x60] sm:$0xf] %vm502_vm7, %v466_v46  ;;  %769 = vrot.lane.b32.xlu1 %v5063_v37, %s4853_s12 }
 0x108   :  { %767 = vrot.lane.b32.xlu0 %v5043_v31, %s4853_s12 }
 0x109   :  { %v472_v29 = vpop.permute.xlu1 %471 }
 0x10a   :  { %506 = vst.msk [vmem:[#allocation2 + $0x90] sm:$0xff] %vm495_vm3, %v472_v29  ;;  %v470_v34 = vpop.permute.xlu0 %469 }
 0x10b   :  { %505 = vst.msk [vmem:[#allocation2 + $0x80] sm:$0xff] %vm495_vm3, %v470_v34  ;;  %773 = vrot.lane.b32.xlu1 %v5076_v41, %s4853_s12  ;;  %v5736_v34 = vsel %vm7283_vm2, %v5099_v49, %v5725_v38 }
 0x10c   :  { %771 = vrot.lane.b32.xlu0 %v5060_v36, %s4853_s12 }
 0x10d   :  { %v476_v23 = vpop.permute.xlu1 %475 }
 0x10e   :  { %508 = vst.msk [vmem:[#allocation2 + $0xb0] sm:$0xff] %vm495_vm3, %v476_v23  ;;  %v474_v60 = vpop.permute.xlu0 %473 }
 0x10f   :  { %507 = vst.msk [vmem:[#allocation2 + $0xa0] sm:$0xff] %vm495_vm3, %v474_v60  ;;  %777 = vrot.lane.b32.xlu1 %v5699_v21, %s4853_s12 }
 0x110   :  { %775 = vrot.lane.b32.xlu0 %v5710_v40, %s4853_s12 }
 0x111   :  { %v480_v5 = vpop.permute.xlu1 %479 }
 0x112   :  { %510 = vst.msk [vmem:[#allocation2 + $0xd0] sm:$0xf] %vm502_vm7, %v480_v5  ;;  %v478_v22 = vpop.permute.xlu0 %477  ;;  %vm855_vm7 = vcmask 449936  }
 0x113   :  { %509 = vst.msk [vmem:[#allocation2 + $0xc0] sm:$0xff] %vm495_vm3, %v478_v22  ;;  %815 = vrot.lane.b32.xlu1 %v5102_v50, %s4854_s13  ;;  %vm800_vm3 = vcmask 404840  }
 0x114   :  { %813 = vrot.lane.b32.xlu0 %v5084_v43, %s4854_s13 }
 0x115   :  { %v545_v46 = vpop.permute.xlu1 %544 }
 0x116   :  { %586 = vst.msk [vmem:[#allocation2 + $0x10] sm:$0xff] %vm584_vm8, %v545_v46  ;;  %v543_v29 = vpop.permute.xlu0 %542 }
 0x117   :  { %585 = vst.msk [vmem:[#allocation2] sm:$0xff] %vm584_vm8, %v543_v29  ;;  %819 = vrot.lane.b32.xlu1 %v5115_v54, %s4854_s13  ;;  %v5757_v29 = vrot.slane %v5386_v52, 2 }
 0x118   :  { %817 = vrot.lane.b32.xlu0 %v5095_v47, %s4854_s13 }
 0x119   :  { %v549_v43 = vpop.permute.xlu1 %548 }
 0x11a   :  { %588 = vst.msk [vmem:[#allocation2 + $0x30] sm:$0xff] %vm584_vm8, %v549_v43  ;;  %v547_v23 = vpop.permute.xlu0 %546 }
 0x11b   :  { %587 = vst.msk [vmem:[#allocation2 + $0x20] sm:$0xff] %vm584_vm8, %v547_v23  ;;  %823 = vrot.lane.b32.xlu1 %v5736_v34, %s4854_s13  ;;  %v5768_v23 = vsel %vm7283_vm2, %v5146_v3, %v5757_v29  ;;  %v5783_v3 = vrot.slane %v5340_v25, 3 }
 0x11c   :  { %821 = vrot.lane.b32.xlu0 %v5110_v51, %s4854_s13 }
 0x11d   :  { %v553_v60 = vpop.permute.xlu1 %552 }
 0x11e   :  { %590 = vst.msk [vmem:[#allocation2 + $0x50] sm:$0xff] %vm584_vm8, %v553_v60  ;;  %v551_v5 = vpop.permute.xlu0 %550 }
 0x11f   :  { %589 = vst.msk [vmem:[#allocation2 + $0x40] sm:$0xff] %vm584_vm8, %v551_v5  ;;  %827 = vrot.lane.b32.xlu1 %v5133_v61, %s4854_s13 }
 0x120   :  { %825 = vrot.lane.b32.xlu0 %v5725_v38, %s4854_s13 }
 0x121   :  { %v557_v49 = vpop.permute.xlu1 %556 }
 0x122   :  { %593 = vst.msk [vmem:[#allocation2 + $0x70] sm:$0xff] %vm584_vm8, %v557_v49  ;;  %v555_v22 = vpop.permute.xlu0 %554 }
 0x123   :  { %592 = vst.msk [vmem:[#allocation2 + $0x60] sm:$0xf] %vm591_vm10, %v555_v22  ;;  %831 = vrot.lane.b32.xlu1 %v5143_v63, %s4854_s13 }
 0x124   :  { %829 = vrot.lane.b32.xlu0 %v5128_v58, %s4854_s13 }
 0x125   :  { %v561_v46 = vpop.permute.xlu1 %560 }
 0x126   :  { %595 = vst.msk [vmem:[#allocation2 + $0x90] sm:$0xff] %vm584_vm8, %v561_v46  ;;  %v559_v61 = vpop.permute.xlu0 %558 }
 0x127   :  { %594 = vst.msk [vmem:[#allocation2 + $0x80] sm:$0xff] %vm584_vm8, %v559_v61  ;;  %835 = vrot.lane.b32.xlu1 %v5156_v9, %s4854_s13  ;;  %v5794_v61 = vsel %vm7285_vm4, %v5177_v30, %v5783_v3 }
 0x128   :  { %833 = vrot.lane.b32.xlu0 %v5140_v62, %s4854_s13 }
 0x129   :  { %v565_v43 = vpop.permute.xlu1 %564 }
 0x12a   :  { %597 = vst.msk [vmem:[#allocation2 + $0xb0] sm:$0xff] %vm584_vm8, %v565_v43  ;;  %v563_v60 = vpop.permute.xlu0 %562 }
 0x12b   :  { %596 = vst.msk [vmem:[#allocation2 + $0xa0] sm:$0xff] %vm584_vm8, %v563_v60  ;;  %839 = vrot.lane.b32.xlu1 %v5757_v29, %s4854_s13 }
 0x12c   :  { %837 = vrot.lane.b32.xlu0 %v5768_v23, %s4854_s13 }
 0x12d   :  { %v569_v5 = vpop.permute.xlu1 %568 }
 0x12e   :  { %599 = vst.msk [vmem:[#allocation2 + $0xd0] sm:$0xf] %vm591_vm10, %v569_v5  ;;  %v567_v49 = vpop.permute.xlu0 %566  ;;  %vm917_vm10 = vcmask 490936  }
 0x12f   :  { %598 = vst.msk [vmem:[#allocation2 + $0xc0] sm:$0xff] %vm584_vm8, %v567_v49  ;;  %877 = vrot.lane.b32.xlu1 %v5180_v32, %s4855_s14  ;;  %vm862_vm8 = vcmask 445840  }
 0x130   :  { %875 = vrot.lane.b32.xlu0 %v5164_v18, %s4855_s14 }
 0x131   :  { %v634_v22 = vpop.permute.xlu1 %633 }
 0x132   :  { %675 = vst.msk [vmem:[#allocation2 + $0x10] sm:$0xff] %vm673_vm11, %v634_v22  ;;  %v632_v46 = vpop.permute.xlu0 %631 }
 0x133   :  { %674 = vst.msk [vmem:[#allocation2] sm:$0xff] %vm673_vm11, %v632_v46  ;;  %881 = vrot.lane.b32.xlu1 %v5193_v42, %s4855_s14  ;;  %v5815_v46 = vrot.slane %v5386_v52, 3 }
 0x134   :  { %879 = vrot.lane.b32.xlu0 %v5173_v28, %s4855_s14 }
 0x135   :  { %v638_v18 = vpop.permute.xlu1 %637 }
 0x136   :  { %677 = vst.msk [vmem:[#allocation2 + $0x30] sm:$0xff] %vm673_vm11, %v638_v18  ;;  %v636_v43 = vpop.permute.xlu0 %635 }
 0x137   :  { %676 = vst.msk [vmem:[#allocation2 + $0x20] sm:$0xff] %vm673_vm11, %v636_v43  ;;  %885 = vrot.lane.b32.xlu1 %v5794_v61, %s4855_s14  ;;  %v5826_v43 = vsel %vm7285_vm4, %v5224_v59, %v5815_v46  ;;  %v7347_v59 = vld [vmem:[#allocation12_spill] sm:$0xff] }
 0x138   :  { %883 = vrot.lane.b32.xlu0 %v5188_v33, %s4855_s14 }
 0x139   :  { %v642_v60 = vpop.permute.xlu1 %641 }
 0x13a   :  { %679 = vst.msk [vmem:[#allocation2 + $0x50] sm:$0xff] %vm673_vm11, %v642_v60  ;;  %v640_v5 = vpop.permute.xlu0 %639 }
 0x13b   :  { %678 = vst.msk [vmem:[#allocation2 + $0x40] sm:$0xff] %vm673_vm11, %v640_v5  ;;  %889 = vrot.lane.b32.xlu1 %v5211_v55, %s4855_s14 }
 0x13c   :  { %887 = vrot.lane.b32.xlu0 %v5783_v3, %s4855_s14 }
 0x13d   :  { %v646_v30 = vpop.permute.xlu1 %645 }
 0x13e   :  { %682 = vst.msk [vmem:[#allocation2 + $0x70] sm:$0xff] %vm673_vm11, %v646_v30  ;;  %v644_v49 = vpop.permute.xlu0 %643 }
 0x13f   :  { %681 = vst.msk [vmem:[#allocation2 + $0x60] sm:$0xf] %vm680_vm13, %v644_v49  ;;  %893 = vrot.lane.b32.xlu1 %v5221_v57, %s4855_s14  ;;  %v7348_v49 = vld [vmem:[#allocation9_spill] sm:$0xff] }
 0x140   :  { %891 = vrot.lane.b32.xlu0 %v5206_v48, %s4855_s14 }
 0x141   :  { %v650_v22 = vpop.permute.xlu1 %649 }
 0x142   :  { %684 = vst.msk [vmem:[#allocation2 + $0x90] sm:$0xff] %vm673_vm11, %v650_v22  ;;  %v648_v55 = vpop.permute.xlu0 %647 }
 0x143   :  { %683 = vst.msk [vmem:[#allocation2 + $0x80] sm:$0xff] %vm673_vm11, %v648_v55  ;;  %897 = vrot.lane.b32.xlu1 %v5234_v6, %s4855_s14 }
 0x144   :  { %895 = vrot.lane.b32.xlu0 %v5218_v56, %s4855_s14 }
 0x145   :  { %v654_v18 = vpop.permute.xlu1 %653 }
 0x146   :  { %686 = vst.msk [vmem:[#allocation2 + $0xb0] sm:$0xff] %vm673_vm11, %v654_v18  ;;  %v652_v60 = vpop.permute.xlu0 %651  ;;  %v7349_v18 = vld [vmem:[#allocation21_spill] sm:$0xff] }
 0x147   :  { %685 = vst.msk [vmem:[#allocation2 + $0xa0] sm:$0xff] %vm673_vm11, %v652_v60  ;;  %901 = vrot.lane.b32.xlu1 %v5815_v46, %s4855_s14  ;;  %v7350_v60 = vld [vmem:[#allocation10_spill] sm:$0xff] }
 0x148   :  { %899 = vrot.lane.b32.xlu0 %v5826_v43, %s4855_s14 }
 0x149   :  { %v658_v5 = vpop.permute.xlu1 %657 }
 0x14a   :  { %688 = vst.msk [vmem:[#allocation2 + $0xd0] sm:$0xf] %vm680_vm13, %v658_v5  ;;  %v656_v30 = vpop.permute.xlu0 %655  ;;  %vm979_vm13 = vcmask 531936  }
 0x14b   :  { %687 = vst.msk [vmem:[#allocation2 + $0xc0] sm:$0xff] %vm673_vm11, %v656_v30  ;;  %939 = vrot.lane.b32.xlu1 %v7347_v59, %s4856_s15  ;;  %vm924_vm11 = vcmask 486840  }
 0x14c   :  { %937 = vrot.lane.b32.xlu0 %v7348_v49, %s4856_s15  ;;  %v7351_v49 = vld [vmem:[#allocation33_spill] sm:$0xff] }
 0x14d   :  { %v692_v22 = vpop.permute.xlu1 %691 }
 0x14e   :  { %733 = vst.msk [vmem:[#allocation2 + $0x10] sm:$0xff] %vm731_vm14, %v692_v22  ;;  %v690_v55 = vpop.permute.xlu0 %689  ;;  %v7352_v22 = vld [vmem:[#allocation23_spill] sm:$0xff] }
 0x14f   :  { %732 = vst.msk [vmem:[#allocation2] sm:$0xff] %vm731_vm14, %v690_v55  ;;  %1001 = vrot.lane.b32.xlu1 %v7349_v18, %s4857_s16 }
 0x150   :  { %941 = vrot.lane.b32.xlu0 %v7350_v60, %s4856_s15 }
 0x151   :  { %v696_v5 = vpop.permute.xlu1 %695 }
 0x152   :  { %735 = vst.msk [vmem:[#allocation2 + $0x30] sm:$0xff] %vm731_vm14, %v696_v5  ;;  %v694_v30 = vpop.permute.xlu0 %693  ;;  %v7353_v5 = vld [vmem:[#allocation35_spill] sm:$0xff] }
 0x153   :  { %734 = vst.msk [vmem:[#allocation2 + $0x20] sm:$0xff] %vm731_vm14, %v694_v30  ;;  %1063 = vrot.lane.b32.xlu1 %v7351_v49, %s4858_s17 }
 0x154   :  { %1003 = vrot.lane.b32.xlu0 %v7352_v22, %s4857_s16 }
 0x155   :  { %v700_v55 = vpop.permute.xlu1 %699 }
 0x156   :  { %737 = vst.msk [vmem:[#allocation2 + $0x50] sm:$0xff] %vm731_vm14, %v700_v55  ;;  %v698_v18 = vpop.permute.xlu0 %697 }
 0x157   :  { %736 = vst.msk [vmem:[#allocation2 + $0x40] sm:$0xff] %vm731_vm14, %v698_v18  ;;  %1125 = vrot.lane.b32.xlu1 %v5524_v26, %s4859_s18 }
 0x158   :  { %1065 = vrot.lane.b32.xlu0 %v7353_v5, %s4858_s17 }
 0x159   :  { %v704_v30 = vpop.permute.xlu1 %703 }
 0x15a   :  { %740 = vst.msk [vmem:[#allocation2 + $0x70] sm:$0xff] %vm731_vm14, %v704_v30  ;;  %v702_v49 = vpop.permute.xlu0 %701 }
 0x15b   :  { %739 = vst.msk [vmem:[#allocation2 + $0x60] sm:$0xf] %vm738_vm15, %v702_v49  ;;  %1183 = vrot.lane.b32.xlu1 %v4911_v0, %s4860_s19 }
 0x15c   :  { %1127 = vrot.lane.b32.xlu0 %v5540_v45, %s4859_s18 }
 0x15d   :  { %v708_v55 = vpop.permute.xlu1 %707 }
 0x15e   :  { %742 = vst.msk [vmem:[#allocation2 + $0x90] sm:$0xff] %vm731_vm14, %v708_v55  ;;  %v706_v26 = vpop.permute.xlu0 %705  ;;  %v7354_v55 = vld [vmem:[#allocation14_spill] sm:$0xff] }
 0x15f   :  { %741 = vst.msk [vmem:[#allocation2 + $0x80] sm:$0xff] %vm731_vm14, %v706_v26  ;;  %1245 = vrot.lane.b32.xlu1 %v4971_v14, %s4861_s20  ;;  %v1961_v26 = vld [vmem:[#allocation3] sm:$0xff] }
 0x160   :  { %1185 = vrot.lane.b32.xlu0 %v4916_v1, %s4860_s19 }
 0x161   :  { %v712_v18 = vpop.permute.xlu1 %711 }
 0x162   :  { %744 = vst.msk [vmem:[#allocation2 + $0xb0] sm:$0xff] %vm731_vm14, %v712_v18  ;;  %v710_v0 = vpop.permute.xlu0 %709  ;;  %v1963_v18 = vld [vmem:[#allocation3 + $0xc] sm:$0xff] }
 0x163   :  { %743 = vst.msk [vmem:[#allocation2 + $0xa0] sm:$0xff] %vm731_vm14, %v710_v0  ;;  %1307 = vrot.lane.b32.xlu1 %v5102_v50, %s4862_s21  ;;  %v4757_v0 = vld [vmem:[#allocation3 + $0x4] ss:$12 sps:$4 sm:$0xff]  }
 0x164   :  { %1247 = vrot.lane.b32.xlu0 %v5008_v20, %s4861_s20  ;;  %2178 = vmatprep.subr.bf16.mxu0 %v4757_v0 }
 0x165   :  { %v716_v30 = vpop.permute.xlu1 %715 }
 0x166   :  { %746 = vst.msk [vmem:[#allocation2 + $0xd0] sm:$0xf] %vm738_vm15, %v716_v30  ;;  %v714_v14 = vpop.permute.xlu0 %713  ;;  %v7281_v30 = vmov 0   ;;  %vm1105_vm15 = vcmask 613936  }
 0x167   :  { %745 = vst.msk [vmem:[#allocation2 + $0xc0] sm:$0xff] %vm731_vm14, %v714_v14  ;;  %1369 = vrot.lane.b32.xlu1 %v5180_v32, %s4863_s24  ;;  %2279 = vmatprep.subr.bf16.mxu1 %v7281_v30  ;;  %v4759_v14 = vld [vmem:[#allocation3 + $0x8] ss:$12 sps:$4 sm:$0xff]   ;;  %vm7298_vm14 = vcmask 572936  }
 0x168   :  { %1309 = vrot.lane.b32.xlu0 %v5095_v47, %s4862_s21  ;;  %v4672_v47 = vcombine.low %v1961_v26, %v1963_v18  ;;  %2280 = vmatpush1.bf16.msra.mxu1 %v4759_v14  ;;  %v1971_v14 = vld [vmem:[#allocation3 + $0x3c] sm:$0xff] }
 0x169   :  { %v754_v49 = vpop.permute.xlu1 %753  ;;  %2281 = vmatprep.subr.bf16.mxu1 %v7281_v30 }
 0x16a   :  { %795 = vst.msk [vmem:[#allocation2 + $0x10] sm:$0xff] %vm793_vm0, %v754_v49  ;;  %v752_v50 = vpop.permute.xlu0 %751  ;;  %2179 = vmatpush1.bf16.msra.mxu0 %v4672_v47  ;;  %v1969_v47 = vld [vmem:[#allocation3 + $0x30] sm:$0xff] }
 0x16b   :  { %794 = vst.msk [vmem:[#allocation2] sm:$0xff] %vm793_vm0, %v752_v50  ;;  %943 = vrot.lane.b32.xlu1 %v7354_v55, %s4856_s15  ;;  %v1967_v50 = vld [vmem:[#allocation3 + $0x24] sm:$0xff]  ;;  %2180 = vmatprep.subr.bf16.mxu0 %v4760_v4 }
 0x16c   :  { %1371 = vrot.lane.b32.xlu0 %v5173_v28, %s4863_s24  ;;  %v1965_v28 = vld [vmem:[#allocation3 + $0x18] sm:$0xff] }
 0x16d   :  { %v758_v32 = vpop.permute.xlu1 %757  ;;  %v4675_v18 = vcombine.low %v1965_v28, %v1967_v50  ;;  %v4678_v50 = vcombine.low %v1969_v47, %v1971_v14 }
 0x16e   :  { %797 = vst.msk [vmem:[#allocation2 + $0x30] sm:$0xff] %vm793_vm0, %v758_v32  ;;  %v756_v49 = vpop.permute.xlu0 %755  ;;  %v4762_v32 = vld [vmem:[#allocation3 + $0x20] ss:$12 sps:$4 sm:$0xff]  }
 0x16f   :  { %796 = vst.msk [vmem:[#allocation2 + $0x20] sm:$0xff] %vm793_vm0, %v756_v49  ;;  %1433 = vrot.lane.b32.xlu1 %v7350_v60, %s4865_s25  ;;  %v7355_v60 = vld [vmem:[#allocation25_spill] sm:$0xff]  ;;  %2181 = vmatpush1.bf16.msra.mxu0 %v4675_v18  ;;  %v4763_v49 = vld [vmem:[#allocation3 + $0x34] ss:$12 sps:$4 sm:$0xff]  }
 0x170   :  { %1431 = vrot.lane.b32.xlu0 %v7347_v59, %s4865_s25  ;;  %v7356_v59 = vld [vmem:[#allocation22_spill] sm:$0xff]  ;;  %2282 = vmatpush1.bf16.msra.mxu1 %v4762_v32  ;;  %v1975_v32 = vld [vmem:[#allocation3 + $0x54] sm:$0xff] }
 0x171   :  { %v762_v26 = vpop.permute.xlu1 %761  ;;  %2283 = vmatprep.subr.bf16.mxu1 %v7281_v30  ;;  %2182 = vmatprep.subr.bf16.mxu0 %v4763_v49  ;;  %v1973_v18 = vld [vmem:[#allocation3 + $0x48] sm:$0xff] }
 0x172   :  { %799 = vst.msk [vmem:[#allocation2 + $0x50] sm:$0xff] %vm793_vm0, %v762_v26  ;;  %v760_v0 = vpop.permute.xlu0 %759  ;;  %v4765_v26 = vld [vmem:[#allocation3 + $0x38] ss:$12 sps:$4 sm:$0xff]   ;;  %v4681_v14 = vcombine.low %v1973_v18, %v1975_v32  ;;  %v7359_v18 = vmov 0  }
 0x173   :  { %798 = vst.msk [vmem:[#allocation2 + $0x40] sm:$0xff] %vm793_vm0, %v760_v0  ;;  %1007 = vrot.lane.b32.xlu1 %v7355_v60, %s4857_s16  ;;  %2183 = vmatpush1.bf16.msra.mxu0 %v4678_v50  ;;  %v4766_v0 = vld [vmem:[#allocation3 + $0x4c] ss:$12 sps:$4 sm:$0xff]   ;;  %v1977_v50 = vld [vmem:[#allocation3 + $0x60] sm:$0xff] }
 0x174   :  { %1005 = vrot.lane.b32.xlu0 %v7356_v59, %s4857_s16  ;;  %2284 = vmatpush1.bf16.msra.mxu1 %v4765_v26  ;;  %v1979_v26 = vld [vmem:[#allocation3 + $0x6c] sm:$0xff] }
 0x175   :  { %v766_v28 = vpop.permute.xlu1 %765  ;;  %2285 = vmatprep.subr.bf16.mxu1 %v7281_v30  ;;  %2184 = vmatprep.subr.bf16.mxu0 %v4766_v0  ;;  %v4684_v32 = vcombine.low %v1977_v50, %v1979_v26  ;;  %v4774_v26 = vld [vmem:[#allocation3 + $0x80] ss:$12 sps:$4 sm:$0xff]  }
 0x176   :  { %802 = vst.msk [vmem:[#allocation2 + $0x70] sm:$0xff] %vm793_vm0, %v766_v28  ;;  %v764_v4 = vpop.permute.xlu0 %763  ;;  %v4768_v28 = vld [vmem:[#allocation3 + $0x50] ss:$12 sps:$4 sm:$0xff]  }
 0x177   :  { %801 = vst.msk [vmem:[#allocation2 + $0x60] sm:$0xf] %vm800_vm3, %v764_v4  ;;  %1497 = vrot.lane.b32.xlu1 %v7356_v59, %s4866_s26  ;;  %v7357_v59 = vld [vmem:[#allocation37_spill] sm:$0xff]  ;;  %2185 = vmatpush1.bf16.msra.mxu0 %v4681_v14  ;;  %v1981_v14 = vld [vmem:[#allocation3 + $0x78] sm:$0xff] }
 0x178   :  { %1495 = vrot.lane.b32.xlu0 %v7352_v22, %s4866_s26  ;;  %v7358_v22 = vld [vmem:[#allocation34_spill] sm:$0xff]  ;;  %2286 = vmatpush1.bf16.msra.mxu1 %v4768_v28  ;;  %v1983_v28 = vld [vmem:[#allocation3 + $0x84] sm:$0xff] }
 0x179   :  { %v770_v47 = vpop.permute.xlu1 %769  ;;  %v4769_v4 = vld [vmem:[#allocation3 + $0x64] ss:$12 sps:$4 sm:$0xff]   ;;  %2287 = vmatprep.subr.bf16.mxu1 %v7359_v18 }
 0x17a   :  { %804 = vst.msk [vmem:[#allocation2 + $0x90] sm:$0xff] %vm793_vm0, %v770_v47  ;;  %v768_v49 = vpop.permute.xlu0 %767  ;;  %v4771_v47 = vld [vmem:[#allocation3 + $0x68] ss:$12 sps:$4 sm:$0xff]   ;;  %2186 = vmatprep.subr.bf16.mxu0 %v4769_v4 }
 0x17b   :  { %803 = vst.msk [vmem:[#allocation2 + $0x80] sm:$0xff] %vm793_vm0, %v768_v49  ;;  %1069 = vrot.lane.b32.xlu1 %v7357_v59, %s4858_s17  ;;  %2187 = vmatpush1.bf16.msra.mxu0 %v4684_v32  ;;  %v4772_v49 = vld [vmem:[#allocation3 + $0x7c] ss:$12 sps:$4 sm:$0xff]   ;;  %v1985_v32 = vld [vmem:[#allocation3 + $0x90] sm:$0xff] }
 0x17c   :  { %1067 = vrot.lane.b32.xlu0 %v7358_v22, %s4858_s17  ;;  %2288 = vmatpush1.bf16.msra.mxu1 %v4771_v47  ;;  %v1987_v47 = vld [vmem:[#allocation3 + $0x9c] sm:$0xff] }
 0x17d   :  { %v774_v30 = vpop.permute.xlu1 %773  ;;  %2289 = vmatprep.subr.bf16.mxu1 %v7359_v18  ;;  %2188 = vmatprep.subr.bf16.mxu0 %v4772_v49 }
 0x17e   :  { %806 = vst.msk [vmem:[#allocation2 + $0xb0] sm:$0xff] %vm793_vm0, %v774_v30  ;;  %v772_v0 = vpop.permute.xlu0 %771  ;;  %v4687_v30 = vcombine.low %v1981_v14, %v1983_v28  ;;  %v4690_v28 = vcombine.low %v1985_v32, %v1987_v47 }
 0x17f   :  { %805 = vst.msk [vmem:[#allocation2 + $0xa0] sm:$0xff] %vm793_vm0, %v772_v0  ;;  %1559 = vrot.lane.b32.xlu1 %v7358_v22, %s4867_s27  ;;  %v7360_v22 = vld [vmem:[#allocation47_spill] sm:$0xff] }
 0x180   :  { %1557 = vrot.lane.b32.xlu0 %v7353_v5, %s4867_s27  ;;  %2189 = vmatpush1.bf16.msra.mxu0 %v4687_v30  ;;  %v7361_v5 = vld [vmem:[#allocation45_spill] sm:$0xff]  ;;  %v4775_v0 = vld [vmem:[#allocation3 + $0x94] ss:$12 sps:$4 sm:$0xff]  }
 0x181   :  { %v778_v50 = vpop.permute.xlu1 %777  ;;  %2290 = vmatpush1.bf16.msra.mxu1 %v4774_v26  ;;  %2190 = vmatprep.subr.bf16.mxu0 %v4775_v0  ;;  %v1989_v30 = vld [vmem:[#allocation3 + $0xa8] sm:$0xff]  ;;  %v1991_v26 = vld [vmem:[#allocation3 + $0xb4] sm:$0xff] }
 0x182   :  { %808 = vst.msk [vmem:[#allocation2 + $0xd0] sm:$0xf] %vm800_vm3, %v778_v50  ;;  %v776_v4 = vpop.permute.xlu0 %775  ;;  %2291 = vmatprep.subr.bf16.mxu1 %v7359_v18  ;;  %v4777_v50 = vld [vmem:[#allocation3 + $0x98] ss:$12 sps:$4 sm:$0xff]   ;;  %v4693_v47 = vcombine.low %v1989_v30, %v1991_v26  ;;  %vm1225_vm3 = vcmask 695936  }
 0x183   :  { %807 = vst.msk [vmem:[#allocation2 + $0xc0] sm:$0xff] %vm793_vm0, %v776_v4  ;;  %1131 = vrot.lane.b32.xlu1 %v7360_v22, %s4859_s18  ;;  %v4778_v4 = vld [vmem:[#allocation3 + $0xac] ss:$12 sps:$4 sm:$0xff]   ;;  %vm1167_vm0 = vcmask 654936  }
 0x184   :  { %1129 = vrot.lane.b32.xlu0 %v7361_v5, %s4859_s18  ;;  %2191 = vmatpush1.bf16.msra.mxu0 %v4690_v28 }
 0x185   :  { %v816_v14 = vpop.permute.xlu1 %815  ;;  %2292 = vmatpush1.bf16.msra.mxu1 %v4777_v50  ;;  %2192 = vmatprep.subr.bf16.mxu0 %v4778_v4  ;;  %v4782_v50 = vld [vmem:[#allocation3 + $0xc8] ss:$0 sps:$4 sm:$0x11]  }
 0x186   :  { %857 = vst.msk [vmem:[#allocation2 + $0x10] sm:$0xff] %vm855_vm7, %v816_v14  ;;  %v814_v49 = vpop.permute.xlu0 %813  ;;  %2293 = vmatprep.subr.bf16.mxu1 %v7359_v18  ;;  %v4780_v14 = vld [vmem:[#allocation3 + $0xb0] ss:$12 sps:$4 sm:$0xff]   ;;  %v2176_v4 = vsel %vm7287_vm12, %v4782_v50, 0 }
 0x187   :  { %856 = vst.msk [vmem:[#allocation2] sm:$0xff] %vm855_vm7, %v814_v49  ;;  %1621 = vrot.lane.b32.xlu1 %v7361_v5, %s4868_s28 }
 0x188   :  { %1619 = vrot.lane.b32.xlu0 %v5540_v45, %s4868_s28  ;;  %2193 = vmatpush1.bf16.msra.mxu0 %v4693_v47  ;;  %v1993_v45 = vld [vmem:[#allocation3 + $0xc0] sm:$0x11] }
 0x189   :  { %v820_v32 = vpop.permute.xlu1 %819  ;;  %2294 = vmatpush1.bf16.msra.mxu1 %v4780_v14  ;;  %v4697_v5 = vcombine.high %v1993_v45, %v1993_v45  ;;  %v4696_v28 = vcombine.low %v1993_v45, %v1993_v45 }
 0x18a   :  { %859 = vst.msk [vmem:[#allocation2 + $0x30] sm:$0xff] %vm855_vm7, %v820_v32  ;;  %v818_v0 = vpop.permute.xlu0 %817  ;;  %2295 = vmatprep.subr.bf16.mxu1 %v7359_v18 }
 0x18b   :  { %858 = vst.msk [vmem:[#allocation2 + $0x20] sm:$0xff] %vm855_vm7, %v818_v0  ;;  %1189 = vrot.lane.b32.xlu1 %v4939_v8, %s4860_s19  ;;  %4699 = vmatprep.subr.msk.bf16.mxu0 %vm7287_vm12, %v4697_v5  ;;  %v2170_v26 = vsel %vm7287_vm12, %v4696_v28, 0 }
 0x18c   :  { %1187 = vrot.lane.b32.xlu0 %v4934_v7, %s4860_s19  ;;  %2195 = vmatpush1.bf16.msra.mxu0 %v2170_v26  ;;  %v7364_v26 = vld [vmem:[#allocation26_spill] sm:$0xff] }
 0x18d   :  { %v824_v49 = vpop.permute.xlu1 %823  ;;  %2296 = vmatpush1.bf16.msra.mxu1 %v2176_v4  ;;  %v7365_v4 = vld [vmem:[#allocation24_spill] sm:$0xff] }
 0x18e   :  { %861 = vst.msk [vmem:[#allocation2 + $0x50] sm:$0xff] %vm855_vm7, %v824_v49  ;;  %v822_v30 = vpop.permute.xlu0 %821 }
 0x18f   :  { %860 = vst.msk [vmem:[#allocation2 + $0x40] sm:$0xff] %vm855_vm7, %v822_v30  ;;  %1679 = vrot.lane.b32.xlu1 %v4934_v7, %s4869_s29 }
 0x190   :  { %1677 = vrot.lane.b32.xlu0 %v4916_v1, %s4869_s29 }
 0x191   :  { %v828_v18 = vpop.permute.xlu1 %827 }
 0x192   :  { %864 = vst.msk [vmem:[#allocation2 + $0x70] sm:$0xff] %vm855_vm7, %v828_v18  ;;  %v826_v32 = vpop.permute.xlu0 %825 }
 0x193   :  { %863 = vst.msk [vmem:[#allocation2 + $0x60] sm:$0xf] %vm862_vm8, %v826_v32  ;;  %1741 = vrot.lane.b32.xlu1 %v5030_v27, %s4870_s30 }
 0x194   :  { %1739 = vrot.lane.b32.xlu0 %v5008_v20, %s4870_s30  ;;  %v5975_v20 = vld [vmem:[%s7198_s0 + $0x38] sm:$0xff] }
 0x195   :  { %v832_v7 = vpop.permute.xlu1 %831  ;;  %v5978_v0 = vrot.slane %v5975_v20, 4 }
 0x196   :  { %866 = vst.msk [vmem:[#allocation2 + $0x90] sm:$0xff] %vm855_vm7, %v832_v7  ;;  %v830_v47 = vpop.permute.xlu0 %829 }
 0x197   :  { %865 = vst.msk [vmem:[#allocation2 + $0x80] sm:$0xff] %vm855_vm7, %v830_v47  ;;  %1251 = vrot.lane.b32.xlu1 %v5025_v24, %s4861_s20  ;;  %v7366_v47 = vld [vmem:[#allocation38_spill] sm:$0xff] }
 0x198   :  { %1249 = vrot.lane.b32.xlu0 %v5030_v27, %s4861_s20 }
 0x199   :  { %v836_v1 = vpop.permute.xlu1 %835 }
 0x19a   :  { %868 = vst.msk [vmem:[#allocation2 + $0xb0] sm:$0xff] %vm855_vm7, %v836_v1  ;;  %v834_v14 = vpop.permute.xlu0 %833  ;;  %v7367_v1 = vld [vmem:[#allocation36_spill] sm:$0xff] }
 0x19b   :  { %867 = vst.msk [vmem:[#allocation2 + $0xa0] sm:$0xff] %vm855_vm7, %v834_v14  ;;  %1313 = vrot.lane.b32.xlu1 %v5110_v51, %s4862_s21  ;;  %v7362_v51 = vld [vmem:[#allocation11_spill] sm:$0xff] }
 0x19c   :  { %1311 = vrot.lane.b32.xlu0 %v5115_v54, %s4862_s21  ;;  %v5989_v54 = vsel %vm7286_vm5, %v7362_v51, %v5978_v0  ;;  %v7368_v51 = vld [vmem:[#allocation46_spill] sm:$0xff] }
 0x19d   :  { %v840_v27 = vpop.permute.xlu1 %839 }
 0x19e   :  { %870 = vst.msk [vmem:[#allocation2 + $0xd0] sm:$0xf] %vm862_vm8, %v840_v27  ;;  %v838_v45 = vpop.permute.xlu0 %837  ;;  %vm7304_vm8 = vcmask 777936  }
 0x19f   :  { %869 = vst.msk [vmem:[#allocation2 + $0xc0] sm:$0xff] %vm855_vm7, %v838_v45  ;;  %1375 = vrot.lane.b32.xlu1 %v5188_v33, %s4863_s24  ;;  %v7363_v33 = vld [vmem:[#allocation13_spill] sm:$0xff]  ;;  %vm7303_vm7 = vcmask 736936  }
 0x1a0   :  { %1373 = vrot.lane.b32.xlu0 %v5193_v42, %s4863_s24 }
 0x1a1   :  { %v878_v5 = vpop.permute.xlu1 %877 }
 0x1a2   :  { %919 = vst.msk [vmem:[#allocation2 + $0x10] sm:$0xff] %vm917_vm10, %v878_v5  ;;  %v876_v28 = vpop.permute.xlu0 %875  ;;  %v7369_v5 = vld [vmem:[#allocation15_spill] sm:$0xff] }
 0x1a3   :  { %918 = vst.msk [vmem:[#allocation2] sm:$0xff] %vm917_vm10, %v876_v28  ;;  %947 = vrot.lane.b32.xlu1 %v5989_v54, %s4856_s15 }
 0x1a4   :  { %945 = vrot.lane.b32.xlu0 %v7363_v33, %s4856_s15 }
 0x1a5   :  { %v882_v50 = vpop.permute.xlu1 %881 }
 0x1a6   :  { %921 = vst.msk [vmem:[#allocation2 + $0x30] sm:$0xff] %vm917_vm10, %v882_v50  ;;  %v880_v42 = vpop.permute.xlu0 %879 }
 0x1a7   :  { %920 = vst.msk [vmem:[#allocation2 + $0x20] sm:$0xff] %vm917_vm10, %v880_v42  ;;  %1437 = vrot.lane.b32.xlu1 %v7363_v33, %s4865_s25 }
 0x1a8   :  { %1435 = vrot.lane.b32.xlu0 %v7354_v55, %s4865_s25 }
 0x1a9   :  { %v886_v49 = vpop.permute.xlu1 %885 }
 0x1aa   :  { %923 = vst.msk [vmem:[#allocation2 + $0x50] sm:$0xff] %vm917_vm10, %v886_v49  ;;  %v884_v30 = vpop.permute.xlu0 %883  ;;  %v7371_v49 = vld [vmem:[#allocation16_spill] sm:$0xff] }
 0x1ab   :  { %922 = vst.msk [vmem:[#allocation2 + $0x40] sm:$0xff] %vm917_vm10, %v884_v30  ;;  %1011 = vrot.lane.b32.xlu1 %v7364_v26, %s4857_s16 }
 0x1ac   :  { %1009 = vrot.lane.b32.xlu0 %v7365_v4, %s4857_s16 }
 0x1ad   :  { %v890_v18 = vpop.permute.xlu1 %889 }
 0x1ae   :  { %926 = vst.msk [vmem:[#allocation2 + $0x70] sm:$0xff] %vm917_vm10, %v890_v18  ;;  %v888_v32 = vpop.permute.xlu0 %887 }
 0x1af   :  { %925 = vst.msk [vmem:[#allocation2 + $0x60] sm:$0xf] %vm924_vm11, %v888_v32  ;;  %1501 = vrot.lane.b32.xlu1 %v7365_v4, %s4866_s26  ;;  %v7372_v4 = vld [vmem:[#allocation27_spill] sm:$0xff] }
 0x1b0   :  { %1499 = vrot.lane.b32.xlu0 %v7355_v60, %s4866_s26 }
 0x1b1   :  { %v894_v55 = vpop.permute.xlu1 %893 }
 0x1b2   :  { %928 = vst.msk [vmem:[#allocation2 + $0x90] sm:$0xff] %vm917_vm10, %v894_v55  ;;  %v892_v7 = vpop.permute.xlu0 %891 }
 0x1b3   :  { %927 = vst.msk [vmem:[#allocation2 + $0x80] sm:$0xff] %vm917_vm10, %v892_v7  ;;  %1073 = vrot.lane.b32.xlu1 %v7366_v47, %s4858_s17 }
 0x1b4   :  { %1071 = vrot.lane.b32.xlu0 %v7367_v1, %s4858_s17 }
 0x1b5   :  { %v898_v14 = vpop.permute.xlu1 %897 }
 0x1b6   :  { %930 = vst.msk [vmem:[#allocation2 + $0xb0] sm:$0xff] %vm917_vm10, %v898_v14  ;;  %v896_v27 = vpop.permute.xlu0 %895  ;;  %v6067_v14 = vld [vmem:[%s7198_s0 + $0x40] sm:$0xff] }
 0x1b7   :  { %929 = vst.msk [vmem:[#allocation2 + $0xa0] sm:$0xff] %vm917_vm10, %v896_v27  ;;  %1563 = vrot.lane.b32.xlu1 %v7367_v1, %s4867_s27  ;;  %v7373_v27 = vld [vmem:[#allocation28_spill] sm:$0xff] }
 0x1b8   :  { %1561 = vrot.lane.b32.xlu0 %v7357_v59, %s4867_s27  ;;  %v7370_v59 = vld [vmem:[#allocation48_spill] sm:$0xff] }
 0x1b9   :  { %v902_v60 = vpop.permute.xlu1 %901 }
 0x1ba   :  { %932 = vst.msk [vmem:[#allocation2 + $0xd0] sm:$0xf] %vm924_vm11, %v902_v60  ;;  %v900_v45 = vpop.permute.xlu0 %899  ;;  %vm1473_vm11 = vcmask 859936  }
 0x1bb   :  { %931 = vst.msk [vmem:[#allocation2 + $0xc0] sm:$0xff] %vm917_vm10, %v900_v45  ;;  %1133 = vrot.lane.b32.xlu1 %v7368_v51, %s4859_s18  ;;  %vm1411_vm10 = vcmask 818936   ;;  %v7374_v45 = vld [vmem:[#allocation39_spill] sm:$0xff] }
 0x1bc   :  { %953 = vrot.lane.b32.xlu0 %v7369_v5, %s4856_s15 }
 0x1bd   :  { %v940_v28 = vpop.permute.xlu1 %939 }
 0x1be   :  { %981 = vst.msk [vmem:[#allocation2 + $0x10] sm:$0xff] %vm979_vm13, %v940_v28  ;;  %v938_v33 = vpop.permute.xlu0 %937 }
 0x1bf   :  { %980 = vst.msk [vmem:[#allocation2] sm:$0xff] %vm979_vm13, %v938_v33  ;;  %1623 = vrot.lane.b32.xlu1 %v7360_v22, %s4868_s28 }
 0x1c0   :  { %1135 = vrot.lane.b32.xlu0 %v7370_v59, %s4859_s18 }
 0x1c1   :  { %v1002_v50 = vpop.permute.xlu1 %1001 }
 0x1c2   :  { %1044 = vst.msk [vmem:[#allocation2] sm:$0xff] %vm7298_vm14, %v1002_v50  ;;  %v942_v42 = vpop.permute.xlu0 %941 }
 0x1c3   :  { %982 = vst.msk [vmem:[#allocation2 + $0x20] sm:$0xff] %vm979_vm13, %v942_v42  ;;  %951 = vrot.lane.b32.xlu1 %v7371_v49, %s4856_s15 }
 0x1c4   :  { %1625 = vrot.lane.b32.xlu0 %v7368_v51, %s4868_s28 }
 0x1c5   :  { %v1064_v30 = vpop.permute.xlu1 %1063 }
 0x1c6   :  { %1106 = vst.msk [vmem:[#allocation2] sm:$0xff] %vm1105_vm15, %v1064_v30  ;;  %v1004_v22 = vpop.permute.xlu0 %1003 }
 0x1c7   :  { %1045 = vst.msk [vmem:[#allocation2 + $0x10] sm:$0xff] %vm7298_vm14, %v1004_v22  ;;  %1191 = vrot.lane.b32.xlu1 %v4952_v11, %s4860_s19  ;;  %v997_v22 = vrot.slane %v6067_v14, 5 }
 0x1c8   :  { %1017 = vrot.lane.b32.xlu0 %v7372_v4, %s4857_s16 }
 0x1c9   :  { %v1126_v18 = vpop.permute.xlu1 %1125 }
 0x1ca   :  { %1168 = vst.msk [vmem:[#allocation2] sm:$0xff] %vm1167_vm0, %v1126_v18  ;;  %v1066_v32 = vpop.permute.xlu0 %1065 }
 0x1cb   :  { %1107 = vst.msk [vmem:[#allocation2 + $0x10] sm:$0xff] %vm1105_vm15, %v1066_v32  ;;  %1681 = vrot.lane.b32.xlu1 %v4939_v8, %s4869_s29 }
 0x1cc   :  { %1193 = vrot.lane.b32.xlu0 %v5975_v20, %s4860_s19 }
 0x1cd   :  { %v1184_v55 = vpop.permute.xlu1 %1183 }
 0x1ce   :  { %1226 = vst.msk [vmem:[#allocation2] sm:$0xff] %vm1225_vm3, %v1184_v55  ;;  %v1128_v7 = vpop.permute.xlu0 %1127  ;;  %v7376_v55 = vrot.slane %v5340_v25, 5 }
 0x1cf   :  { %1169 = vst.msk [vmem:[#allocation2 + $0x10] sm:$0xff] %vm1167_vm0, %v1128_v7  ;;  %1743 = vrot.lane.b32.xlu1 %v5025_v24, %s4870_s30 }
 0x1d0   :  { %1683 = vrot.lane.b32.xlu0 %v4952_v11, %s4869_s29  ;;  %v6075_v11 = vrot.slane %v6067_v14, 1 }
 0x1d1   :  { %v1246_v1 = vpop.permute.xlu1 %1245 }
 0x1d2   :  { %1288 = vst.msk [vmem:[#allocation2] sm:$0xff] %vm7303_vm7, %v1246_v1  ;;  %v1186_v8 = vpop.permute.xlu0 %1185  ;;  %v6086_v28 = vsel %vm7289_vm1, %v5667_v39, %v6075_v11  ;;  %v7375_v39 = vld [vmem:[#allocation40_spill] sm:$0xff]  ;;  %v7377_v1 = vld [vmem:[#allocation49_spill] sm:$0xff] }
 0x1d3   :  { %1227 = vst.msk [vmem:[#allocation2 + $0x10] sm:$0xff] %vm1225_vm3, %v1186_v8  ;;  %1015 = vrot.lane.b32.xlu1 %v7373_v27, %s4857_s16  ;;  %v1365_v27 = vrot.slane %v6067_v14, 3 }
 0x1d4   :  { %1745 = vrot.lane.b32.xlu0 %v5678_v13, %s4870_s30 }
 0x1d5   :  { %v1308_v24 = vpop.permute.xlu1 %1307 }
 0x1d6   :  { %1350 = vst.msk [vmem:[#allocation2] sm:$0xff] %vm7304_vm8, %v1308_v24  ;;  %v1248_v60 = vpop.permute.xlu0 %1247 }
 0x1d7   :  { %1289 = vst.msk [vmem:[#allocation2 + $0x10] sm:$0xff] %vm7303_vm7, %v1248_v60  ;;  %1253 = vrot.lane.b32.xlu1 %v5678_v13, %s4861_s20  ;;  %v1303_v13 = vrot.slane %v6067_v14, 2  ;;  %v7378_v60 = vrot.slane %v5340_v25, 6 }
 0x1d8   :  { %1079 = vrot.lane.b32.xlu0 %v7374_v45, %s4858_s17 }
 0x1d9   :  { %v1370_v51 = vpop.permute.xlu1 %1369  ;;  %v1304_v49 = vsel %vm7283_vm2, %v5725_v38, %v1303_v13  ;;  %v998_v38 = vsel %vm7284_vm6, %v7376_v55, %v997_v22  ;;  %vm1537_vm2 = vcmask 900936   ;;  %vm1599_vm6 = vcmask 941936  }
 0x1da   :  { %1412 = vst.msk [vmem:[#allocation2] sm:$0xff] %vm1411_vm10, %v1370_v51  ;;  %v1310_v33 = vpop.permute.xlu0 %1309  ;;  %v7379_v55 = vrot.slane %v5340_v25, 7 }
 0x1db   :  { %1351 = vst.msk [vmem:[#allocation2 + $0x10] sm:$0xff] %vm7304_vm8, %v1310_v33  ;;  %949 = vrot.lane.b32.xlu1 %v5978_v0, %s4856_s15 }
 0x1dc   :  { %1255 = vrot.lane.b32.xlu0 %v6086_v28, %s4861_s20 }
 0x1dd   :  { %v944_v50 = vpop.permute.xlu1 %943 }
 0x1de   :  { %983 = vst.msk [vmem:[#allocation2 + $0x30] sm:$0xff] %vm979_vm13, %v944_v50  ;;  %v1372_v42 = vpop.permute.xlu0 %1371  ;;  %v1366_v50 = vsel %vm7285_vm4, %v5783_v3, %v1365_v27  ;;  %vm1661_vm4 = vcmask 982936  }
 0x1df   :  { %1413 = vst.msk [vmem:[#allocation2 + $0x10] sm:$0xff] %vm1411_vm10, %v1372_v42  ;;  %1141 = vrot.lane.b32.xlu1 %v5577_v10, %s4859_s18 }
 0x1e0   :  { %1077 = vrot.lane.b32.xlu0 %v7375_v39, %s4858_s17 }
 0x1e1   :  { %v1434_v30 = vpop.permute.xlu1 %1433 }
 0x1e2   :  { %1475 = vst.msk [vmem:[#allocation2 + $0x10] sm:$0xff] %vm1473_vm11, %v1434_v30  ;;  %v1432_v18 = vpop.permute.xlu0 %1431 }
 0x1e3   :  { %1474 = vst.msk [vmem:[#allocation2] sm:$0xff] %vm1473_vm11, %v1432_v18  ;;  %1317 = vrot.lane.b32.xlu1 %v1304_v49, %s4862_s21  ;;  %v1121_v18 = vrot.slane %v6067_v14, 7 }
 0x1e4   :  { %1315 = vrot.lane.b32.xlu0 %v5736_v34, %s4862_s21  ;;  %v1059_v34 = vrot.slane %v6067_v14, 6 }
 0x1e5   :  { %v1008_v32 = vpop.permute.xlu1 %1007 }
 0x1e6   :  { %1047 = vst.msk [vmem:[#allocation2 + $0x30] sm:$0xff] %vm7298_vm14, %v1008_v32  ;;  %v1006_v7 = vpop.permute.xlu0 %1005  ;;  %v1060_v51 = vsel %vm7288_vm9, %v7378_v60, %v1059_v34  ;;  %vm1783_vm9 = vcmask 15360  }
 0x1e7   :  { %1046 = vst.msk [vmem:[#allocation2 + $0x20] sm:$0xff] %vm7298_vm14, %v1006_v7  ;;  %1139 = vrot.lane.b32.xlu1 %v7377_v1, %s4859_s18 }
 0x1e8   :  { %1013 = vrot.lane.b32.xlu0 %v998_v38, %s4857_s16 }
 0x1e9   :  { %v1498_v8 = vpop.permute.xlu1 %1497 }
 0x1ea   :  { %1539 = vst.msk [vmem:[#allocation2 + $0x10] sm:$0xff] %vm1537_vm2, %v1498_v8  ;;  %v1496_v24 = vpop.permute.xlu0 %1495 }
 0x1eb   :  { %1538 = vst.msk [vmem:[#allocation2] sm:$0xff] %vm1537_vm2, %v1496_v24  ;;  %1377 = vrot.lane.b32.xlu1 %v5794_v61, %s4863_s24  ;;  %v1427_v61 = vrot.slane %v6067_v14, 4 }
 0x1ec   :  { %1199 = vrot.lane.b32.xlu0 %v4981_v16, %s4860_s19 }
 0x1ed   :  { %v1070_v33 = vpop.permute.xlu1 %1069  ;;  %v1428_v3 = vsel %vm7286_vm5, %v5978_v0, %v1427_v61  ;;  %v6164_v0 = vsel %vm7287_vm12, %v7379_v55, %v1121_v18  ;;  %vm1719_vm5 = vcmask 1023936   ;;  %vm7290_vm12 = vcmask 1048552  }
 0x1ee   :  { %1109 = vst.msk [vmem:[#allocation2 + $0x30] sm:$0xff] %vm1105_vm15, %v1070_v33  ;;  %v1068_v42 = vpop.permute.xlu0 %1067 }
 0x1ef   :  { %1108 = vst.msk [vmem:[#allocation2 + $0x20] sm:$0xff] %vm1105_vm15, %v1068_v42  ;;  %1075 = vrot.lane.b32.xlu1 %v1060_v51, %s4858_s17 }
 0x1f0   :  { %1379 = vrot.lane.b32.xlu0 %v1366_v50, %s4863_s24 }
 0x1f1   :  { %v1560_v39 = vpop.permute.xlu1 %1559 }
 0x1f2   :  { %1601 = vst.msk [vmem:[#allocation2 + $0x10] sm:$0xff] %vm1599_vm6, %v1560_v39  ;;  %v1558_v49 = vpop.permute.xlu0 %1557 }
 0x1f3   :  { %1600 = vst.msk [vmem:[#allocation2] sm:$0xff] %vm1599_vm6, %v1558_v49  ;;  %1261 = vrot.lane.b32.xlu1 %v5063_v37, %s4861_s20 }
 0x1f4   :  { %1197 = vrot.lane.b32.xlu0 %v4976_v15, %s4860_s19 }
 0x1f5   :  { %v1132_v30 = vpop.permute.xlu1 %1131 }
 0x1f6   :  { %1171 = vst.msk [vmem:[#allocation2 + $0x30] sm:$0xff] %vm1167_vm0, %v1132_v30  ;;  %v1130_v32 = vpop.permute.xlu0 %1129 }
 0x1f7   :  { %1170 = vst.msk [vmem:[#allocation2 + $0x20] sm:$0xff] %vm1167_vm0, %v1130_v32  ;;  %1441 = vrot.lane.b32.xlu1 %v1428_v3, %s4865_s25 }
 0x1f8   :  { %1439 = vrot.lane.b32.xlu0 %v5989_v54, %s4865_s25 }
 0x1f9   :  { %v1622_v15 = vpop.permute.xlu1 %1621 }
 0x1fa   :  { %1663 = vst.msk [vmem:[#allocation2 + $0x10] sm:$0xff] %vm1661_vm4, %v1622_v15  ;;  %v1620_v7 = vpop.permute.xlu0 %1619 }
 0x1fb   :  { %1662 = vst.msk [vmem:[#allocation2] sm:$0xff] %vm1661_vm4, %v1620_v7  ;;  %1259 = vrot.lane.b32.xlu1 %v5043_v31, %s4861_s20 }
 0x1fc   :  { %1137 = vrot.lane.b32.xlu0 %v6164_v0, %s4859_s18 }
 0x1fd   :  { %v1190_v54 = vpop.permute.xlu1 %1189 }
 0x1fe   :  { %1229 = vst.msk [vmem:[#allocation2 + $0x30] sm:$0xff] %vm1225_vm3, %v1190_v54  ;;  %v1188_v1 = vpop.permute.xlu0 %1187 }
 0x1ff   :  { %1228 = vst.msk [vmem:[#allocation2 + $0x20] sm:$0xff] %vm1225_vm3, %v1188_v1  ;;  %1503 = vrot.lane.b32.xlu1 %v7364_v26, %s4866_s26 }
 0x200   :  { %1323 = vrot.lane.b32.xlu0 %v5143_v63, %s4862_s21 }
 0x201   :  { %v1680_v25 = vpop.permute.xlu1 %1679 }
 0x202   :  { %1721 = vst.msk [vmem:[#allocation2 + $0x10] sm:$0xff] %vm1719_vm5, %v1680_v25  ;;  %v1678_v31 = vpop.permute.xlu0 %1677  ;;  %v6232_v25 = vld [vmem:[%s7198_s0 + $0x48] sm:$0x1f] }
 0x203   :  { %1720 = vst.msk [vmem:[#allocation2] sm:$0xff] %vm1719_vm5, %v1678_v31  ;;  %1195 = vrot.lane.b32.xlu1 %v6067_v14, %s4860_s19 }
 0x204   :  { %1505 = vrot.lane.b32.xlu0 %v998_v38, %s4866_s26 }
 0x205   :  { %v1742_v8 = vpop.permute.xlu1 %1741 }
 0x206   :  { %1785 = vst.msk [vmem:[#allocation2 + $0x10] sm:$0xff] %vm7290_vm12, %v1742_v8  ;;  %v1740_v26 = vpop.permute.xlu0 %1739 }
 0x207   :  { %1786 = vst.msk [vmem:[#allocation2 + $0x18] sm:$0xff] %vm1783_vm9, %v1742_v8  ;;  %1784 = vst.msk [vmem:[#allocation2 + $0x8] sm:$0xff] %vm1783_vm9, %v1740_v26  ;;  %1385 = vrot.lane.b32.xlu1 %v5221_v57, %s4863_s24 }
 0x208   :  { %1782 = vst.msk [vmem:[#allocation2] sm:$0xff] %vm7290_vm12, %v1740_v26  ;;  %1321 = vrot.lane.b32.xlu0 %v5128_v58, %s4862_s21  ;;  %v7380_v58 = vld [vmem:[#allocation17_spill] sm:$0xff] }
 0x209   :  { %v1252_v63 = vpop.permute.xlu1 %1251 }
 0x20a   :  { %1291 = vst.msk [vmem:[#allocation2 + $0x30] sm:$0xff] %vm7303_vm7, %v1252_v63  ;;  %v1250_v38 = vpop.permute.xlu0 %1249 }
 0x20b   :  { %1290 = vst.msk [vmem:[#allocation2 + $0x20] sm:$0xff] %vm7303_vm7, %v1250_v38  ;;  %1567 = vrot.lane.b32.xlu1 %v1060_v51, %s4867_s27  ;;  %v7381_v51 = vld [vmem:[#allocation18_spill] sm:$0xff] }
 0x20c   :  { %1565 = vrot.lane.b32.xlu0 %v7366_v47, %s4867_s27 }
 0x20d   :  { %v1314_v24 = vpop.permute.xlu1 %1313  ;;  %v1815_v33 = vld [vmem:[#allocation2 + $0x10] sm:$0xff] }
 0x20e   :  { %v1816_v60 = vld [vmem:[#allocation2 + $0x18] sm:$0xff]  ;;  %1353 = vst.msk [vmem:[#allocation2 + $0x30] sm:$0xff] %vm7304_vm8, %v1314_v24  ;;  %v1312_v57 = vpop.permute.xlu0 %1311  ;;  %v1814_v50 = vld [vmem:[#allocation2 + $0x8] sm:$0xff] }
 0x20f   :  { %v1813_v42 = vld [vmem:[#allocation2] sm:$0xff]  ;;  %1352 = vst.msk [vmem:[#allocation2 + $0x20] sm:$0xff] %vm7304_vm8, %v1312_v57  ;;  %957 = vrot.lane.b32.xlu1 %v7380_v58, %s4856_s15  ;;  %v1948_v39 = vpack.c.bf16 %v1816_v60, %v1814_v50 }
 0x210   :  { %v1947_v49 = vpack.c.bf16 %v1815_v33, %v1813_v42  ;;  %955 = vrot.lane.b32.xlu0 %v7381_v51, %s4856_s15  ;;  %v7384_v24 = vld [vmem:[#allocation41_spill] sm:$0xff] }
 0x211   :  { %4700 = vmatprep.mubr.msk.bf16.mxu0 %vm1783_vm9, %v1948_v39  ;;  %4707 = vmatprep.mubr.msk.bf16.mxu1 %vm1783_vm9, %v1948_v39  ;;  %v1376_v47 = vpop.permute.xlu1 %1375 }
 0x212   :  { %1415 = vst.msk [vmem:[#allocation2 + $0x30] sm:$0xff] %vm1411_vm10, %v1376_v47  ;;  %v1374_v3 = vpop.permute.xlu0 %1373  ;;  %2211 = vmatmul.mubr.bf16.vlgmr.msra.gmra.mrb[0].mxu0 %v1947_v49  ;;  %2312 = vmatmul.mubr.bf16.vlgmr.msra.gmra.mrb[0].mxu1 %v1947_v49  ;;  %v1491_v49 = vrot.slane %v6232_v25, 5  ;;  %v1553_v47 = vrot.slane %v6232_v25, 6 }
 0x213   :  { %1414 = vst.msk [vmem:[#allocation2 + $0x20] sm:$0xff] %vm1411_vm10, %v1374_v3  ;;  %1383 = vrot.lane.b32.xlu1 %v5206_v48, %s4863_s24  ;;  %v7382_v48 = vld [vmem:[#allocation30_spill] sm:$0xff] }
 0x214   :  { %1257 = vrot.lane.b32.xlu0 %v6075_v11, %s4861_s20 }
 0x215   :  { %v948_v30 = vpop.permute.xlu1 %947 }
 0x216   :  { %985 = vst.msk [vmem:[#allocation2 + $0x50] sm:$0xff] %vm979_vm13, %v948_v30  ;;  %v946_v32 = vpop.permute.xlu0 %945 }
 0x217   :  { %984 = vst.msk [vmem:[#allocation2 + $0x40] sm:$0xff] %vm979_vm13, %v946_v32  ;;  %1627 = vrot.lane.b32.xlu1 %v7370_v59, %s4868_s28  ;;  %v7383_v59 = vld [vmem:[#allocation29_spill] sm:$0xff] }
 0x218   :  { %1447 = vrot.lane.b32.xlu0 %v7381_v51, %s4865_s25 }
 0x219   :  { %v1438_v15 = vpop.permute.xlu1 %1437 }
 0x21a   :  { %1477 = vst.msk [vmem:[#allocation2 + $0x30] sm:$0xff] %vm1473_vm11, %v1438_v15  ;;  %v1436_v55 = vpop.permute.xlu0 %1435 }
 0x21b   :  { %1476 = vst.msk [vmem:[#allocation2 + $0x20] sm:$0xff] %vm1473_vm11, %v1436_v55  ;;  %1019 = vrot.lane.b32.xlu1 %v7382_v48, %s4857_s16 }
 0x21c   :  { %1629 = vrot.lane.b32.xlu0 %v6164_v0, %s4868_s28 }
 0x21d   :  { %v1012_v7 = vpop.permute.xlu1 %1011 }
 0x21e   :  { %1049 = vst.msk [vmem:[#allocation2 + $0x50] sm:$0xff] %vm7298_vm14, %v1012_v7  ;;  %v1010_v54 = vpop.permute.xlu0 %1009 }
 0x21f   :  { %1048 = vst.msk [vmem:[#allocation2 + $0x40] sm:$0xff] %vm7298_vm14, %v1010_v54  ;;  %1319 = vrot.lane.b32.xlu1 %v1303_v13, %s4862_s21  ;;  %v1735_v13 = vrot.slane %v6232_v25, 1 }
 0x220   :  { %1021 = vrot.lane.b32.xlu0 %v7383_v59, %s4857_s16 }
 0x221   :  { %v1502_v1 = vpop.permute.xlu1 %1501  ;;  %v1736_v26 = vsel %vm7289_vm1, %v6075_v11, %v1735_v13  ;;  %v7385_v11 = vld [vmem:[#allocation42_spill] sm:$0xff]  ;;  %vm7386_vm1 = vcmask 1042432  }
 0x222   :  { %1541 = vst.msk [vmem:[#allocation2 + $0x30] sm:$0xff] %vm1537_vm2, %v1502_v1  ;;  %v1500_v0 = vpop.permute.xlu0 %1499 }
 0x223   :  { %1540 = vst.msk [vmem:[#allocation2 + $0x20] sm:$0xff] %vm1537_vm2, %v1500_v0  ;;  %1511 = vrot.lane.b32.xlu1 %v7382_v48, %s4866_s26 }
 0x224   :  { %1445 = vrot.lane.b32.xlu0 %v7369_v5, %s4865_s25 }
 0x225   :  { %v1074_v31 = vpop.permute.xlu1 %1073 }
 0x226   :  { %1111 = vst.msk [vmem:[#allocation2 + $0x50] sm:$0xff] %vm1105_vm15, %v1074_v31  ;;  %v1072_v8 = vpop.permute.xlu0 %1071  ;;  %v1615_v31 = vrot.slane %v6232_v25, 7 }
 0x227   :  { %1110 = vst.msk [vmem:[#allocation2 + $0x40] sm:$0xff] %vm1105_vm15, %v1072_v8  ;;  %1687 = vrot.lane.b32.xlu1 %v6067_v14, %s4869_s29  ;;  %v6352_v14 = vld [vmem:[%s7198_s0 + $0x88] sm:$0xff] }
 0x228   :  { %1685 = vrot.lane.b32.xlu0 %v5975_v20, %s4869_s29 }
 0x229   :  { %v1564_v5 = vpop.permute.xlu1 %1563 }
 0x22a   :  { %1603 = vst.msk [vmem:[#allocation2 + $0x30] sm:$0xff] %vm1599_vm6, %v1564_v5  ;;  %v1562_v63 = vpop.permute.xlu0 %1561 }
 0x22b   :  { %1602 = vst.msk [vmem:[#allocation2 + $0x20] sm:$0xff] %vm1599_vm6, %v1562_v63  ;;  %1749 = vrot.lane.b32.xlu1 %v1736_v26, %s4870_s30 }
 0x22c   :  { %1747 = vrot.lane.b32.xlu0 %v6086_v28, %s4870_s30 }
 0x22d   :  { %v1134_v38 = vpop.permute.xlu1 %1133 }
 0x22e   :  { %1172 = vst.msk [vmem:[#allocation2 + $0x40] sm:$0xff] %vm1167_vm0, %v1134_v38  ;;  %v954_v20 = vpop.permute.xlu0 %953 }
 0x22f   :  { %989 = vst.msk [vmem:[#allocation2 + $0x80] sm:$0xff] %vm979_vm13, %v954_v20  ;;  %1083 = vrot.lane.b32.xlu1 %v7384_v24, %s4858_s17  ;;  %v7391_v20 = vld [vmem:[#allocation20_spill] sm:$0xff] }
 0x230   :  { %1081 = vrot.lane.b32.xlu0 %v7385_v11, %s4858_s17 }
 0x231   :  { %v1624_v60 = vpop.permute.xlu1 %1623 }
 0x232   :  { %1664 = vst.msk [vmem:[#allocation2 + $0x20] sm:$0xff] %vm1661_vm4, %v1624_v60  ;;  %v1136_v33 = vpop.permute.xlu0 %1135 }
 0x233   :  { %1173 = vst.msk [vmem:[#allocation2 + $0x50] sm:$0xff] %vm1167_vm0, %v1136_v33  ;;  %1509 = vrot.lane.b32.xlu1 %v7372_v4, %s4866_s26  ;;  %v7392_v33 = vld [vmem:[#allocation31_spill] sm:$0xff] }
 0x234   :  { %1381 = vrot.lane.b32.xlu0 %v1365_v27, %s4863_s24 }
 0x235   :  { %v952_v28 = vpop.permute.xlu1 %951 }
 0x236   :  { %988 = vst.msk [vmem:[#allocation2 + $0x70] sm:$0xff] %vm979_vm13, %v952_v28  ;;  %v1626_v57 = vpop.permute.xlu0 %1625  ;;  %v7393_v28 = vld [vmem:[#allocation32_spill] sm:$0xff] }
 0x237   :  { %1665 = vst.msk [vmem:[#allocation2 + $0x30] sm:$0xff] %vm1661_vm4, %v1626_v57  ;;  %1143 = vrot.lane.b32.xlu1 %v5596_v53, %s4859_s18 }
 0x238   :  { %1573 = vrot.lane.b32.xlu0 %v7385_v11, %s4867_s27 }
 0x239   :  { %v1192_v50 = vpop.permute.xlu1 %1191 }
 0x23a   :  { %1230 = vst.msk [vmem:[#allocation2 + $0x40] sm:$0xff] %vm1225_vm3, %v1192_v50  ;;  %v1018_v4 = vpop.permute.xlu0 %1017 }
 0x23b   :  { %1053 = vst.msk [vmem:[#allocation2 + $0x80] sm:$0xff] %vm7298_vm14, %v1018_v4  ;;  %1443 = vrot.lane.b32.xlu1 %v1427_v61, %s4865_s25 }
 0x23c   :  { %1145 = vrot.lane.b32.xlu0 %v5591_v12, %s4859_s18 }
 0x23d   :  { %v1682_v27 = vpop.permute.xlu1 %1681 }
 0x23e   :  { %1722 = vst.msk [vmem:[#allocation2 + $0x20] sm:$0xff] %vm1719_vm5, %v1682_v27  ;;  %v1194_v42 = vpop.permute.xlu0 %1193  ;;  %v7394_v27 = vld [vmem:[#allocation43_spill] sm:$0xff] }
 0x23f   :  { %1231 = vst.msk [vmem:[#allocation2 + $0x50] sm:$0xff] %vm1225_vm3, %v1194_v42  ;;  %1635 = vrot.lane.b32.xlu1 %v5596_v53, %s4868_s28  ;;  %v7395_v42 = vld [vmem:[#allocation44_spill] sm:$0xff] }
 0x240   :  { %1571 = vrot.lane.b32.xlu0 %v7374_v45, %s4867_s27  ;;  %v1492_v45 = vsel %vm7386_vm1, %v997_v22, %v1491_v49  ;;  %vm7291_vm1 = vcmask 527840  }
 0x241   :  { %v1744_v39 = vpop.permute.xlu1 %1743 }
 0x242   :  { %1787 = vst.msk [vmem:[#allocation2 + $0x20] sm:$0xff] %vm7290_vm12, %v1744_v39  ;;  %v1684_v61 = vpop.permute.xlu0 %1683 }
 0x243   :  { %1788 = vst.msk [vmem:[#allocation2 + $0x28] sm:$0xff] %vm1783_vm9, %v1744_v39  ;;  %1203 = vrot.lane.b32.xlu1 %v4998_v19, %s4860_s19 }
 0x244   :  { %1723 = vst.msk [vmem:[#allocation2 + $0x30] sm:$0xff] %vm1719_vm5, %v1684_v61  ;;  %1201 = vrot.lane.b32.xlu0 %v4986_v17, %s4860_s19 }
 0x245   :  { %v1016_v53 = vpop.permute.xlu1 %1015 }
 0x246   :  { %1052 = vst.msk [vmem:[#allocation2 + $0x70] sm:$0xff] %vm7298_vm14, %v1016_v53  ;;  %v1746_v51 = vpop.permute.xlu0 %1745 }
 0x247   :  { %1789 = vst.msk [vmem:[#allocation2 + $0x30] sm:$0xff] %vm7290_vm12, %v1746_v51  ;;  %1633 = vrot.lane.b32.xlu1 %v5577_v10, %s4868_s28  ;;  %vm7387_vm12 = vcmask 1041408  }
 0x248   :  { %1790 = vst.msk [vmem:[#allocation2 + $0x38] sm:$0xff] %vm1783_vm9, %v1746_v51  ;;  %1507 = vrot.lane.b32.xlu0 %v1492_v45, %s4866_s26  ;;  %v1554_v10 = vsel %vm7387_vm12, %v1059_v34, %v1553_v47  ;;  %vm7292_vm12 = vcmask 568840   ;;  %v6420_v51 = vld [vmem:[%s7198_s0 + $0x90] sm:$0xff] }
 0x249   :  { %v1254_v3 = vpop.permute.xlu1 %1253  ;;  %v1817_v48 = vld [vmem:[#allocation2 + $0x20] sm:$0xff] }
 0x24a   :  { %1292 = vst.msk [vmem:[#allocation2 + $0x40] sm:$0xff] %vm7303_vm7, %v1254_v3  ;;  %v1080_v30 = vpop.permute.xlu0 %1079  ;;  %v1818_v32 = vld [vmem:[#allocation2 + $0x28] sm:$0xff] }
 0x24b   :  { %1115 = vst.msk [vmem:[#allocation2 + $0x80] sm:$0xff] %vm1105_vm15, %v1080_v30  ;;  %1263 = vrot.lane.b32.xlu1 %v5060_v36, %s4861_s20 }
 0x24c   :  { %1693 = vrot.lane.b32.xlu0 %v4986_v17, %s4869_s29 }
 0x24d   :  { %v950_v22 = vpop.permute.xlu1 %949 }
 0x24e   :  { %987 = vst.msk [vmem:[#allocation2 + $0x60] sm:$0xf] %vm7291_vm1, %v950_v22  ;;  %v1256_v15 = vpop.permute.xlu0 %1255  ;;  %v1819_v7 = vld [vmem:[#allocation2 + $0x30] sm:$0xff]  ;;  %vm7388_vm1 = vcmask 1040384  }
 0x24f   :  { %v1820_v55 = vld [vmem:[#allocation2 + $0x38] sm:$0xff]  ;;  %1293 = vst.msk [vmem:[#allocation2 + $0x50] sm:$0xff] %vm7303_vm7, %v1256_v15  ;;  %1569 = vrot.lane.b32.xlu1 %v1554_v10, %s4867_s27  ;;  %v1949_v1 = vpack.c.bf16 %v1819_v7, %v1817_v48  ;;  %v1367_v15 = vrot.slane %v6420_v51, 3  ;;  %v999_v7 = vrot.slane %v6420_v51, 5 }
 0x250   :  { %v1950_v54 = vpack.c.bf16 %v1820_v55, %v1818_v32  ;;  %1265 = vrot.lane.b32.xlu0 %v5076_v41, %s4861_s20 }
 0x251   :  { %v1142_v17 = vpop.permute.xlu1 %1141 }
 0x252   :  { %4701 = vmatprep.mubr.msk.bf16.mxu0 %vm1783_vm9, %v1950_v54  ;;  %4708 = vmatprep.mubr.msk.bf16.mxu1 %vm1783_vm9, %v1950_v54  ;;  %1177 = vst.msk [vmem:[#allocation2 + $0x80] sm:$0xff] %vm1167_vm0, %v1142_v17  ;;  %v1078_v34 = vpop.permute.xlu0 %1077 }
 0x253   :  { %2221 = vmatmul.mubr.bf16.gmra.mrb[4].mxu0 %v1949_v1  ;;  %2320 = vmatmul.mubr.bf16.gmra.mrb[4].mxu1 %v1949_v1  ;;  %1114 = vst.msk [vmem:[#allocation2 + $0x70] sm:$0xff] %vm1105_vm15, %v1078_v34 }
 0x254   :  { %1755 = vrot.lane.b32.xlu1 %v5060_v36, %s4870_s30  ;;  %1691 = vrot.lane.b32.xlu0 %v4981_v16, %s4869_s29  ;;  %v1616_v16 = vsel %vm7388_vm1, %v1121_v18, %v1615_v31  ;;  %vm7293_vm1 = vcmask 609840  }
 0x255   :  { %v1318_v0 = vpop.permute.xlu1 %1317 }
 0x256   :  { %1355 = vst.msk [vmem:[#allocation2 + $0x50] sm:$0xff] %vm7304_vm8, %v1318_v0  ;;  %v1316_v8 = vpop.permute.xlu0 %1315 }
 0x257   :  { %1354 = vst.msk [vmem:[#allocation2 + $0x40] sm:$0xff] %vm7304_vm8, %v1316_v8 }
 0x258   :  { %1327 = vrot.lane.b32.xlu1 %v5156_v9, %s4862_s21  ;;  %1325 = vrot.lane.b32.xlu0 %v5140_v62, %s4862_s21 }
 0x259   :  { %v1140_v26 = vpop.permute.xlu1 %1139 }
 0x25a   :  { %1176 = vst.msk [vmem:[#allocation2 + $0x70] sm:$0xff] %vm1167_vm0, %v1140_v26  ;;  %v1014_v36 = vpop.permute.xlu0 %1013 }
 0x25b   :  { %1051 = vst.msk [vmem:[#allocation2 + $0x60] sm:$0xf] %vm7292_vm12, %v1014_v36  ;;  %vm7390_vm12 = vcmask 1043456  }
 0x25c   :  { %1753 = vrot.lane.b32.xlu1 %v5063_v37, %s4870_s30  ;;  %1631 = vrot.lane.b32.xlu0 %v1616_v16, %s4868_s28  ;;  %v6355_v37 = vrot.slane %v6352_v14, 4  ;;  %v1061_v16 = vrot.slane %v6420_v51, 6 }
 0x25d   :  { %v1378_v9 = vpop.permute.xlu1 %1377 }
 0x25e   :  { %1416 = vst.msk [vmem:[#allocation2 + $0x40] sm:$0xff] %vm1411_vm10, %v1378_v9  ;;  %v1200_v62 = vpop.permute.xlu0 %1199 }
 0x25f   :  { %1235 = vst.msk [vmem:[#allocation2 + $0x80] sm:$0xff] %vm1225_vm3, %v1200_v62 }
 0x260   :  { %1389 = vrot.lane.b32.xlu1 %v5234_v6, %s4863_s24  ;;  %1387 = vrot.lane.b32.xlu0 %v5218_v56, %s4863_s24  ;;  %v7389_v56 = vld [vmem:[#allocation19_spill] sm:$0xff] }
 0x261   :  { %v1076_v18 = vpop.permute.xlu1 %1075  ;;  %v6367_v6 = vsel %vm7390_vm12, %v7389_v56, %v6355_v37  ;;  %vm7296_vm12 = vcmask 650840  }
 0x262   :  { %1113 = vst.msk [vmem:[#allocation2 + $0x60] sm:$0xf] %vm7293_vm1, %v1076_v18  ;;  %v1380_v5 = vpop.permute.xlu0 %1379  ;;  %vm7294_vm1 = vcmask 691840  }
 0x263   :  { %1417 = vst.msk [vmem:[#allocation2 + $0x50] sm:$0xff] %vm1411_vm10, %v1380_v5  ;;  %v1123_v5 = vrot.slane %v6420_v51, 7 }
 0x264   :  { %1751 = vrot.lane.b32.xlu1 %v1735_v13, %s4870_s30  ;;  %1689 = vrot.lane.b32.xlu0 %v6232_v25, %s4869_s29 }
 0x265   :  { %v1262_v63 = vpop.permute.xlu1 %1261 }
 0x266   :  { %1297 = vst.msk [vmem:[#allocation2 + $0x80] sm:$0xff] %vm7303_vm7, %v1262_v63  ;;  %v1198_v38 = vpop.permute.xlu0 %1197 }
 0x267   :  { %1234 = vst.msk [vmem:[#allocation2 + $0x70] sm:$0xff] %vm1225_vm3, %v1198_v38 }
 0x268   :  { %961 = vrot.lane.b32.xlu1 %v6367_v6, %s4856_s15  ;;  %959 = vrot.lane.b32.xlu0 %v7391_v20, %s4856_s15 }
 0x269   :  { %v1442_v13 = vpop.permute.xlu1 %1441 }
 0x26a   :  { %1479 = vst.msk [vmem:[#allocation2 + $0x50] sm:$0xff] %vm1473_vm11, %v1442_v13  ;;  %v1440_v25 = vpop.permute.xlu0 %1439 }
 0x26b   :  { %1478 = vst.msk [vmem:[#allocation2 + $0x40] sm:$0xff] %vm1473_vm11, %v1440_v25 }
 0x26c   :  { %1451 = vrot.lane.b32.xlu1 %v7391_v20, %s4865_s25  ;;  %1449 = vrot.lane.b32.xlu0 %v7380_v58, %s4865_s25  ;;  %v7406_v20 = vrot.slane %v5386_v52, 7 }
 0x26d   :  { %v1260_v11 = vpop.permute.xlu1 %1259 }
 0x26e   :  { %1296 = vst.msk [vmem:[#allocation2 + $0x70] sm:$0xff] %vm7303_vm7, %v1260_v11  ;;  %v1138_v60 = vpop.permute.xlu0 %1137 }
 0x26f   :  { %1175 = vst.msk [vmem:[#allocation2 + $0x60] sm:$0xf] %vm7296_vm12, %v1138_v60  ;;  %vm7297_vm12 = vcmask 773840  }
 0x270   :  { %1025 = vrot.lane.b32.xlu1 %v7392_v33, %s4857_s16  ;;  %1023 = vrot.lane.b32.xlu0 %v7393_v28, %s4857_s16 }
 0x271   :  { %v1504_v57 = vpop.permute.xlu1 %1503 }
 0x272   :  { %1542 = vst.msk [vmem:[#allocation2 + $0x40] sm:$0xff] %vm1537_vm2, %v1504_v57  ;;  %v1324_v50 = vpop.permute.xlu0 %1323 }
 0x273   :  { %1359 = vst.msk [vmem:[#allocation2 + $0x80] sm:$0xff] %vm7304_vm8, %v1324_v50 }
 0x274   :  { %1515 = vrot.lane.b32.xlu1 %v7393_v28, %s4866_s26  ;;  %1513 = vrot.lane.b32.xlu0 %v7383_v59, %s4866_s26  ;;  %v49_v28 = vld [vmem:[%s7198_s0 + $0x98] sm:$0x1f] }
 0x275   :  { %v1196_v58 = vpop.permute.xlu1 %1195  ;;  %v1737_v50 = vrot.slane %v49_v28, 1 }
 0x276   :  { %1233 = vst.msk [vmem:[#allocation2 + $0x60] sm:$0xf] %vm7294_vm1, %v1196_v58  ;;  %v1506_v4 = vpop.permute.xlu0 %1505  ;;  %vm7295_vm1 = vcmask 732840  }
 0x277   :  { %1543 = vst.msk [vmem:[#allocation2 + $0x50] sm:$0xff] %vm1537_vm2, %v1506_v4 }
 0x278   :  { %1087 = vrot.lane.b32.xlu1 %v7394_v27, %s4858_s17  ;;  %1085 = vrot.lane.b32.xlu0 %v7395_v42, %s4858_s17 }
 0x279   :  { %v1386_v39 = vpop.permute.xlu1 %1385 }
 0x27a   :  { %1421 = vst.msk [vmem:[#allocation2 + $0x80] sm:$0xff] %vm1411_vm10, %v1386_v39  ;;  %v1322_v49 = vpop.permute.xlu0 %1321 }
 0x27b   :  { %1358 = vst.msk [vmem:[#allocation2 + $0x70] sm:$0xff] %vm7304_vm8, %v1322_v49 }
 0x27c   :  { %1577 = vrot.lane.b32.xlu1 %v7395_v42, %s4867_s27  ;;  %1575 = vrot.lane.b32.xlu0 %v7384_v24, %s4867_s27  ;;  %v1493_v42 = vrot.slane %v49_v28, 5 }
 0x27d   :  { %v1568_v59 = vpop.permute.xlu1 %1567 }
 0x27e   :  { %1605 = vst.msk [vmem:[#allocation2 + $0x50] sm:$0xff] %vm1599_vm6, %v1568_v59  ;;  %v1566_v61 = vpop.permute.xlu0 %1565 }
 0x27f   :  { %1604 = vst.msk [vmem:[#allocation2 + $0x40] sm:$0xff] %vm1599_vm6, %v1566_v61  ;;  %v1617_v61 = vrot.slane %v49_v28, 7 }
 0x280   :  { %1149 = vrot.lane.b32.xlu1 %v5607_v44, %s4859_s18  ;;  %1147 = vrot.lane.b32.xlu0 %v5610_v2, %s4859_s18 }
 0x281   :  { %v958_v53 = vpop.permute.xlu1 %957 }
 0x282   :  { %991 = vst.msk [vmem:[#allocation2 + $0xa0] sm:$0xff] %vm979_vm13, %v958_v53  ;;  %v956_v45 = vpop.permute.xlu0 %955 }
 0x283   :  { %990 = vst.msk [vmem:[#allocation2 + $0x90] sm:$0xff] %vm979_vm13, %v956_v45  ;;  %v1555_v45 = vrot.slane %v49_v28, 6 }
 0x284   :  { %1639 = vrot.lane.b32.xlu1 %v5610_v2, %s4868_s28  ;;  %1637 = vrot.lane.b32.xlu0 %v5591_v12, %s4868_s28  ;;  %v6429_v12 = vrot.slane %v6420_v51, 1 }
 0x285   :  { %v1384_v24 = vpop.permute.xlu1 %1383 }
 0x286   :  { %1420 = vst.msk [vmem:[#allocation2 + $0x70] sm:$0xff] %vm1411_vm10, %v1384_v24  ;;  %v1258_v47 = vpop.permute.xlu0 %1257 }
 0x287   :  { %1295 = vst.msk [vmem:[#allocation2 + $0x60] sm:$0xf] %vm7295_vm1, %v1258_v47  ;;  %vm7396_vm1 = vcmask 1046528  }
 0x288   :  { %1207 = vrot.lane.b32.xlu1 %v6352_v14, %s4860_s19  ;;  %1205 = vrot.lane.b32.xlu0 %v5053_v35, %s4860_s19  ;;  %v6440_v30 = vsel %vm7396_vm1, %v5699_v21, %v6429_v12  ;;  %vm7397_vm1 = vcmask 1045504  }
 0x289   :  { %v1628_v2 = vpop.permute.xlu1 %1627 }
 0x28a   :  { %1666 = vst.msk [vmem:[#allocation2 + $0x40] sm:$0xff] %vm1661_vm4, %v1628_v2  ;;  %v1448_v3 = vpop.permute.xlu0 %1447 }
 0x28b   :  { %1483 = vst.msk [vmem:[#allocation2 + $0x80] sm:$0xff] %vm1473_vm11, %v1448_v3 }
 0x28c   :  { %1697 = vrot.lane.b32.xlu1 %v5053_v35, %s4869_s29  ;;  %1695 = vrot.lane.b32.xlu0 %v4998_v19, %s4869_s29  ;;  %v1305_v19 = vrot.slane %v6420_v51, 2 }
 0x28d   :  { %v1020_v10 = vpop.permute.xlu1 %1019 }
 0x28e   :  { %1054 = vst.msk [vmem:[#allocation2 + $0x90] sm:$0xff] %vm7298_vm14, %v1020_v10  ;;  %v1630_v22 = vpop.permute.xlu0 %1629  ;;  %v1306_v32 = vsel %vm7397_vm1, %v5757_v29, %v1305_v19  ;;  %vm7399_vm1 = vcmask 1048552  }
 0x28f   :  { %1667 = vst.msk [vmem:[#allocation2 + $0x50] sm:$0xff] %vm1661_vm4, %v1630_v22 }
 0x290   :  { %1269 = vrot.lane.b32.xlu1 %v6440_v30, %s4861_s20  ;;  %1267 = vrot.lane.b32.xlu0 %v5710_v40, %s4861_s20 }
 0x291   :  { %v1320_v35 = vpop.permute.xlu1 %1319 }
 0x292   :  { %1357 = vst.msk [vmem:[#allocation2 + $0x60] sm:$0xf] %vm7297_vm12, %v1320_v35  ;;  %v1022_v21 = vpop.permute.xlu0 %1021  ;;  %vm7398_vm12 = vcmask 1044480   ;;  %v1997_v35 = vlaneseq }
 0x293   :  { %1055 = vst.msk [vmem:[#allocation2 + $0xa0] sm:$0xff] %vm7298_vm14, %v1022_v21  ;;  %vm7402_vm14 = vcmask 1042432  }
 0x294   :  { %1759 = vrot.lane.b32.xlu1 %v5710_v40, %s4870_s30  ;;  %1757 = vrot.lane.b32.xlu0 %v5076_v41, %s4870_s30  ;;  %v1368_v41 = vsel %vm7398_vm12, %v5815_v46, %v1367_v15  ;;  %vm7400_vm12 = vmmov %vm7399_vm1 }
 0x295   :  { %v1512_v55 = vpop.permute.xlu1 %1511 }
 0x296   :  { %1547 = vst.msk [vmem:[#allocation2 + $0x80] sm:$0xff] %vm1537_vm2, %v1512_v55  ;;  %v1446_v48 = vpop.permute.xlu0 %1445 }
 0x297   :  { %1482 = vst.msk [vmem:[#allocation2 + $0x70] sm:$0xff] %vm1473_vm11, %v1446_v48 }
 0x298   :  { %1331 = vrot.lane.b32.xlu1 %v1306_v32, %s4862_s21  ;;  %1329 = vrot.lane.b32.xlu0 %v5768_v23, %s4862_s21  ;;  %v1429_v23 = vrot.slane %v6420_v51, 4 }
 0x299   :  { %v1688_v40 = vpop.permute.xlu1 %1687 }
 0x29a   :  { %1725 = vst.msk [vmem:[#allocation2 + $0x50] sm:$0xff] %vm1719_vm5, %v1688_v40  ;;  %v1686_v29 = vpop.permute.xlu0 %1685  ;;  %v1998_v40 = vshrl.u32 %v1997_v35, 7 }
 0x29b   :  { %1724 = vst.msk [vmem:[#allocation2 + $0x40] sm:$0xff] %vm1719_vm5, %v1686_v29 }
 0x29c   :  { %1393 = vrot.lane.b32.xlu1 %v1368_v41, %s4863_s24  ;;  %1391 = vrot.lane.b32.xlu0 %v5826_v43, %s4863_s24  ;;  %v7401_v43 = vrot.slane %v5386_v52, 5 }
 0x29d   :  { %v1750_v54 = vpop.permute.xlu1 %1749 }
 0x29e   :  { %1793 = vst.msk [vmem:[#allocation2 + $0x50] sm:$0xff] %vm7399_vm1, %v1750_v54  ;;  %v1748_v46 = vpop.permute.xlu0 %1747  ;;  %v1000_v1 = vsel %vm7402_vm14, %v7401_v43, %v999_v7  ;;  %vm7403_vm1 = vcmask 1043456   ;;  %vm7405_vm14 = vcmask 1041408   ;;  %v1999_v43 = vsub.s32 0, %v1998_v40 }
 0x29f   :  { %1794 = vst.msk [vmem:[#allocation2 + $0x58] sm:$0xff] %vm1783_vm9, %v1750_v54  ;;  %1792 = vst.msk [vmem:[#allocation2 + $0x48] sm:$0xff] %vm1783_vm9, %v1748_v46  ;;  %v1430_v34 = vsel %vm7403_vm1, %v6355_v37, %v1429_v23  ;;  %vm7300_vm1 = vcmask 855840  }
 0x2a0   :  { %1791 = vst.msk [vmem:[#allocation2 + $0x40] sm:$0xff] %vm7400_vm12, %v1748_v46  ;;  %1453 = vrot.lane.b32.xlu1 %v6367_v6, %s4865_s25  ;;  %963 = vrot.lane.b32.xlu0 %v6355_v37, %s4856_s15  ;;  %vm7299_vm12 = vcmask 814840   ;;  %v7404_v6 = vrot.slane %v5386_v52, 6 }
 0x2a1   :  { %v1084_v17 = vpop.permute.xlu1 %1083 }
 0x2a2   :  { %1117 = vst.msk [vmem:[#allocation2 + $0xa0] sm:$0xff] %vm1105_vm15, %v1084_v17  ;;  %v1082_v0 = vpop.permute.xlu0 %1081  ;;  %v1062_v63 = vsel %vm7405_vm14, %v7404_v6, %v1061_v16  ;;  %vm7408_vm14 = vcmask 1046528  }
 0x2a3   :  { %1116 = vst.msk [vmem:[#allocation2 + $0x90] sm:$0xff] %vm1105_vm15, %v1082_v0  ;;  %v2007_v0 = vsub.s32 2, %v1998_v40 }
 0x2a4   :  { %1027 = vrot.lane.b32.xlu1 %v1000_v1, %s4857_s16  ;;  %1455 = vrot.lane.b32.xlu0 %v1430_v34, %s4865_s25 }
 0x2a5   :  { %v1510_v31 = vpop.permute.xlu1 %1509  ;;  %v1823_v26 = vld [vmem:[#allocation2 + $0x50] sm:$0xff] }
 0x2a6   :  { %v1824_v8 = vld [vmem:[#allocation2 + $0x58] sm:$0xff]  ;;  %1546 = vst.msk [vmem:[#allocation2 + $0x70] sm:$0xff] %vm1537_vm2, %v1510_v31  ;;  %v1382_v36 = vpop.permute.xlu0 %1381  ;;  %v1822_v9 = vld [vmem:[#allocation2 + $0x48] sm:$0xff] }
 0x2a7   :  { %v1821_v62 = vld [vmem:[#allocation2 + $0x40] sm:$0xff]  ;;  %1419 = vst.msk [vmem:[#allocation2 + $0x60] sm:$0xf] %vm7299_vm12, %v1382_v36  ;;  %v1952_v37 = vpack.c.bf16 %v1824_v8, %v1822_v9  ;;  %vm7407_vm12 = vcmask 1040384   ;;  %v2003_v9 = vsub.s32 1, %v1998_v40 }
 0x2a8   :  { %1519 = vrot.lane.b32.xlu1 %v1000_v1, %s4866_s26  ;;  %v1951_v18 = vpack.c.bf16 %v1823_v26, %v1821_v62  ;;  %1517 = vrot.lane.b32.xlu0 %v7392_v33, %s4866_s26  ;;  %v1124_v13 = vsel %vm7407_vm12, %v7406_v20, %v1123_v5  ;;  %vm7301_vm12 = vcmask 896840   ;;  %v1995_v8 = vld [vmem:[%s7200_s2] sm:$0x7]  ;;  %s4872_s2 = smov [#allocation6]  }
 0x2a9   :  { %4702 = vmatprep.mubr.msk.bf16.mxu0 %vm1783_vm9, %v1952_v37  ;;  %4709 = vmatprep.mubr.msk.bf16.mxu1 %vm1783_vm9, %v1952_v37  ;;  %v1144_v56 = vpop.permute.xlu1 %1143  ;;  %v4871_v37 = vmov 1966171168   ;;  %v6607_v6 = vrot.slane %v1995_v8, %v1999_v43  ;;  %s4646_s16 = sshll.u32 %s4872_s2, 4  ;;  %s4647_s16 = int_to_ptr.vmem [resolvable:$true] %s4646_s16 }
 0x2aa   :  { %1178 = vst.msk [vmem:[#allocation2 + $0x90] sm:$0xff] %vm1167_vm0, %v1144_v56  ;;  %v1574_v38 = vpop.permute.xlu0 %1573  ;;  %2231 = vmatmul.mubr.bf16.gmra.mrb[8].mxu0 %v1951_v18  ;;  %2328 = vmatmul.mubr.bf16.gmra.mrb[8].mxu1 %v1951_v18  ;;  %v2449_v18 = vunpack.c.l.s4 %v4871_v37  ;;  %p4821_p9 = scmp.lt.s32.totalorder %s4647_s16, %s4647_s16 }
 0x2ab   :  { %1609 = vst.msk [vmem:[#allocation2 + $0x80] sm:$0xff] %vm1599_vm6, %v1574_v38  ;;  %v6612_v38 = vrot.slane %v1995_v8, %v2003_v9 }
 0x2ac   :  { %1579 = vrot.lane.b32.xlu1 %v7394_v27, %s4867_s27  ;;  %1089 = vrot.lane.b32.xlu0 %v1062_v63, %s4858_s17  ;;  %s4816_s17 = scalar_lea.vmem %s4647_s16, 384 }
 0x2ad   :  { %v1444_v25 = vpop.permute.xlu1 %1443  ;;  %p4817_p8 = scmp.ne.s32.totalorder %s4647_s16, %s4816_s17  ;;  %p4822_p10 = scmp.lt.s32.totalorder %s4816_s17, %s4816_s17 }
 0x2ae   :  { %1481 = vst.msk [vmem:[#allocation2 + $0x60] sm:$0xf] %vm7300_vm1, %v1444_v25  ;;  %v1146_v11 = vpop.permute.xlu0 %1145  ;;  %vm7302_vm1 = vcmask 937840   ;;  %v2450_v25 = vunpack.c.0.s8 %v2449_v18 }
 0x2af   :  { %1179 = vst.msk [vmem:[#allocation2 + $0xa0] sm:$0xff] %vm1167_vm0, %v1146_v11  ;;  %p4823_p11 = por %p4822_p10, %p4821_p9 }
 0x2b0   :  { %1151 = vrot.lane.b32.xlu1 %v1124_v13, %s4859_s18  ;;  %1581 = vrot.lane.b32.xlu0 %v1062_v63, %s4867_s27  ;;  %v6609_v63 = vrot.slane %v1995_v8, %v2007_v0 }
 0x2b1   :  { %v1636_v60 = vpop.permute.xlu1 %1635  ;;  %p4824_p12 = pnand %p4823_p11, %p4817_p8 }
 0x2b2   :  { %1671 = vst.msk [vmem:[#allocation2 + $0x80] sm:$0xff] %vm1661_vm4, %v1636_v60  ;;  %v1572_v33 = vpop.permute.xlu0 %1571 }
 0x2b3   :  { %1608 = vst.msk [vmem:[#allocation2 + $0x70] sm:$0xff] %vm1599_vm6, %v1572_v33 }
 0x2b4   :  { %1643 = vrot.lane.b32.xlu1 %v1124_v13, %s4868_s28  ;;  %1641 = vrot.lane.b32.xlu0 %v5607_v44, %s4868_s28 }
 0x2b5   :  { %v1204_v52 = vpop.permute.xlu1 %1203 }
 0x2b6   :  { %1237 = vst.msk [vmem:[#allocation2 + $0xa0] sm:$0xff] %vm1225_vm3, %v1204_v52  ;;  %v1202_v57 = vpop.permute.xlu0 %1201 }
 0x2b7   :  { %1236 = vst.msk [vmem:[#allocation2 + $0x90] sm:$0xff] %vm1225_vm3, %v1202_v57 }
 0x2b8   :  { %1699 = vrot.lane.b32.xlu1 %v6352_v14, %s4869_s29  ;;  %1209 = vrot.lane.b32.xlu0 %v6420_v51, %s4860_s19  ;;  %v1738_v14 = vsel %vm7408_vm14, %v6429_v12, %v1737_v50  ;;  %vm7409_vm14 = vcmask 1042432  }
 0x2b9   :  { %v1634_v58 = vpop.permute.xlu1 %1633  ;;  %v1494_v59 = vsel %vm7409_vm14, %v999_v7, %v1493_v42  ;;  %vm7412_vm14 = vcmask 1041408  }
 0x2ba   :  { %1670 = vst.msk [vmem:[#allocation2 + $0x70] sm:$0xff] %vm1661_vm4, %v1634_v58  ;;  %v1508_v44 = vpop.permute.xlu0 %1507  ;;  %v1556_v2 = vsel %vm7412_vm14, %v1061_v16, %v1555_v45  ;;  %vm1726_vm14 = vcmask 1019840  }
 0x2bb   :  { %1545 = vst.msk [vmem:[#allocation2 + $0x60] sm:$0xf] %vm7301_vm12, %v1508_v44  ;;  %vm7410_vm12 = vcmask 1048552  }
 0x2bc   :  { %1271 = vrot.lane.b32.xlu1 %v6429_v12, %s4861_s20  ;;  %1701 = vrot.lane.b32.xlu0 %v6420_v51, %s4869_s29 }
 0x2bd   :  { %v1264_v4 = vpop.permute.xlu1 %1263 }
 0x2be   :  { %1298 = vst.msk [vmem:[#allocation2 + $0x90] sm:$0xff] %vm7303_vm7, %v1264_v4  ;;  %v1694_v27 = vpop.permute.xlu0 %1693 }
 0x2bf   :  { %1729 = vst.msk [vmem:[#allocation2 + $0x80] sm:$0xff] %vm1719_vm5, %v1694_v27  ;;  %v6619_v27 = vsub.s32 %v2450_v25, %v1998_v40 }
 0x2c0   :  { %1763 = vrot.lane.b32.xlu1 %v1738_v14, %s4870_s30  ;;  %1761 = vrot.lane.b32.xlu0 %v6440_v30, %s4870_s30 }
 0x2c1   :  { %v1570_v39 = vpop.permute.xlu1 %1569 }
 0x2c2   :  { %1607 = vst.msk [vmem:[#allocation2 + $0x60] sm:$0xf] %vm7302_vm1, %v1570_v39  ;;  %v1266_v49 = vpop.permute.xlu0 %1265  ;;  %vm7411_vm1 = vcmask 1040384  }
 0x2c3   :  { %1299 = vst.msk [vmem:[#allocation2 + $0xa0] sm:$0xff] %vm7303_vm7, %v1266_v49  ;;  %v1618_v47 = vsel %vm7411_vm1, %v1123_v5, %v1617_v61  ;;  %vm7413_vm7 = vcmask 1048552   ;;  %vm1797_vm1 = vcmask 11264  }
 0x2c4   :  { %1395 = vrot.lane.b32.xlu1 %v1367_v15, %s4863_s24  ;;  %1333 = vrot.lane.b32.xlu0 %v1305_v19, %s4862_s21 }
 0x2c6   :  { %v1756_v53 = vpop.permute.xlu1 %1755  ;;  %v1692_v24 = vpop.permute.xlu0 %1691 }
 0x2c7   :  { %1801 = vst.msk [vmem:[#allocation2 + $0x80] sm:$0xff] %vm7410_vm12, %v1756_v53  ;;  %vm1668_vm12 = vcmask 978840  }
 0x2c8   :  { %1802 = vst.msk [vmem:[#allocation2 + $0x88] sm:$0xff] %vm1783_vm9, %v1756_v53  ;;  %1521 = vrot.lane.b32.xlu1 %v1494_v59, %s4866_s26  ;;  %1457 = vrot.lane.b32.xlu0 %v1429_v23, %s4865_s25 }
 0x2c9   :  { %1728 = vst.msk [vmem:[#allocation2 + $0x70] sm:$0xff] %vm1719_vm5, %v1692_v24 }
 0x2ca   :  { %v1328_v12 = vpop.permute.xlu1 %1327  ;;  %v1326_v3 = vpop.permute.xlu0 %1325 }
 0x2cb   :  { %1361 = vst.msk [vmem:[#allocation2 + $0xa0] sm:$0xff] %vm7304_vm8, %v1328_v12  ;;  %1360 = vst.msk [vmem:[#allocation2 + $0x90] sm:$0xff] %vm7304_vm8, %v1326_v3  ;;  %vm7305_vm8 = vcmask 1044456  }
 0x2cc   :  { %1645 = vrot.lane.b32.xlu1 %v1618_v47, %s4868_s28  ;;  %1583 = vrot.lane.b32.xlu0 %v1556_v2, %s4867_s27 }
 0x2ce   :  { %v1754_v30 = vpop.permute.xlu1 %1753  ;;  %v1632_v10 = vpop.permute.xlu0 %1631  ;;  %v6590_v32 = vld [vmem:[#allocation2 + $0x80] sm:$0xff] }
 0x2cf   :  { %1799 = vst.msk [vmem:[#allocation2 + $0x70] sm:$0xff] %vm7413_vm7, %v1754_v30  ;;  %v6592_v48 = vld [vmem:[#allocation2 + $0x88] sm:$0xff] }
 0x2d0   :  { %1800 = vst.msk [vmem:[#allocation2 + $0x78] sm:$0xff] %vm1783_vm9, %v1754_v30  ;;  %1765 = vrot.lane.b32.xlu1 %v1737_v50, %s4870_s30  ;;  %1703 = vrot.lane.b32.xlu0 %v49_v28, %s4869_s29  ;;  %v1884_v7 = vcombine.low %v6590_v32, %v6592_v48 }
 0x2d1   :  { %1669 = vst.msk [vmem:[#allocation2 + $0x60] sm:$0xf] %vm1668_vm12, %v1632_v10 }
 0x2d2   :  { %v1390_v51 = vpop.permute.xlu1 %1389  ;;  %v1388_v22 = vpop.permute.xlu0 %1387 }
 0x2d3   :  { %1423 = vst.msk [vmem:[#allocation2 + $0xa0] sm:$0xff] %vm1411_vm10, %v1390_v51  ;;  %1422 = vst.msk [vmem:[#allocation2 + $0x90] sm:$0xff] %vm1411_vm10, %v1388_v22 }
 0x2d6   :  { %v1752_v19 = vpop.permute.xlu1 %1751  ;;  %v1690_v21 = vpop.permute.xlu0 %1689  ;;  %v1827_v41 = vld [vmem:[#allocation2 + $0x70] sm:$0xff] }
 0x2d7   :  { %1798 = vst.msk [vmem:[#allocation2 + $0x68] sm:$0xf] %vm1797_vm1, %v1752_v19  ;;  %v1828_v55 = vld [vmem:[#allocation2 + $0x78] sm:$0xff] }
 0x2d8   :  { %1727 = vst.msk [vmem:[#allocation2 + $0x60] sm:$0xf] %vm1726_vm14, %v1690_v21  ;;  %v1883_v54 = vcombine.high %v1827_v41, %v1828_v55  ;;  %v4661_v34 = vcombine.high %v1828_v55, %v1884_v7 }
 0x2d9   :  { %1796 = vst.msk [vmem:[#allocation2 + $0x60] sm:$0xf] %vm7305_vm8, %v1752_v19 }
 0x2da   :  { %v962_v15 = vpop.permute.xlu1 %961  ;;  %v960_v29 = vpop.permute.xlu0 %959  ;;  %v4660_v36 = vcombine.low %v1883_v54, %v6590_v32 }
 0x2db   :  { %993 = vst.msk [vmem:[#allocation2 + $0xc0] sm:$0xff] %vm979_vm13, %v962_v15  ;;  %992 = vst.msk [vmem:[#allocation2 + $0xb0] sm:$0xff] %vm979_vm13, %v960_v29  ;;  %vm7414_vm13 = vcmask 572936  }
 0x2dc   :  { %vm7415_vm7 = vmmov %vm7414_vm13 }
 0x2de   :  { %v1452_v23 = vpop.permute.xlu1 %1451  ;;  %v1826_v46 = vld [vmem:[#allocation2 + $0x68] sm:$0xf]  ;;  %v1450_v1 = vpop.permute.xlu0 %1449 }
 0x2df   :  { %1485 = vst.msk [vmem:[#allocation2 + $0xa0] sm:$0xff] %vm1473_vm11, %v1452_v23  ;;  %v4659_v17 = vcombine.low %v1826_v46, %v1828_v55  ;;  %1484 = vst.msk [vmem:[#allocation2 + $0x90] sm:$0xff] %vm1473_vm11, %v1450_v1 }
 0x2e0   :  { %v1825_v31 = vld [vmem:[#allocation2 + $0x60] sm:$0xf] }
 0x2e1   :  { %v1954_v26 = vpack.c.bf16 %v4661_v34, %v4659_v17  ;;  %v4658_v16 = vcombine.low %v1825_v31, %v1827_v41 }
 0x2e2   :  { %v1026_v62 = vpop.permute.xlu1 %1025  ;;  %v1024_v5 = vpop.permute.xlu0 %1023 }
 0x2e3   :  { %1057 = vst.msk [vmem:[#allocation2 + $0xc0] sm:$0xff] %vm7414_vm13, %v1026_v62  ;;  %4703 = vmatprep.mubr.msk.bf16.mxu0 %vm1783_vm9, %v1954_v26  ;;  %4710 = vmatprep.mubr.msk.bf16.mxu1 %vm1783_vm9, %v1954_v26  ;;  %v1953_v56 = vpack.c.bf16 %v4660_v36, %v4658_v16 }
 0x2e4   :  { %1056 = vst.msk [vmem:[#allocation2 + $0xb0] sm:$0xff] %vm7415_vm7, %v1024_v5  ;;  %vm7418_vm7 = vcmask 736936  }
 0x2e5   :  { %2241 = vmatmul.mubr.bf16.gmra.mrb[12].mxu0 %v1953_v56  ;;  %2336 = vmatmul.mubr.bf16.gmra.mrb[12].mxu1 %v1953_v56  ;;  %v2212_v20 = vpop.f32.mrb[0].mxu0  ;;  %v2313_v13 = vpop.f32.mrb[0].mxu1  ;;  %vm7419_vm8 = vmmov %vm7418_vm7 }
 0x2e6   :  { %v2213_v11 = vadd.f32 %v2212_v20, %v6607_v6  ;;  %v2314_v60 = vadd.f32 %v2313_v13, %v6609_v63  ;;  %v1516_v33 = vpop.permute.xlu1 %1515  ;;  %v1514_v52 = vpop.permute.xlu0 %1513 }
 0x2e7   :  { %1549 = vst.msk [vmem:[#allocation2 + $0xa0] sm:$0xff] %vm1537_vm2, %v1516_v33  ;;  %1548 = vst.msk [vmem:[#allocation2 + $0x90] sm:$0xff] %vm1537_vm2, %v1514_v52  ;;  %v2214_v28 = vpop.f32.mrb[1].mxu0  ;;  %v2315_v57 = vpop.f32.mrb[1].mxu1 }
 0x2e8   :  { %v2367_v50 = vmax.f32 %v2213_v11, 0.0  ;;  %v2369_v58 = vmax.f32 %v2314_v60, 0.0  ;;  %v2215_v44 = vadd.f32 %v2214_v28, %v6612_v38  ;;  %v2216_v14 = vpop.f32.mrb[2].mxu0  ;;  %v2316_v4 = vpop.f32.mrb[2].mxu1 }
 0x2e9   :  { %v2217_v42 = vadd.f32 %v2216_v14, %v6607_v6  ;;  %v2317_v39 = vadd.f32 %v2316_v4, %v6609_v63  ;;  %v2218_v49 = vpop.f32.mrb[3].mxu0  ;;  %v2318_v59 = vpop.f32.mrb[3].mxu1 }
 0x2ea   :  { %v2447_v61 = vcombine.high %v2369_v58, %v2369_v58  ;;  %v2368_v53 = vmax.f32 %v2215_v44, 0.0  ;;  %v2219_v45 = vadd.f32 %v2218_v49, %v6612_v38  ;;  %v1088_v24 = vpop.permute.xlu1 %1087  ;;  %v1086_v47 = vpop.permute.xlu0 %1085  ;;  %v2468_v22 = vrot.slane %v2369_v58, %v6619_v27 }
 0x2eb   :  { %v2370_v12 = vmax.f32 %v2217_v42, 0.0  ;;  %v2372_v2 = vmax.f32 %v2317_v39, 0.0  ;;  %1119 = vst.msk [vmem:[#allocation2 + $0xc0] sm:$0xff] %vm1105_vm15, %v1088_v24  ;;  %1118 = vst.msk [vmem:[#allocation2 + $0xb0] sm:$0xff] %vm1105_vm15, %v1086_v47  ;;  %vm4372_vm15 = vcmask 523264  }
 0x2ec   :  { %v2475_v3 = vrot.slane %v2447_v61, %v6619_v27  ;;  %v2445_v30 = vcombine.low %v2367_v50, %v2368_v53  ;;  %v2446_v10 = vcombine.high %v2367_v50, %v2368_v53  ;;  %v2371_v51 = vmax.f32 %v2219_v45, 0.0 }
 0x2ed   :  { %v2514_v19 = vcombine.high %v2372_v2, %v2372_v2  ;;  %v2535_v43 = vrot.slane %v2372_v2, %v6619_v27 }
 0x2ee   :  { %v2454_v35 = vrot.slane %v2445_v30, %v6619_v27  ;;  %v2461_v21 = vrot.slane %v2446_v10, %v6619_v27  ;;  %v2512_v15 = vcombine.low %v2370_v12, %v2371_v51  ;;  %v2513_v55 = vcombine.high %v2370_v12, %v2371_v51  ;;  %v1578_v41 = vpop.permute.xlu1 %1577  ;;  %v1576_v40 = vpop.permute.xlu0 %1575 }
 0x2ef   :  { %v2542_v29 = vrot.slane %v2514_v19, %v6619_v27  ;;  %1611 = vst.msk [vmem:[#allocation2 + $0xa0] sm:$0xff] %vm1599_vm6, %v1578_v41  ;;  %1610 = vst.msk [vmem:[#allocation2 + $0x90] sm:$0xff] %vm1599_vm6, %v1576_v40 }
 0x2f0   :  { %v2476_v7 = vcombine.low %v2454_v35, %v2468_v22  ;;  %v2477_v54 = vcombine.high %v2454_v35, %v2468_v22  ;;  %v2478_v23 = vcombine.low %v2461_v21, %v2475_v3  ;;  %v2479_v46 = vcombine.high %v2461_v21, %v2475_v3 }
 0x2f1   :  { %v2521_v1 = vrot.slane %v2512_v15, %v6619_v27  ;;  %v2528_v17 = vrot.slane %v2513_v55, %v6619_v27 }
 0x2f2   :  { %v2486_v34 = vrot.slane %v2476_v7, %v6619_v27  ;;  %v2493_v0 = vrot.slane %v2478_v23, %v6619_v27  ;;  %v2500_v31 = vrot.slane %v2477_v54, %v6619_v27  ;;  %v2507_v8 = vrot.slane %v2479_v46, %v6619_v27  ;;  %v1150_v26 = vpop.permute.xlu1 %1149  ;;  %v1148_v16 = vpop.permute.xlu0 %1147 }
 0x2f3   :  { %v2543_v36 = vcombine.low %v2521_v1, %v2535_v43  ;;  %v2544_v9 = vcombine.high %v2521_v1, %v2535_v43  ;;  %v2545_v62 = vcombine.low %v2528_v17, %v2542_v29  ;;  %v2546_v37 = vcombine.high %v2528_v17, %v2542_v29  ;;  %1181 = vst.msk [vmem:[#allocation2 + $0xc0] sm:$0xff] %vm1167_vm0, %v1150_v26 }
 0x2f4   :  { %1180 = vst.msk [vmem:[#allocation2 + $0xb0] sm:$0xff] %vm1167_vm0, %v1148_v16  ;;  %v3316_v18 = vcombine.low %v2486_v34, %v2500_v31  ;;  %v4714_v5 = vcombine.high %v2486_v34, %v2500_v31  ;;  %v3318_v56 = vcombine.low %v2493_v0, %v2507_v8  ;;  %v4715_v20 = vcombine.high %v2493_v0, %v2507_v8 }
 0x2f5   :  { %v2553_v13 = vrot.slane %v2543_v36, %v6619_v27  ;;  %v2560_v25 = vrot.slane %v2545_v62, %v6619_v27  ;;  %v2567_v11 = vrot.slane %v2544_v9, %v6619_v27  ;;  %v6650_v58 = vrot.slane %v2546_v37, %v6619_v27 }
 0x2f6   :  { %v3326_v60 = vrot.slane %v3316_v18, %v6619_v27  ;;  %v3333_v33 = vrot.slane %v4714_v5, %v6619_v27  ;;  %v3340_v52 = vrot.slane %v3318_v56, %v6619_v27  ;;  %v3347_v28 = vrot.slane %v4715_v20, %v6619_v27  ;;  %v1640_v57 = vpop.permute.xlu1 %1639  ;;  %v1638_v50 = vpop.permute.xlu0 %1637 }
 0x2f7   :  { %v2576_v44 = vcombine.high %v2560_v25, %v2560_v25  ;;  %v3383_v14 = vcombine.low %v2553_v13, %v2567_v11  ;;  %v4716_v4 = vcombine.high %v2553_v13, %v2567_v11  ;;  %1673 = vst.msk [vmem:[#allocation2 + $0xa0] sm:$0xff] %vm1661_vm4, %v1640_v57  ;;  %1672 = vst.msk [vmem:[#allocation2 + $0x90] sm:$0xff] %vm1661_vm4, %v1638_v50  ;;  %vm4374_vm0 = vcmask 520192  }
 0x2f8   :  { %v3348_v42 = vcombine.low %v3326_v60, %v3333_v33  ;;  %v3349_v39 = vcombine.high %v3326_v60, %v3333_v33  ;;  %v3350_v49 = vcombine.low %v3340_v52, %v3347_v28  ;;  %v3351_v59 = vcombine.high %v3340_v52, %v3347_v28 }
 0x2f9   :  { %v3391_v61 = vrot.slane %v3383_v14, %v6619_v27  ;;  %v3398_v53 = vrot.slane %v4716_v4, %v6619_v27  ;;  %v3405_v45 = vrot.slane %v2560_v25, %v6619_v27  ;;  %v6658_v24 = vcombine.low %v6650_v58, %v2576_v44 }
 0x2fa   :  { %v3358_v47 = vrot.slane %v3348_v42, %v6619_v27  ;;  %v3365_v12 = vrot.slane %v3349_v39, %v6619_v27  ;;  %v3372_v2 = vrot.slane %v3350_v49, %v6619_v27  ;;  %v3379_v3 = vrot.slane %v3351_v59, %v6619_v27  ;;  %v1208_v30 = vpop.permute.xlu1 %1207  ;;  %v1206_v10 = vpop.permute.xlu0 %1205 }
 0x2fb   :  { %v3406_v51 = vcombine.low %v3391_v61, %v3398_v53  ;;  %v3407_v22 = vcombine.high %v3391_v61, %v3398_v53  ;;  %v3408_v19 = vcombine.high %v3405_v45, %v3405_v45  ;;  %1239 = vst.msk [vmem:[#allocation2 + $0xc0] sm:$0xff] %vm1225_vm3, %v1208_v30  ;;  %1238 = vst.msk [vmem:[#allocation2 + $0xb0] sm:$0xff] %vm1225_vm3, %v1206_v10  ;;  %vm7416_vm3 = vcmask 1044480  }
 0x2fc   :  { %v3380_v35 = vcombine.low %v3358_v47, %v3372_v2  ;;  %v3381_v21 = vcombine.high %v3358_v47, %v3372_v2  ;;  %v3382_v15 = vcombine.low %v3365_v12, %v3379_v3  ;;  %v3429_v40 = vrot.slane %v3405_v45, %v6619_v27  ;;  %vm7417_vm13 = vmmov %vm7416_vm3 }
 0x2fd   :  { %v3415_v55 = vrot.slane %v3406_v51, %v6619_v27  ;;  %v3422_v41 = vrot.slane %v3407_v22, %v6619_v27  ;;  %v3436_v29 = vrot.slane %v3408_v19, %v6619_v27  ;;  %v1885_v61 = vcombine.high %v6590_v32, %v6592_v48 }
 0x2fe   :  { %v1698_v7 = vpop.permute.xlu1 %1697  ;;  %v1696_v54 = vpop.permute.xlu0 %1695  ;;  %v4373_v34 = vsel %vm4372_vm15, %v3381_v21, -inf }
 0x2ff   :  { %v3437_v23 = vcombine.low %v3415_v55, %v3429_v40  ;;  %v3438_v46 = vcombine.high %v3415_v55, %v3429_v40  ;;  %v3439_v43 = vcombine.low %v3422_v41, %v3436_v29  ;;  %1731 = vst.msk [vmem:[#allocation2 + $0xa0] sm:$0xff] %vm1719_vm5, %v1698_v7  ;;  %1730 = vst.msk [vmem:[#allocation2 + $0x90] sm:$0xff] %vm1719_vm5, %v1696_v54 }
 0x301   :  { %v4356_v1 = vsel %vm7416_vm3, %v3437_v23, -inf  ;;  %v4364_v17 = vsel %vm7417_vm13, %v3439_v43, -inf  ;;  %v4375_v0 = vsel %vm4374_vm0, %v3438_v46, -inf  ;;  %vm7420_vm3 = vcmask 1048552  }
 0x302   :  { %v4357_v31 = vmax.f32 %v3380_v35, %v4356_v1  ;;  %v4365_v8 = vmax.f32 %v3382_v15, %v4364_v17  ;;  %v6676_v26 = vmax.f32 %v4373_v34, %v4375_v0  ;;  %v1270_v16 = vpop.permute.xlu1 %1269  ;;  %v1268_v36 = vpop.permute.xlu0 %1267  ;;  %vm7421_vm13 = vmmov %vm7420_vm3 }
 0x303   :  { %1301 = vst.msk [vmem:[#allocation2 + $0xc0] sm:$0xff] %vm7418_vm7, %v1270_v16 }
 0x304   :  { %1300 = vst.msk [vmem:[#allocation2 + $0xb0] sm:$0xff] %vm7419_vm8, %v1268_v36  ;;  %v4358_v9 = vrot.slane %v4357_v31, 4  ;;  %v4366_v62 = vrot.slane %v4365_v8, 4  ;;  %vm7422_vm8 = vcmask 777936  }
 0x305   :  { %vm7423_vm7 = vmmov %vm7422_vm8 }
 0x306   :  { %v4359_v37 = vmax.f32 %v4357_v31, %v4358_v9  ;;  %v4367_v18 = vmax.f32 %v4365_v8, %v4366_v62  ;;  %v1760_v5 = vpop.permute.xlu1 %1759  ;;  %v1758_v56 = vpop.permute.xlu0 %1757 }
 0x307   :  { %1805 = vst.msk [vmem:[#allocation2 + $0xa0] sm:$0xff] %vm7420_vm3, %v1760_v5  ;;  %vm7425_vm3 = vcmask 568840  }
 0x308   :  { %1806 = vst.msk [vmem:[#allocation2 + $0xa8] sm:$0xff] %vm1783_vm9, %v1760_v5  ;;  %1804 = vst.msk [vmem:[#allocation2 + $0x98] sm:$0xff] %vm1783_vm9, %v1758_v56  ;;  %v4360_v20 = vrot.slane %v4359_v37, 2  ;;  %v4368_v13 = vrot.slane %v4367_v18, 2 }
 0x309   :  { %1803 = vst.msk [vmem:[#allocation2 + $0x90] sm:$0xff] %vm7421_vm13, %v1758_v56  ;;  %vm7426_vm13 = vcmask 609840  }
 0x30a   :  { %v4361_v25 = vmax.f32 %v4359_v37, %v4360_v20  ;;  %v4369_v11 = vmax.f32 %v4367_v18, %v4368_v13  ;;  %v1332_v60 = vpop.permute.xlu1 %1331  ;;  %v1330_v33 = vpop.permute.xlu0 %1329 }
 0x30b   :  { %1363 = vst.msk [vmem:[#allocation2 + $0xc0] sm:$0xff] %vm7422_vm8, %v1332_v60  ;;  %vm7427_vm8 = vcmask 650840  }
 0x30c   :  { %1362 = vst.msk [vmem:[#allocation2 + $0xb0] sm:$0xff] %vm7423_vm7, %v1330_v33  ;;  %v4362_v52 = vrot.slane %v4361_v25, 1  ;;  %v4370_v28 = vrot.slane %v4369_v11, 1  ;;  %vm7433_vm7 = vcmask 814840  }
 0x30e   :  { %v6686_v57 = vmax.f32 %v4361_v25, %v4362_v52  ;;  %v6688_v50 = vmax.f32 %v4369_v11, %v4370_v28  ;;  %v1394_v44 = vpop.permute.xlu1 %1393  ;;  %v1392_v14 = vpop.permute.xlu0 %1391  ;;  %v6690_v39 = vld [vmem:[#allocation2 + $0xa0] sm:$0xff] }
 0x30f   :  { %v1832_v42 = vld [vmem:[#allocation2 + $0x98] sm:$0xff]  ;;  %1425 = vst.msk [vmem:[#allocation2 + $0xc0] sm:$0xff] %vm1411_vm10, %v1394_v44  ;;  %1424 = vst.msk [vmem:[#allocation2 + $0xb0] sm:$0xff] %vm1411_vm10, %v1392_v14  ;;  %v6694_v49 = vld [vmem:[#allocation2 + $0xa8] sm:$0xff]  ;;  %vm7424_vm10 = vcmask 527840  }
 0x310   :  { %v1831_v4 = vld [vmem:[#allocation2 + $0x90] sm:$0xff]  ;;  %v1888_v45 = vcombine.low %v6690_v39, %v6694_v49  ;;  %v4582_v47 = vcombine.low %v6686_v57, %v6688_v50 }
 0x311   :  { %v1886_v59 = vcombine.low %v1831_v4, %v1832_v42  ;;  %v1887_v53 = vcombine.high %v1831_v4, %v1832_v42  ;;  %v4662_v2 = vcombine.low %v1885_v61, %v1831_v4 }
 0x312   :  { %v1454_v30 = vpop.permute.xlu1 %1453  ;;  %v964_v10 = vpop.permute.xlu0 %963  ;;  %v4665_v51 = vcombine.high %v1832_v42, %v1888_v45 }
 0x313   :  { %v4663_v12 = vcombine.high %v6592_v48, %v1886_v59  ;;  %v4664_v3 = vcombine.low %v1887_v53, %v6690_v39  ;;  %1486 = vst.msk [vmem:[#allocation2 + $0xb0] sm:$0xff] %vm1473_vm11, %v1454_v30 }
 0x314   :  { %994 = vst.msk [vmem:[#allocation2 + $0xd0] sm:$0xf] %vm7424_vm10, %v964_v10  ;;  %vm7434_vm10 = vcmask 855840  }
 0x315   :  { %v1955_v32 = vpack.c.bf16 %v4664_v3, %v4662_v2  ;;  %v1956_v22 = vpack.c.bf16 %v4665_v51, %v4663_v12  ;;  %v2578_v12 = vcombine.high %v6650_v58, %v6650_v58  ;;  %v6734_v2 = vrot.slane %v6658_v24, %v6619_v27 }
 0x316   :  { %v1028_v19 = vpop.permute.xlu1 %1027  ;;  %v1456_v35 = vpop.permute.xlu0 %1455 }
 0x317   :  { %4704 = vmatprep.mubr.msk.bf16.mxu0 %vm1783_vm9, %v1956_v22  ;;  %4711 = vmatprep.mubr.msk.bf16.mxu1 %vm1783_vm9, %v1956_v22  ;;  %1058 = vst.msk [vmem:[#allocation2 + $0xd0] sm:$0xf] %vm7425_vm3, %v1028_v19  ;;  %v4377_v22 = vrot.slane %v6676_v26, 4  ;;  %vm7435_vm3 = vcmask 896840  }
 0x318   :  { %1487 = vst.msk [vmem:[#allocation2 + $0xc0] sm:$0xff] %vm1473_vm11, %v1456_v35  ;;  %2251 = vmatmul.mubr.bf16.gmra.mrb[16].mxu0 %v1955_v32  ;;  %2344 = vmatmul.mubr.bf16.gmra.mrb[16].mxu1 %v1955_v32  ;;  %vm7432_vm11 = vcmask 773840  }
 0x31a   :  { %v1520_v48 = vpop.permute.xlu1 %1519  ;;  %v1518_v21 = vpop.permute.xlu0 %1517 }
 0x31b   :  { %1551 = vst.msk [vmem:[#allocation2 + $0xc0] sm:$0xff] %vm1537_vm2, %v1520_v48  ;;  %1550 = vst.msk [vmem:[#allocation2 + $0xb0] sm:$0xff] %vm1537_vm2, %v1518_v21  ;;  %vm7428_vm2 = vcmask 691840  }
 0x31e   :  { %v1580_v15 = vpop.permute.xlu1 %1579  ;;  %v1090_v55 = vpop.permute.xlu0 %1089 }
 0x31f   :  { %1612 = vst.msk [vmem:[#allocation2 + $0xb0] sm:$0xff] %vm1599_vm6, %v1580_v15 }
 0x320   :  { %1120 = vst.msk [vmem:[#allocation2 + $0xd0] sm:$0xf] %vm7426_vm13, %v1090_v55  ;;  %vm7436_vm13 = vcmask 937840  }
 0x322   :  { %v1152_v41 = vpop.permute.xlu1 %1151  ;;  %v1582_v40 = vpop.permute.xlu0 %1581 }
 0x323   :  { %1182 = vst.msk [vmem:[#allocation2 + $0xd0] sm:$0xf] %vm7427_vm8, %v1152_v41  ;;  %vm7437_vm8 = vcmask 1044480  }
 0x324   :  { %1613 = vst.msk [vmem:[#allocation2 + $0xc0] sm:$0xff] %vm1599_vm6, %v1582_v40 }
 0x326   :  { %v2222_v29 = vpop.f32.mrb[4].mxu0  ;;  %v2321_v7 = vpop.f32.mrb[4].mxu1 }
 0x327   :  { %v2223_v54 = vadd.f32 %v2222_v29, %v6607_v6  ;;  %v2322_v23 = vadd.f32 %v2321_v7, %v6609_v63  ;;  %v1644_v46 = vpop.permute.xlu1 %1643  ;;  %v1642_v43 = vpop.permute.xlu0 %1641 }
 0x328   :  { %1675 = vst.msk [vmem:[#allocation2 + $0xc0] sm:$0xff] %vm1661_vm4, %v1644_v46  ;;  %1674 = vst.msk [vmem:[#allocation2 + $0xb0] sm:$0xff] %vm1661_vm4, %v1642_v43  ;;  %v2224_v1 = vpop.f32.mrb[5].mxu0  ;;  %v2323_v17 = vpop.f32.mrb[5].mxu1  ;;  %vm7429_vm4 = vcmask 732840  }
 0x329   :  { %v2373_v34 = vmax.f32 %v2223_v54, 0.0  ;;  %v2375_v0 = vmax.f32 %v2322_v23, 0.0  ;;  %v2225_v31 = vadd.f32 %v2224_v1, %v6612_v38  ;;  %v2226_v8 = vpop.f32.mrb[6].mxu0  ;;  %v2324_v16 = vpop.f32.mrb[6].mxu1 }
 0x32a   :  { %v2227_v36 = vadd.f32 %v2226_v8, %v6607_v6  ;;  %v2325_v9 = vadd.f32 %v2324_v16, %v6609_v63  ;;  %v2228_v62 = vpop.f32.mrb[7].mxu0  ;;  %v2326_v37 = vpop.f32.mrb[7].mxu1 }
 0x32b   :  { %v2581_v18 = vcombine.high %v2375_v0, %v2375_v0  ;;  %v2374_v5 = vmax.f32 %v2225_v31, 0.0  ;;  %v2229_v56 = vadd.f32 %v2228_v62, %v6612_v38  ;;  %v1700_v20 = vpop.permute.xlu1 %1699  ;;  %v1210_v13 = vpop.permute.xlu0 %1209  ;;  %v2602_v44 = vrot.slane %v2375_v0, %v6619_v27 }
 0x32c   :  { %v2376_v25 = vmax.f32 %v2227_v36, 0.0  ;;  %v2378_v11 = vmax.f32 %v2325_v9, 0.0  ;;  %1732 = vst.msk [vmem:[#allocation2 + $0xb0] sm:$0xff] %vm1719_vm5, %v1700_v20 }
 0x32d   :  { %1240 = vst.msk [vmem:[#allocation2 + $0xd0] sm:$0xf] %vm7428_vm2, %v1210_v13  ;;  %v2609_v60 = vrot.slane %v2581_v18, %v6619_v27  ;;  %v2579_v33 = vcombine.low %v2373_v34, %v2374_v5  ;;  %v2580_v52 = vcombine.high %v2373_v34, %v2374_v5  ;;  %v2377_v28 = vmax.f32 %v2229_v56, 0.0  ;;  %vm7438_vm2 = vmmov %vm7437_vm8 }
 0x32e   :  { %v2648_v14 = vcombine.high %v2378_v11, %v2378_v11  ;;  %v2669_v19 = vrot.slane %v2378_v11, %v6619_v27 }
 0x32f   :  { %v2588_v4 = vrot.slane %v2579_v33, %v6619_v27  ;;  %v2595_v42 = vrot.slane %v2580_v52, %v6619_v27  ;;  %v2646_v59 = vcombine.low %v2376_v25, %v2377_v28  ;;  %v2647_v61 = vcombine.high %v2376_v25, %v2377_v28  ;;  %v1272_v53 = vpop.permute.xlu1 %1271  ;;  %v1702_v45 = vpop.permute.xlu0 %1701 }
 0x330   :  { %v2676_v3 = vrot.slane %v2648_v14, %v6619_v27  ;;  %1302 = vst.msk [vmem:[#allocation2 + $0xd0] sm:$0xf] %vm7429_vm4, %v1272_v53  ;;  %v6772_v14 = vmax.f32 %v6676_v26, %v4377_v22  ;;  %vm7441_vm4 = vmmov %vm7438_vm2 }
 0x331   :  { %1733 = vst.msk [vmem:[#allocation2 + $0xc0] sm:$0xff] %vm1719_vm5, %v1702_v45  ;;  %v2610_v30 = vcombine.low %v2588_v4, %v2602_v44  ;;  %v2611_v10 = vcombine.high %v2588_v4, %v2602_v44  ;;  %v2612_v51 = vcombine.low %v2595_v42, %v2609_v60  ;;  %v2613_v32 = vcombine.high %v2595_v42, %v2609_v60 }
 0x332   :  { %v2655_v58 = vrot.slane %v2646_v59, %v6619_v27  ;;  %v2662_v35 = vrot.slane %v2647_v61, %v6619_v27  ;;  %vm7430_vm5 = vcmask 1048552  }
 0x333   :  { %v2620_v24 = vrot.slane %v2610_v30, %v6619_v27  ;;  %v2627_v48 = vrot.slane %v2612_v51, %v6619_v27  ;;  %v2634_v21 = vrot.slane %v2611_v10, %v6619_v27  ;;  %v2641_v15 = vrot.slane %v2613_v32, %v6619_v27  ;;  %v1764_v55 = vpop.permute.xlu1 %1763  ;;  %v1762_v41 = vpop.permute.xlu0 %1761  ;;  %vm7431_vm6 = vmmov %vm7430_vm5 }
 0x334   :  { %v2677_v40 = vcombine.low %v2655_v58, %v2669_v19  ;;  %v2678_v29 = vcombine.high %v2655_v58, %v2669_v19  ;;  %v2679_v7 = vcombine.low %v2662_v35, %v2676_v3  ;;  %v2680_v54 = vcombine.high %v2662_v35, %v2676_v3  ;;  %1809 = vst.msk [vmem:[#allocation2 + $0xc0] sm:$0xff] %vm7430_vm5, %v1764_v55 }
 0x335   :  { %1810 = vst.msk [vmem:[#allocation2 + $0xc8] sm:$0xff] %vm1783_vm9, %v1764_v55  ;;  %1808 = vst.msk [vmem:[#allocation2 + $0xb8] sm:$0xff] %vm1783_vm9, %v1762_v41  ;;  %v2642_v23 = vcombine.high %v2620_v24, %v2620_v24  ;;  %v2643_v46 = vcombine.high %v2627_v48, %v2627_v48  ;;  %v2644_v43 = vcombine.high %v2634_v21, %v2634_v21  ;;  %vm4596_vm5 = vcmask 1042434  }
 0x336   :  { %1807 = vst.msk [vmem:[#allocation2 + $0xb0] sm:$0xff] %vm7431_vm6, %v1762_v41  ;;  %v2645_v1 = vcombine.high %v2641_v15, %v2641_v15  ;;  %v3441_v17 = vcombine.low %v2578_v12, %v2620_v24  ;;  %v2687_v34 = vrot.slane %v2677_v40, %v6619_v27  ;;  %v6753_v0 = vrot.slane %v2679_v7, %v6619_v27 }
 0x337   :  { %v2701_v31 = vrot.slane %v2678_v29, %v6619_v27  ;;  %v3442_v8 = vcombine.low %v2634_v21, %v2642_v23  ;;  %v3443_v16 = vcombine.low %v2644_v43, %v2627_v48  ;;  %v3507_v36 = vcombine.low %v2641_v15, %v2643_v46  ;;  %v1334_v62 = vpop.permute.xlu0 %1333  ;;  %v1396_v37 = vpop.permute.xlu1 %1395 }
 0x338   :  { %v6757_v9 = vrot.slane %v2680_v54, %v6619_v27  ;;  %v3457_v18 = vrot.slane %v3441_v17, %v6619_v27  ;;  %v3508_v5 = vcombine.low %v2645_v1, %v2687_v34  ;;  %1364 = vst.msk [vmem:[#allocation2 + $0xd0] sm:$0xf] %vm7432_vm11, %v1334_v62  ;;  %vm4598_vm6 = vcmask 1046534   ;;  %vm7442_vm11 = vmmov %vm7438_vm2 }
 0x339   :  { %v3529_v56 = vrot.slane %v2701_v31, %v6619_v27  ;;  %v4717_v20 = vcombine.high %v2687_v34, %v2701_v31  ;;  %v3464_v13 = vrot.slane %v3442_v8, %v6619_v27  ;;  %v3471_v25 = vrot.slane %v3443_v16, %v6619_v27  ;;  %1426 = vst.msk [vmem:[#allocation2 + $0xd0] sm:$0xf] %vm7433_vm7, %v1396_v37  ;;  %vm7443_vm7 = vmmov %vm7438_vm2 }
 0x33a   :  { %v3515_v11 = vrot.slane %v3507_v36, %v6619_v27  ;;  %v3565_v60 = vcombine.low %v6753_v0, %v6757_v9  ;;  %v3472_v33 = vcombine.low %v6734_v2, %v3457_v18  ;;  %v3473_v52 = vcombine.high %v6734_v2, %v3457_v18 }
 0x33b   :  { %v3522_v28 = vrot.slane %v3508_v5, %v6619_v27  ;;  %v3532_v44 = vcombine.high %v3529_v56, %v3529_v56  ;;  %v3474_v4 = vcombine.low %v3464_v13, %v3471_v25  ;;  %v3475_v42 = vcombine.high %v3464_v13, %v3471_v25  ;;  %v1458_v61 = vpop.permute.xlu0 %1457  ;;  %v1522_v53 = vpop.permute.xlu1 %1521  ;;  %v6792_v48 = vld [vmem:[#allocation2 + $0xc0] sm:$0xff] }
 0x33c   :  { %v4718_v59 = vcombine.high %v6753_v0, %v6757_v9  ;;  %v3482_v45 = vrot.slane %v3472_v33, %v6619_v27  ;;  %v3553_v30 = vrot.slane %v3529_v56, %v6619_v27  ;;  %1488 = vst.msk [vmem:[#allocation2 + $0xd0] sm:$0xf] %vm7434_vm10, %v1458_v61  ;;  %v1836_v10 = vld [vmem:[#allocation2 + $0xb8] sm:$0xff]  ;;  %v3489_v26 = vrot.slane %v3473_v52, %v6619_v27  ;;  %v6794_v21 = vld [vmem:[#allocation2 + $0xc8] sm:$0xff] }
 0x33d   :  { %v3530_v12 = vcombine.low %v3515_v11, %v3522_v28  ;;  %v3531_v3 = vcombine.high %v3515_v11, %v3522_v28  ;;  %v1835_v2 = vld [vmem:[#allocation2 + $0xb0] sm:$0xff]  ;;  %v3496_v51 = vrot.slane %v3474_v4, %v6619_v27  ;;  %v3503_v32 = vrot.slane %v3475_v42, %v6619_v27  ;;  %1552 = vst.msk [vmem:[#allocation2 + $0xd0] sm:$0xf] %vm7435_vm3, %v1522_v53 }
 0x33e   :  { %v6783_v22 = vrot.slane %v4717_v20, %v6619_v27  ;;  %v3560_v35 = vrot.slane %v3532_v44, %v6619_v27  ;;  %v6790_v24 = vrot.slane %v3565_v60, %v6619_v27  ;;  %v1890_v7 = vcombine.low %v1835_v2, %v1836_v10 }
 0x33f   :  { %v3539_v19 = vrot.slane %v3530_v12, %v6619_v27  ;;  %v3546_v58 = vrot.slane %v3531_v3, %v6619_v27  ;;  %v3504_v15 = vcombine.low %v3482_v45, %v3496_v51  ;;  %v3505_v55 = vcombine.high %v3482_v45, %v3496_v51  ;;  %v1584_v40 = vpop.permute.xlu0 %1583  ;;  %v1646_v29 = vpop.permute.xlu1 %1645 }
 0x340   :  { %v3506_v41 = vcombine.low %v3489_v26, %v3503_v32  ;;  %v3596_v43 = vcombine.low %v6783_v22, %v6790_v24  ;;  %1614 = vst.msk [vmem:[#allocation2 + $0xd0] sm:$0xf] %vm7436_vm13, %v1584_v40  ;;  %v3597_v1 = vcombine.high %v6783_v22, %v6790_v24  ;;  %v1892_v34 = vcombine.low %v6792_v48, %v6794_v21 }
 0x341   :  { %v3561_v54 = vcombine.low %v3539_v19, %v3553_v30  ;;  %v3562_v23 = vcombine.high %v3539_v19, %v3553_v30  ;;  %v3563_v46 = vcombine.low %v3546_v58, %v3560_v35  ;;  %v4399_v17 = vsel %vm4372_vm15, %v3505_v55, -inf  ;;  %1676 = vst.msk [vmem:[#allocation2 + $0xd0] sm:$0xf] %vm1668_vm12, %v1646_v29 }
 0x342   :  { %v4667_v36 = vcombine.high %v6694_v49, %v1890_v7  ;;  %v4379_v20 = vrot.slane %v6772_v14, 2  ;;  %v4669_v13 = vcombine.high %v1836_v10, %v1892_v34  ;;  %v1889_v25 = vcombine.high %v6690_v39, %v6694_v49 }
 0x343   :  { %v4383_v31 = vsel %vm7437_vm8, %v3561_v54, -inf  ;;  %v4391_v8 = vsel %vm7438_vm2, %v3563_v46, -inf  ;;  %v4400_v16 = vsel %vm4374_vm0, %v3562_v23, -inf  ;;  %v1704_v5 = vpop.permute.xlu0 %1703  ;;  %v1766_v56 = vpop.permute.xlu1 %1765  ;;  %v1891_v11 = vcombine.high %v1835_v2, %v1836_v10  ;;  %vm7444_vm8 = vmmov %vm7438_vm2 }
 0x344   :  { %v4384_v62 = vmax.f32 %v3504_v15, %v4383_v31  ;;  %v4392_v37 = vmax.f32 %v3506_v41, %v4391_v8  ;;  %v4401_v18 = vmax.f32 %v4399_v17, %v4400_v16  ;;  %1734 = vst.msk [vmem:[#allocation2 + $0xd0] sm:$0xf] %vm1726_vm14, %v1704_v5  ;;  %vm7439_vm12 = vcmask 1044456  }
 0x345   :  { %1812 = vst.msk [vmem:[#allocation2 + $0xd8] sm:$0xf] %vm1797_vm1, %v1766_v56  ;;  %v1958_v28 = vpack.c.bf16 %v4669_v13, %v4667_v36  ;;  %v4666_v44 = vcombine.low %v1889_v25, %v1835_v2  ;;  %v4668_v4 = vcombine.low %v1891_v11, %v6792_v48  ;;  %v4380_v45 = vmax.f32 %v6772_v14, %v4379_v20 }
 0x346   :  { %v4385_v60 = vrot.slane %v4384_v62, 4  ;;  %v4393_v33 = vrot.slane %v4392_v37, 4  ;;  %v4402_v52 = vrot.slane %v4401_v18, 4  ;;  %1811 = vst.msk [vmem:[#allocation2 + $0xd0] sm:$0xf] %vm7439_vm12, %v1766_v56  ;;  %v1893_v19 = vcombine.high %v6792_v48, %v6794_v21  ;;  %vm7445_vm12 = vmmov %vm7438_vm2 }
 0x347   :  { %4705 = vmatprep.mubr.msk.bf16.mxu0 %vm1783_vm9, %v1958_v28  ;;  %4712 = vmatprep.mubr.msk.bf16.mxu1 %vm1783_vm9, %v1958_v28  ;;  %v1957_v39 = vpack.c.bf16 %v4668_v4, %v4666_v44  ;;  %v4381_v51 = vrot.slane %v4380_v45, 1  ;;  %vm4591_vm1 = vcmask 1041409   ;;  %vm4593_vm14 = vcmask 1045509  }
 0x348   :  { %v4386_v42 = vmax.f32 %v4384_v62, %v4385_v60  ;;  %v4394_v61 = vmax.f32 %v4392_v37, %v4393_v33  ;;  %v4403_v53 = vmax.f32 %v4401_v18, %v4402_v52  ;;  %vm4601_vm10 = vcmask 1043459  }
 0x349   :  { %2261 = vmatmul.mubr.bf16.gmra.mrb[20].mxu0 %v1957_v39  ;;  %2352 = vmatmul.mubr.bf16.gmra.mrb[20].mxu1 %v1957_v39  ;;  %v4382_v54 = vmax.f32 %v4380_v45, %v4381_v51  ;;  %vm4603_vm3 = vcmask 1047559   ;;  %vm4637_vm13 = vcmask 519168  }
 0x34a   :  { %v4387_v49 = vrot.slane %v4386_v42, 2  ;;  %v4395_v12 = vrot.slane %v4394_v61, 2  ;;  %v4404_v3 = vrot.slane %v4403_v53, 2 }
 0x34c   :  { %v4388_v30 = vmax.f32 %v4386_v42, %v4387_v49  ;;  %v4396_v10 = vmax.f32 %v4394_v61, %v4395_v12  ;;  %v4405_v2 = vmax.f32 %v4403_v53, %v4404_v3  ;;  %v1840_v26 = vld [vmem:[#allocation2 + $0xd8] sm:$0xf] }
 0x34d   :  { %v1839_v32 = vld [vmem:[#allocation2 + $0xd0] sm:$0xf] }
 0x34e   :  { %v4389_v14 = vrot.slane %v4388_v30, 1  ;;  %v4397_v58 = vrot.slane %v4396_v10, 1  ;;  %v4406_v35 = vrot.slane %v4405_v2, 1  ;;  %v1894_v15 = vcombine.low %v1839_v32, %v1840_v26 }
 0x34f   :  { %v4670_v55 = vcombine.low %v1893_v19, %v1839_v32  ;;  %v3588_v26 = vrot.slane %v4718_v59, %v6619_v27 }
 0x350   :  { %v4390_v41 = vmax.f32 %v4388_v30, %v4389_v14  ;;  %v4407_v40 = vmax.f32 %v4405_v2, %v4406_v35  ;;  %v4671_v29 = vcombine.high %v6794_v21, %v1894_v15  ;;  %v4398_v7 = vmax.f32 %v4396_v10, %v4397_v58 }
 0x351   :  { %v1959_v34 = vpack.c.bf16 %v4670_v55, %v4670_v55  ;;  %v3606_v35 = vrot.slane %v3596_v43, %v6619_v27 }
 0x352   :  { %v1960_v23 = vpack.c.bf16 %v4671_v29, %v4671_v29  ;;  %v4583_v46 = vcombine.low %v4390_v41, %v4398_v7  ;;  %v4605_v17 = vrot.slane %v4407_v40, 7 }
 0x354   :  { %4706 = vmatprep.mubr.msk.bf16.mxu0 %vm1783_vm9, %v1960_v23  ;;  %4713 = vmatprep.mubr.msk.bf16.mxu1 %vm1783_vm9, %v1960_v23  ;;  %v4590_v48 = vrot.slane %v4583_v46, 7  ;;  %v4606_v31 = vsel %vm4591_vm1, %v4605_v17, %v4382_v54  ;;  %vm7440_vm9 = vmmov %vm7438_vm2 }
 0x355   :  { %2271 = vmatmul.mubr.bf16.gmra.mrb[24].mxu0 %v1959_v34  ;;  %2360 = vmatmul.mubr.bf16.gmra.mrb[24].mxu1 %v1959_v34  ;;  %v6826_v8 = vsel %vm4593_vm14, %v4605_v17, %v4606_v31 }
 0x356   :  { %v4592_v21 = vsel %vm4591_vm1, %v4590_v48, %v4582_v47 }
 0x357   :  { %v6833_v16 = vsel %vm4593_vm14, %v4590_v48, %v4592_v21 }
 0x37d   :  { %v2232_v36 = vpop.f32.mrb[8].mxu0  ;;  %v2329_v62 = vpop.f32.mrb[8].mxu1 }
 0x37e   :  { %v2233_v37 = vadd.f32 %v2232_v36, %v6607_v6  ;;  %v2330_v18 = vadd.f32 %v2329_v62, %v6609_v63  ;;  %v2234_v5 = vpop.f32.mrb[9].mxu0  ;;  %v2331_v56 = vpop.f32.mrb[9].mxu1  ;;  %v3613_v62 = vrot.slane %v3597_v1, %v6619_v27 }
 0x37f   :  { %v2235_v20 = vadd.f32 %v2234_v5, %v6612_v38  ;;  %v2236_v13 = vpop.f32.mrb[10].mxu0  ;;  %v2332_v25 = vpop.f32.mrb[10].mxu1 }
 0x380   :  { %v2379_v11 = vmax.f32 %v2233_v37, 0.0  ;;  %v2381_v60 = vmax.f32 %v2330_v18, 0.0  ;;  %v2237_v57 = vadd.f32 %v2236_v13, %v6607_v6  ;;  %v2333_v50 = vadd.f32 %v2332_v25, %v6609_v63  ;;  %v2238_v47 = vpop.f32.mrb[11].mxu0  ;;  %v2334_v33 = vpop.f32.mrb[11].mxu1 }
 0x381   :  { %v2380_v52 = vmax.f32 %v2235_v20, 0.0  ;;  %v2239_v28 = vadd.f32 %v2238_v47, %v6612_v38 }
 0x382   :  { %v2715_v44 = vcombine.high %v2381_v60, %v2381_v60  ;;  %v2382_v4 = vmax.f32 %v2237_v57, 0.0  ;;  %v2384_v42 = vmax.f32 %v2333_v50, 0.0  ;;  %v2736_v39 = vrot.slane %v2381_v60, %v6619_v27 }
 0x383   :  { %v2713_v61 = vcombine.low %v2379_v11, %v2380_v52  ;;  %v2714_v53 = vcombine.high %v2379_v11, %v2380_v52  ;;  %v2383_v45 = vmax.f32 %v2239_v28, 0.0 }
 0x384   :  { %v2743_v49 = vrot.slane %v2715_v44, %v6619_v27  ;;  %v2782_v12 = vcombine.high %v2384_v42, %v2384_v42  ;;  %v2803_v15 = vrot.slane %v2384_v42, %v6619_v27 }
 0x385   :  { %v2722_v3 = vrot.slane %v2713_v61, %v6619_v27  ;;  %v2729_v30 = vrot.slane %v2714_v53, %v6619_v27  ;;  %v2780_v10 = vcombine.low %v2382_v4, %v2383_v45  ;;  %v2781_v2 = vcombine.high %v2382_v4, %v2383_v45 }
 0x386   :  { %v2810_v51 = vrot.slane %v2782_v12, %v6619_v27 }
 0x387   :  { %v2744_v32 = vcombine.low %v2722_v3, %v2736_v39  ;;  %v2745_v19 = vcombine.high %v2722_v3, %v2736_v39  ;;  %v2746_v14 = vcombine.low %v2729_v30, %v2743_v49  ;;  %v2747_v58 = vcombine.high %v2729_v30, %v2743_v49 }
 0x388   :  { %v2789_v55 = vrot.slane %v2780_v10, %v6619_v27  ;;  %v2796_v41 = vrot.slane %v2781_v2, %v6619_v27 }
 0x389   :  { %v2754_v0 = vrot.slane %v2744_v32, %v6619_v27  ;;  %v2761_v9 = vrot.slane %v2746_v14, %v6619_v27  ;;  %v2768_v59 = vrot.slane %v2745_v19, %v6619_v27  ;;  %v2775_v40 = vrot.slane %v2747_v58, %v6619_v27 }
 0x38a   :  { %v2811_v29 = vcombine.low %v2789_v55, %v2803_v15  ;;  %v2812_v7 = vcombine.high %v2789_v55, %v2803_v15  ;;  %v2813_v54 = vcombine.low %v2796_v41, %v2810_v51  ;;  %v2814_v23 = vcombine.high %v2796_v41, %v2810_v51 }
 0x38b   :  { %v2777_v46 = vcombine.high %v2761_v9, %v2761_v9  ;;  %v2779_v43 = vcombine.high %v2775_v40, %v2775_v40  ;;  %v3567_v17 = vcombine.low %v2754_v0, %v2768_v59  ;;  %v4719_v34 = vcombine.high %v2754_v0, %v2768_v59 }
 0x38c   :  { %v3632_v48 = vcombine.low %v2761_v9, %v2775_v40  ;;  %v2821_v31 = vrot.slane %v2811_v29, %v6619_v27  ;;  %v2828_v21 = vrot.slane %v2813_v54, %v6619_v27  ;;  %v2835_v36 = vrot.slane %v2812_v7, %v6619_v27 }
 0x38d   :  { %v3595_v37 = vrot.slane %v3567_v17, %v6619_v27  ;;  %v3639_v18 = vrot.slane %v4719_v34, %v6619_v27  ;;  %v3653_v5 = vrot.slane %v2777_v46, %v6619_v27  ;;  %v6873_v50 = vrot.slane %v2814_v23, %v6619_v27 }
 0x38e   :  { %v3646_v56 = vrot.slane %v3632_v48, %v6619_v27  ;;  %v2843_v20 = vcombine.high %v2821_v31, %v2821_v31  ;;  %v2844_v13 = vcombine.high %v2828_v21, %v2828_v21  ;;  %v2845_v25 = vcombine.high %v2835_v36, %v2835_v36 }
 0x38f   :  { %v3598_v11 = vcombine.low %v3588_v26, %v3595_v37  ;;  %v3599_v60 = vcombine.high %v3588_v26, %v3595_v37  ;;  %v3656_v57 = vcombine.high %v3653_v5, %v3653_v5  ;;  %v3677_v24 = vrot.slane %v3653_v5, %v6619_v27 }
 0x390   :  { %v3654_v47 = vcombine.low %v3639_v18, %v3646_v56  ;;  %v3655_v22 = vcombine.high %v3639_v18, %v3646_v56  ;;  %v3688_v1 = vcombine.low %v2779_v43, %v2821_v31  ;;  %v3689_v44 = vcombine.low %v2835_v36, %v2843_v20 }
 0x391   :  { %v3620_v33 = vrot.slane %v3598_v11, %v6619_v27  ;;  %v3627_v52 = vrot.slane %v3599_v60, %v6619_v27  ;;  %v3684_v28 = vrot.slane %v3656_v57, %v6619_v27  ;;  %v3690_v61 = vcombine.low %v2845_v25, %v2828_v21 }
 0x392   :  { %v3663_v4 = vrot.slane %v3654_v47, %v6619_v27  ;;  %v3670_v42 = vrot.slane %v3655_v22, %v6619_v27  ;;  %v3691_v53 = vcombine.low %v6873_v50, %v2844_v13  ;;  %v3698_v12 = vrot.slane %v3688_v1, %v6619_v27 }
 0x393   :  { %v3628_v45 = vcombine.low %v3606_v35, %v3620_v33  ;;  %v3629_v39 = vcombine.high %v3606_v35, %v3620_v33  ;;  %v3630_v49 = vcombine.low %v3613_v62, %v3627_v52  ;;  %v3705_v2 = vrot.slane %v3689_v44, %v6619_v27 }
 0x394   :  { %v3685_v3 = vcombine.low %v3663_v4, %v3677_v24  ;;  %v3686_v30 = vcombine.high %v3663_v4, %v3677_v24  ;;  %v3687_v10 = vcombine.low %v3670_v42, %v3684_v28  ;;  %v3712_v51 = vrot.slane %v3690_v61, %v6619_v27 }
 0x395   :  { %v4424_v26 = vsel %vm4372_vm15, %v3629_v39, -inf  ;;  %v3719_v32 = vrot.slane %v3691_v53, %v6619_v27  ;;  %v3720_v35 = vcombine.low %v3698_v12, %v3705_v2  ;;  %v3721_v0 = vcombine.high %v3698_v12, %v3705_v2 }
 0x396   :  { %v4408_v19 = vsel %vm7440_vm9, %v3685_v3, -inf  ;;  %v4416_v14 = vsel %vm7441_vm4, %v3687_v10, -inf  ;;  %v4425_v58 = vsel %vm4374_vm0, %v3686_v30, -inf  ;;  %vm7446_vm9 = vmmov %vm7438_vm2 }
 0x397   :  { %v4409_v15 = vmax.f32 %v3628_v45, %v4408_v19  ;;  %v4417_v55 = vmax.f32 %v3630_v49, %v4416_v14  ;;  %v4426_v41 = vmax.f32 %v4424_v26, %v4425_v58  ;;  %v3722_v9 = vcombine.low %v3712_v51, %v3719_v32 }
 0x398   :  { %v3723_v59 = vcombine.high %v3712_v51, %v3719_v32  ;;  %v6891_v40 = vrot.slane %v3720_v35, %v6619_v27  ;;  %v6894_v23 = vrot.slane %v3721_v0, %v6619_v27 }
 0x399   :  { %v4410_v29 = vrot.slane %v4409_v15, 4  ;;  %v4418_v7 = vrot.slane %v4417_v55, 4  ;;  %v4427_v54 = vrot.slane %v4426_v41, 4  ;;  %v6897_v46 = vrot.slane %v3722_v9, %v6619_v27 }
 0x39a   :  { %v6900_v43 = vrot.slane %v3723_v59, %v6619_v27 }
 0x39b   :  { %v4411_v17 = vmax.f32 %v4409_v15, %v4410_v29  ;;  %v4419_v34 = vmax.f32 %v4417_v55, %v4418_v7  ;;  %v4428_v48 = vmax.f32 %v4426_v41, %v4427_v54  ;;  %v3752_v31 = vcombine.low %v6891_v40, %v6897_v46 }
 0x39c   :  { %v3753_v21 = vcombine.high %v6891_v40, %v6897_v46  ;;  %v3754_v36 = vcombine.low %v6894_v23, %v6900_v43 }
 0x39d   :  { %v4412_v62 = vrot.slane %v4411_v17, 2  ;;  %v4429_v37 = vrot.slane %v4428_v48, 2  ;;  %v4420_v18 = vrot.slane %v4419_v34, 2 }
 0x39f   :  { %v4413_v5 = vmax.f32 %v4411_v17, %v4412_v62  ;;  %v4421_v56 = vmax.f32 %v4419_v34, %v4420_v18  ;;  %v4430_v20 = vmax.f32 %v4428_v48, %v4429_v37  ;;  %v2846_v18 = vcombine.high %v6873_v50, %v6873_v50 }
 0x3a1   :  { %v4414_v13 = vrot.slane %v4413_v5, 1  ;;  %v4422_v25 = vrot.slane %v4421_v56, 1  ;;  %v4431_v11 = vrot.slane %v4430_v20, 1 }
 0x3a3   :  { %v4415_v60 = vmax.f32 %v4413_v5, %v4414_v13  ;;  %v4423_v57 = vmax.f32 %v4421_v56, %v4422_v25  ;;  %v4432_v47 = vmax.f32 %v4430_v20, %v4431_v11 }
 0x3a5   :  { %v4584_v22 = vcombine.low %v4415_v60, %v4423_v57  ;;  %v4608_v24 = vrot.slane %v4432_v47, 6 }
 0x3a7   :  { %v4595_v1 = vrot.slane %v4584_v22, 6  ;;  %v4609_v33 = vsel %vm4596_vm5, %v4608_v24, %v6826_v8 }
 0x3a8   :  { %v6911_v52 = vsel %vm4598_vm6, %v4608_v24, %v4609_v33 }
 0x3a9   :  { %v4597_v28 = vsel %vm4596_vm5, %v4595_v1, %v6833_v16 }
 0x3aa   :  { %v6916_v44 = vsel %vm4598_vm6, %v4595_v1, %v4597_v28 }
 0x3b8   :  { %v2242_v4 = vpop.f32.mrb[12].mxu0  ;;  %v2337_v42 = vpop.f32.mrb[12].mxu1 }
 0x3b9   :  { %v2243_v61 = vadd.f32 %v2242_v4, %v6607_v6  ;;  %v2338_v53 = vadd.f32 %v2337_v42, %v6609_v63  ;;  %v2244_v45 = vpop.f32.mrb[13].mxu0  ;;  %v2339_v39 = vpop.f32.mrb[13].mxu1 }
 0x3ba   :  { %v2245_v49 = vadd.f32 %v2244_v45, %v6612_v38  ;;  %v2246_v8 = vpop.f32.mrb[14].mxu0  ;;  %v2340_v12 = vpop.f32.mrb[14].mxu1 }
 0x3bb   :  { %v2385_v3 = vmax.f32 %v2243_v61, 0.0  ;;  %v2387_v30 = vmax.f32 %v2338_v53, 0.0  ;;  %v2247_v10 = vadd.f32 %v2246_v8, %v6607_v6  ;;  %v2341_v16 = vadd.f32 %v2340_v12, %v6609_v63  ;;  %v2248_v2 = vpop.f32.mrb[15].mxu0  ;;  %v2342_v26 = vpop.f32.mrb[15].mxu1 }
 0x3bc   :  { %v2386_v51 = vmax.f32 %v2245_v49, 0.0  ;;  %v2249_v32 = vadd.f32 %v2248_v2, %v6612_v38 }
 0x3bd   :  { %v2849_v19 = vcombine.high %v2387_v30, %v2387_v30  ;;  %v2388_v14 = vmax.f32 %v2247_v10, 0.0  ;;  %v2390_v58 = vmax.f32 %v2341_v16, 0.0  ;;  %v2870_v41 = vrot.slane %v2387_v30, %v6619_v27 }
 0x3be   :  { %v2847_v35 = vcombine.low %v2385_v3, %v2386_v51  ;;  %v2848_v15 = vcombine.high %v2385_v3, %v2386_v51  ;;  %v2389_v55 = vmax.f32 %v2249_v32, 0.0 }
 0x3bf   :  { %v2877_v0 = vrot.slane %v2849_v19, %v6619_v27  ;;  %v2916_v9 = vcombine.high %v2390_v58, %v2390_v58  ;;  %v2937_v5 = vrot.slane %v2390_v58, %v6619_v27 }
 0x3c0   :  { %v2856_v59 = vrot.slane %v2847_v35, %v6619_v27  ;;  %v2863_v29 = vrot.slane %v2848_v15, %v6619_v27  ;;  %v2914_v7 = vcombine.low %v2388_v14, %v2389_v55  ;;  %v2915_v54 = vcombine.high %v2388_v14, %v2389_v55 }
 0x3c1   :  { %v2944_v17 = vrot.slane %v2916_v9, %v6619_v27 }
 0x3c2   :  { %v2878_v34 = vcombine.low %v2856_v59, %v2870_v41  ;;  %v2879_v48 = vcombine.high %v2856_v59, %v2870_v41  ;;  %v2880_v62 = vcombine.low %v2863_v29, %v2877_v0  ;;  %v2881_v37 = vcombine.high %v2863_v29, %v2877_v0 }
 0x3c3   :  { %v2923_v56 = vrot.slane %v2914_v7, %v6619_v27  ;;  %v2930_v20 = vrot.slane %v2915_v54, %v6619_v27 }
 0x3c4   :  { %v2888_v13 = vrot.slane %v2878_v34, %v6619_v27  ;;  %v2895_v25 = vrot.slane %v2880_v62, %v6619_v27  ;;  %v2902_v11 = vrot.slane %v2879_v48, %v6619_v27  ;;  %v2909_v60 = vrot.slane %v2881_v37, %v6619_v27 }
 0x3c5   :  { %v2945_v57 = vcombine.low %v2923_v56, %v2937_v5  ;;  %v2946_v47 = vcombine.high %v2923_v56, %v2937_v5  ;;  %v2947_v22 = vcombine.low %v2930_v20, %v2944_v17  ;;  %v2948_v24 = vcombine.high %v2930_v20, %v2944_v17 }
 0x3c6   :  { %v2910_v1 = vcombine.high %v2888_v13, %v2888_v13  ;;  %v2912_v50 = vcombine.high %v2902_v11, %v2902_v11  ;;  %v3755_v33 = vcombine.low %v2846_v18, %v2888_v13  ;;  %v3812_v28 = vcombine.low %v2895_v25, %v2909_v60 }
 0x3c7   :  { %v4720_v4 = vcombine.high %v2895_v25, %v2909_v60  ;;  %v2955_v42 = vrot.slane %v2945_v57, %v6619_v27  ;;  %v2969_v61 = vrot.slane %v2946_v47, %v6619_v27  ;;  %v2962_v49 = vrot.slane %v2947_v22, %v6619_v27 }
 0x3c8   :  { %v3756_v53 = vcombine.low %v2902_v11, %v2910_v1  ;;  %v3777_v45 = vrot.slane %v2912_v50, %v6619_v27  ;;  %v3822_v39 = vrot.slane %v3812_v28, %v6619_v27  ;;  %v2976_v12 = vrot.slane %v2948_v24, %v6619_v27 }
 0x3c9   :  { %v3829_v8 = vrot.slane %v4720_v4, %v6619_v27  ;;  %v3814_v3 = vcombine.low %v2955_v42, %v2969_v61  ;;  %v4721_v30 = vcombine.high %v2955_v42, %v2969_v61  ;;  %v3763_v10 = vrot.slane %v3755_v33, %v6619_v27 }
 0x3ca   :  { %v3770_v16 = vrot.slane %v3756_v53, %v6619_v27  ;;  %v3780_v2 = vcombine.high %v3777_v45, %v3777_v45  ;;  %v3879_v35 = vcombine.low %v2962_v49, %v2976_v12  ;;  %v3801_v15 = vrot.slane %v3777_v45, %v6619_v27 }
 0x3cb   :  { %v3844_v26 = vcombine.low %v3822_v39, %v3829_v8  ;;  %v3845_v51 = vcombine.high %v3822_v39, %v3829_v8  ;;  %v3836_v32 = vrot.slane %v3814_v3, %v6619_v27  ;;  %v3843_v19 = vrot.slane %v4721_v30, %v6619_v27 }
 0x3cc   :  { %v3778_v14 = vcombine.low %v3763_v10, %v3770_v16  ;;  %v3779_v58 = vcombine.high %v3763_v10, %v3770_v16  ;;  %v3808_v55 = vrot.slane %v3780_v2, %v6619_v27  ;;  %v4722_v29 = vcombine.high %v2962_v49, %v2976_v12 }
 0x3cd   :  { %v3846_v41 = vcombine.low %v3836_v32, %v3843_v19  ;;  %v3847_v0 = vcombine.high %v3836_v32, %v3843_v19  ;;  %v6954_v7 = vrot.slane %v3879_v35, %v6619_v27  ;;  %v6957_v54 = vrot.slane %v3844_v26, %v6619_v27 }
 0x3ce   :  { %v3787_v9 = vrot.slane %v3778_v14, %v6619_v27  ;;  %v3794_v59 = vrot.slane %v3779_v58, %v6619_v27  ;;  %v6960_v17 = vrot.slane %v3845_v51, %v6619_v27  ;;  %v6969_v5 = vrot.slane %v4722_v29, %v6619_v27 }
 0x3cf   :  { %v6963_v34 = vrot.slane %v3846_v41, %v6619_v27  ;;  %v6966_v48 = vrot.slane %v3847_v0, %v6619_v27  ;;  %v4449_v56 = vsel %vm4372_vm15, %v3753_v21, -inf }
 0x3d0   :  { %v3809_v62 = vcombine.low %v3787_v9, %v3801_v15  ;;  %v3810_v37 = vcombine.high %v3787_v9, %v3801_v15  ;;  %v3811_v18 = vcombine.low %v3794_v59, %v3808_v55  ;;  %v3902_v47 = vcombine.low %v6954_v7, %v6969_v5 }
 0x3d1   :  { %v3876_v20 = vcombine.low %v6957_v54, %v6963_v34  ;;  %v3877_v13 = vcombine.high %v6957_v54, %v6963_v34  ;;  %v3878_v25 = vcombine.low %v6960_v17, %v6966_v48  ;;  %v3903_v1 = vcombine.high %v6954_v7, %v6969_v5 }
 0x3d2   :  { %v4433_v11 = vsel %vm7442_vm11, %v3809_v62, -inf  ;;  %v4441_v60 = vsel %vm7443_vm7, %v3811_v18, -inf  ;;  %v4450_v57 = vsel %vm4374_vm0, %v3810_v37, -inf }
 0x3d3   :  { %v4434_v21 = vmax.f32 %v3752_v31, %v4433_v11  ;;  %v4442_v22 = vmax.f32 %v3754_v36, %v4441_v60  ;;  %v4451_v24 = vmax.f32 %v4449_v56, %v4450_v57 }
 0x3d5   :  { %v4435_v50 = vrot.slane %v4434_v21, 4  ;;  %v4443_v33 = vrot.slane %v4442_v22, 4  ;;  %v4452_v28 = vrot.slane %v4451_v24, 4 }
 0x3d7   :  { %v4436_v4 = vmax.f32 %v4434_v21, %v4435_v50  ;;  %v4444_v42 = vmax.f32 %v4442_v22, %v4443_v33  ;;  %v4453_v61 = vmax.f32 %v4451_v24, %v4452_v28 }
 0x3d9   :  { %v4437_v53 = vrot.slane %v4436_v4, 2  ;;  %v4445_v45 = vrot.slane %v4444_v42, 2  ;;  %v4454_v39 = vrot.slane %v4453_v61, 2 }
 0x3db   :  { %v4438_v49 = vmax.f32 %v4436_v4, %v4437_v53  ;;  %v4446_v40 = vmax.f32 %v4444_v42, %v4445_v45  ;;  %v4455_v46 = vmax.f32 %v4453_v61, %v4454_v39  ;;  %v3911_v53 = vrot.slane %v3902_v47, %v6619_v27 }
 0x3dc   :  { %v4474_v45 = vsel %vm4372_vm15, %v3877_v13, -inf }
 0x3dd   :  { %v4439_v31 = vrot.slane %v4438_v49, 1  ;;  %v4447_v8 = vrot.slane %v4446_v40, 1  ;;  %v4456_v23 = vrot.slane %v4455_v46, 1 }
 0x3df   :  { %v4440_v43 = vmax.f32 %v4438_v49, %v4439_v31  ;;  %v4448_v36 = vmax.f32 %v4446_v40, %v4447_v8  ;;  %v4457_v12 = vmax.f32 %v4455_v46, %v4456_v23  ;;  %v3918_v8 = vrot.slane %v3903_v1, %v6619_v27 }
 0x3e1   :  { %v4585_v3 = vcombine.low %v4440_v43, %v4448_v36  ;;  %v4611_v30 = vrot.slane %v4457_v12, 5 }
 0x3e3   :  { %v4600_v10 = vrot.slane %v4585_v3, 5  ;;  %v4612_v16 = vsel %vm4601_vm10, %v4611_v30, %v6911_v52 }
 0x3e4   :  { %v4613_v2 = vsel %vm4603_vm3, %v4611_v30, %v4612_v16 }
 0x3e5   :  { %v4602_v26 = vsel %vm4601_vm10, %v4600_v10, %v6916_v44  ;;  %4638 = vst.msk [vmem:[#allocation6 + $0x8] sm:$0xf] %vm4637_vm13, %v4613_v2 }
 0x3e6   :  { %v4604_v51 = vsel %vm4603_vm3, %v4600_v10, %v4602_v26 }
 0x3e7   :  { %4636 = vst [vmem:[#allocation6] sm:$0xff] %v4604_v51 }
 0x3eb   :  { %v2252_v32 = vpop.f32.mrb[16].mxu0  ;;  %v2345_v19 = vpop.f32.mrb[16].mxu1 }
 0x3ec   :  { %v2253_v14 = vadd.f32 %v2252_v32, %v6607_v6  ;;  %v2346_v58 = vadd.f32 %v2345_v19, %v6609_v63  ;;  %v2254_v35 = vpop.f32.mrb[17].mxu0  ;;  %v2347_v15 = vpop.f32.mrb[17].mxu1 }
 0x3ed   :  { %v2255_v52 = vadd.f32 %v2254_v35, %v6612_v38  ;;  %v2256_v55 = vpop.f32.mrb[18].mxu0  ;;  %v2348_v41 = vpop.f32.mrb[18].mxu1 }
 0x3ee   :  { %v2391_v0 = vmax.f32 %v2253_v14, 0.0  ;;  %v2393_v9 = vmax.f32 %v2346_v58, 0.0  ;;  %v2257_v44 = vadd.f32 %v2256_v55, %v6607_v6  ;;  %v2349_v59 = vadd.f32 %v2348_v41, %v6609_v63  ;;  %v2258_v29 = vpop.f32.mrb[19].mxu0  ;;  %v2350_v62 = vpop.f32.mrb[19].mxu1 }
 0x3ef   :  { %v2392_v37 = vmax.f32 %v2255_v52, 0.0  ;;  %v2259_v18 = vadd.f32 %v2258_v29, %v6612_v38 }
 0x3f0   :  { %v2983_v56 = vcombine.high %v2393_v9, %v2393_v9  ;;  %v2394_v11 = vmax.f32 %v2257_v44, 0.0  ;;  %v2396_v60 = vmax.f32 %v2349_v59, 0.0  ;;  %v3004_v24 = vrot.slane %v2393_v9, %v6619_v27 }
 0x3f1   :  { %v2981_v57 = vcombine.low %v2391_v0, %v2392_v37  ;;  %v2982_v21 = vcombine.high %v2391_v0, %v2392_v37  ;;  %v2395_v22 = vmax.f32 %v2259_v18, 0.0 }
 0x3f2   :  { %v3011_v50 = vrot.slane %v2983_v56, %v6619_v27  ;;  %v3050_v33 = vcombine.high %v2396_v60, %v2396_v60  ;;  %v3071_v23 = vrot.slane %v2396_v60, %v6619_v27 }
 0x3f3   :  { %v2990_v28 = vrot.slane %v2981_v57, %v6619_v27  ;;  %v2997_v4 = vrot.slane %v2982_v21, %v6619_v27  ;;  %v3048_v42 = vcombine.low %v2394_v11, %v2395_v22  ;;  %v3049_v61 = vcombine.high %v2394_v11, %v2395_v22 }
 0x3f4   :  { %v3078_v39 = vrot.slane %v3050_v33, %v6619_v27 }
 0x3f5   :  { %v3012_v49 = vcombine.low %v2990_v28, %v3004_v24  ;;  %v3013_v40 = vcombine.high %v2990_v28, %v3004_v24  ;;  %v3014_v46 = vcombine.low %v2997_v4, %v3011_v50  ;;  %v3015_v31 = vcombine.high %v2997_v4, %v3011_v50 }
 0x3f6   :  { %v3057_v47 = vrot.slane %v3048_v42, %v6619_v27  ;;  %v3064_v43 = vrot.slane %v3049_v61, %v6619_v27 }
 0x3f7   :  { %v3022_v36 = vrot.slane %v3012_v49, %v6619_v27  ;;  %v3029_v13 = vrot.slane %v3014_v46, %v6619_v27  ;;  %v3036_v12 = vrot.slane %v3013_v40, %v6619_v27  ;;  %v3043_v3 = vrot.slane %v3015_v31, %v6619_v27 }
 0x3f8   :  { %v3079_v30 = vcombine.low %v3057_v47, %v3071_v23  ;;  %v3080_v10 = vcombine.high %v3057_v47, %v3071_v23  ;;  %v3081_v16 = vcombine.low %v3064_v43, %v3078_v39  ;;  %v3082_v2 = vcombine.high %v3064_v43, %v3078_v39 }
 0x3f9   :  { %v3044_v7 = vcombine.high %v3022_v36, %v3022_v36  ;;  %v3045_v5 = vcombine.high %v3029_v13, %v3029_v13  ;;  %v3046_v1 = vcombine.high %v3036_v12, %v3036_v12  ;;  %v3047_v26 = vcombine.high %v3043_v3, %v3043_v3 }
 0x3fa   :  { %v3901_v51 = vrot.slane %v3022_v36, %v6619_v27  ;;  %v3089_v32 = vrot.slane %v3079_v30, %v6619_v27  ;;  %v7034_v19 = vrot.slane %v3081_v16, %v6619_v27  ;;  %v3103_v14 = vrot.slane %v3080_v10, %v6619_v27 }
 0x3fb   :  { %v3936_v58 = vcombine.low %v3036_v12, %v3044_v7  ;;  %v3937_v35 = vcombine.low %v3046_v1, %v3029_v13  ;;  %v3938_v15 = vcombine.low %v3043_v3, %v3045_v5  ;;  %v7038_v52 = vrot.slane %v3082_v2, %v6619_v27 }
 0x3fc   :  { %v3904_v55 = vcombine.high %v3901_v51, %v3901_v51  ;;  %v3925_v41 = vrot.slane %v3901_v51, %v6619_v27  ;;  %v3111_v0 = vcombine.high %v3089_v32, %v3089_v32  ;;  %v3113_v9 = vcombine.high %v3103_v14, %v3103_v14 }
 0x3fd   :  { %v3946_v44 = vrot.slane %v3936_v58, %v6619_v27  ;;  %v3953_v59 = vrot.slane %v3937_v35, %v6619_v27  ;;  %v3960_v29 = vrot.slane %v3938_v15, %v6619_v27  ;;  %v3939_v62 = vcombine.low %v3047_v26, %v3089_v32 }
 0x3fe   :  { %v3932_v37 = vrot.slane %v3904_v55, %v6619_v27  ;;  %v3933_v18 = vcombine.low %v3911_v53, %v3925_v41  ;;  %v3934_v56 = vcombine.high %v3911_v53, %v3925_v41  ;;  %v4003_v11 = vcombine.low %v3103_v14, %v3111_v0 }
 0x3ff   :  { %v3968_v60 = vcombine.low %v3946_v44, %v3953_v59  ;;  %v3969_v57 = vcombine.high %v3946_v44, %v3953_v59  ;;  %v3967_v21 = vrot.slane %v3939_v62, %v6619_v27  ;;  %v4004_v22 = vcombine.low %v3113_v9, %v7034_v19 }
 0x400   :  { %v3935_v24 = vcombine.low %v3918_v8, %v3932_v37  ;;  %v4458_v50 = vsel %vm7444_vm8, %v3933_v18, -inf  ;;  %v4475_v33 = vsel %vm4374_vm0, %v3934_v56, -inf  ;;  %v4011_v28 = vrot.slane %v4003_v11, %v6619_v27 }
 0x401   :  { %v3978_v4 = vrot.slane %v3968_v60, %v6619_v27  ;;  %v3985_v42 = vrot.slane %v3969_v57, %v6619_v27  ;;  %v4459_v61 = vmax.f32 %v3876_v20, %v4458_v50  ;;  %v4476_v53 = vmax.f32 %v4474_v45, %v4475_v33 }
 0x402   :  { %v4466_v39 = vsel %vm7438_vm2, %v3935_v24, -inf  ;;  %v3970_v49 = vcombine.low %v3960_v29, %v3967_v21  ;;  %v3971_v40 = vcombine.high %v3960_v29, %v3967_v21  ;;  %v4018_v46 = vrot.slane %v4004_v22, %v6619_v27 }
 0x403   :  { %v4460_v31 = vrot.slane %v4459_v61, 4  ;;  %v4467_v8 = vmax.f32 %v3878_v25, %v4466_v39  ;;  %v4025_v23 = vrot.slane %v7038_v52, %v6619_v27  ;;  %v4477_v25 = vrot.slane %v4476_v53, 4 }
 0x404   :  { %v3992_v47 = vrot.slane %v3970_v49, %v6619_v27  ;;  %v3999_v54 = vrot.slane %v3971_v40, %v6619_v27  ;;  %v4026_v34 = vcombine.low %v4011_v28, %v4018_v46  ;;  %v4027_v20 = vcombine.high %v4011_v28, %v4018_v46 }
 0x405   :  { %v4461_v45 = vmax.f32 %v4459_v61, %v4460_v31  ;;  %v4468_v43 = vrot.slane %v4467_v8, 4  ;;  %v4028_v36 = vcombine.high %v4025_v23, %v4025_v23  ;;  %v4049_v16 = vrot.slane %v4025_v23, %v6619_v27 }
 0x406   :  { %v4000_v13 = vcombine.low %v3978_v4, %v3992_v47  ;;  %v4001_v12 = vcombine.high %v3978_v4, %v3992_v47  ;;  %v4002_v3 = vcombine.low %v3985_v42, %v3999_v54  ;;  %v4035_v30 = vrot.slane %v4026_v34, %v6619_v27 }
 0x407   :  { %v4462_v10 = vrot.slane %v4461_v45, 2  ;;  %v4469_v17 = vmax.f32 %v4467_v8, %v4468_v43  ;;  %v4042_v48 = vrot.slane %v4027_v20, %v6619_v27  ;;  %v4056_v2 = vrot.slane %v4028_v36, %v6619_v27 }
 0x408   :  { %v4723_v7 = vcombine.high %v7034_v19, %v7038_v52  ;;  %v4057_v26 = vcombine.low %v4035_v30, %v4049_v16  ;;  %v4058_v51 = vcombine.high %v4035_v30, %v4049_v16  ;;  %v4478_v35 = vmax.f32 %v4476_v53, %v4477_v25 }
 0x409   :  { %v4463_v5 = vmax.f32 %v4461_v45, %v4462_v10  ;;  %v4470_v1 = vrot.slane %v4469_v17, 2  ;;  %v4059_v32 = vcombine.low %v4042_v48, %v4056_v2  ;;  %v4499_v44 = vsel %vm4372_vm15, %v4001_v12, -inf }
 0x40a   :  { %v4483_v15 = vsel %vm7445_vm12, %v4057_v26, -inf  ;;  %v4500_v41 = vsel %vm4374_vm0, %v4058_v51, -inf  ;;  %v4479_v56 = vrot.slane %v4478_v35, 2 }
 0x40b   :  { %v4464_v14 = vrot.slane %v4463_v5, 1  ;;  %v4471_v58 = vmax.f32 %v4469_v17, %v4470_v1  ;;  %v4491_v55 = vsel %vm7446_vm9, %v4059_v32, -inf  ;;  %v4484_v9 = vmax.f32 %v4000_v13, %v4483_v15 }
 0x40c   :  { %v4492_v59 = vmax.f32 %v4002_v3, %v4491_v55  ;;  %v4501_v29 = vmax.f32 %v4499_v44, %v4500_v41  ;;  %v4480_v33 = vmax.f32 %v4478_v35, %v4479_v56 }
 0x40d   :  { %v4472_v0 = vrot.slane %v4471_v58, 1  ;;  %v4465_v62 = vmax.f32 %v4463_v5, %v4464_v14  ;;  %v4485_v18 = vrot.slane %v4484_v9, 4 }
 0x40e   :  { %v4493_v11 = vrot.slane %v4492_v59, 4  ;;  %v4502_v60 = vrot.slane %v4501_v29, 4  ;;  %v4481_v49 = vrot.slane %v4480_v33, 1 }
 0x40f   :  { %v4473_v37 = vmax.f32 %v4471_v58, %v4472_v0  ;;  %v4486_v57 = vmax.f32 %v4484_v9, %v4485_v18 }
 0x410   :  { %v4494_v22 = vmax.f32 %v4492_v59, %v4493_v11  ;;  %v4503_v24 = vmax.f32 %v4501_v29, %v4502_v60  ;;  %v4482_v47 = vmax.f32 %v4480_v33, %v4481_v49 }
 0x411   :  { %v4586_v21 = vcombine.low %v4465_v62, %v4473_v37  ;;  %v4487_v50 = vrot.slane %v4486_v57, 2 }
 0x412   :  { %v4495_v28 = vrot.slane %v4494_v22, 2  ;;  %v4504_v4 = vrot.slane %v4503_v24, 2 }
 0x413   :  { %v4488_v42 = vmax.f32 %v4486_v57, %v4487_v50 }
 0x414   :  { %v4496_v61 = vmax.f32 %v4494_v22, %v4495_v28  ;;  %v4505_v53 = vmax.f32 %v4503_v24, %v4504_v4  ;;  %v4070_v28 = vrot.slane %v4723_v7, %v6619_v27 }
 0x415   :  { %v4489_v39 = vrot.slane %v4488_v42, 1 }
 0x416   :  { %v4497_v40 = vrot.slane %v4496_v61, 1  ;;  %v4506_v46 = vrot.slane %v4505_v53, 1 }
 0x417   :  { %v4490_v31 = vmax.f32 %v4488_v42, %v4489_v39 }
 0x418   :  { %v4507_v8 = vmax.f32 %v4505_v53, %v4506_v46  ;;  %v4498_v23 = vmax.f32 %v4496_v61, %v4497_v40 }
 0x41a   :  { %v4587_v54 = vcombine.low %v4490_v31, %v4498_v23  ;;  %v4623_v34 = vrot.slane %v4507_v8, 7 }
 0x41c   :  { %v2262_v20 = vpop.f32.mrb[20].mxu0  ;;  %v2353_v45 = vpop.f32.mrb[20].mxu1  ;;  %v4614_v3 = vrot.slane %v4587_v54, 7  ;;  %v4624_v30 = vsel %vm4591_vm1, %v4623_v34, %v4482_v47 }
 0x41d   :  { %v2263_v43 = vadd.f32 %v2262_v20, %v6607_v6  ;;  %v2354_v36 = vadd.f32 %v2353_v45, %v6609_v63  ;;  %v2264_v13 = vpop.f32.mrb[21].mxu0  ;;  %v2355_v12 = vpop.f32.mrb[21].mxu1  ;;  %v7079_v25 = vsel %vm4593_vm14, %v4623_v34, %v4624_v30 }
 0x41e   :  { %v2265_v10 = vadd.f32 %v2264_v13, %v6612_v38  ;;  %v2266_v17 = vpop.f32.mrb[22].mxu0  ;;  %v2356_v48 = vpop.f32.mrb[22].mxu1  ;;  %v4615_v58 = vsel %vm4591_vm1, %v4614_v3, %v4586_v21  ;;  %vm7447_vm1 = vmmov %vm7438_vm2 }
 0x41f   :  { %v2397_v16 = vmax.f32 %v2263_v43, 0.0  ;;  %v2399_v2 = vmax.f32 %v2354_v36, 0.0  ;;  %v2267_v5 = vadd.f32 %v2266_v17, %v6607_v6  ;;  %v2357_v1 = vadd.f32 %v2356_v48, %v6609_v63  ;;  %v2268_v26 = vpop.f32.mrb[23].mxu0  ;;  %v2358_v51 = vpop.f32.mrb[23].mxu1  ;;  %vm7449_vm4 = vmmov %vm7447_vm1 }
 0x420   :  { %v2398_v32 = vmax.f32 %v2265_v10, 0.0  ;;  %v2269_v14 = vadd.f32 %v2268_v26, %v6612_v38  ;;  %v7086_v44 = vsel %vm4593_vm14, %v4614_v3, %v4615_v58  ;;  %vm7448_vm14 = vmmov %vm7447_vm1 }
 0x421   :  { %v3117_v35 = vcombine.high %v2399_v2, %v2399_v2  ;;  %v2400_v15 = vmax.f32 %v2267_v5, 0.0  ;;  %v2402_v55 = vmax.f32 %v2357_v1, 0.0  ;;  %v3138_v59 = vrot.slane %v2399_v2, %v6619_v27  ;;  %vm7450_vm11 = vmmov %vm7447_vm1 }
 0x422   :  { %v3115_v41 = vcombine.low %v2397_v16, %v2398_v32  ;;  %v3116_v0 = vcombine.high %v2397_v16, %v2398_v32  ;;  %v2401_v9 = vmax.f32 %v2269_v14, 0.0 }
 0x423   :  { %v3145_v29 = vrot.slane %v3117_v35, %v6619_v27  ;;  %v3184_v62 = vcombine.high %v2402_v55, %v2402_v55  ;;  %v3205_v4 = vrot.slane %v2402_v55, %v6619_v27 }
 0x424   :  { %v3124_v37 = vrot.slane %v3115_v41, %v6619_v27  ;;  %v3131_v18 = vrot.slane %v3116_v0, %v6619_v27  ;;  %v3182_v56 = vcombine.low %v2400_v15, %v2401_v9  ;;  %v3183_v11 = vcombine.high %v2400_v15, %v2401_v9 }
 0x425   :  { %v3212_v60 = vrot.slane %v3184_v62, %v6619_v27 }
 0x426   :  { %v3146_v57 = vcombine.low %v3124_v37, %v3138_v59  ;;  %v3147_v21 = vcombine.high %v3124_v37, %v3138_v59  ;;  %v3148_v22 = vcombine.low %v3131_v18, %v3145_v29  ;;  %v3149_v24 = vcombine.high %v3131_v18, %v3145_v29 }
 0x427   :  { %v3191_v42 = vrot.slane %v3182_v56, %v6619_v27  ;;  %v3198_v61 = vrot.slane %v3183_v11, %v6619_v27 }
 0x428   :  { %v2272_v50 = vpop.f32.mrb[24].mxu0  ;;  %v2361_v33 = vpop.f32.mrb[24].mxu1  ;;  %v3156_v49 = vrot.slane %v3146_v57, %v6619_v27  ;;  %v3163_v40 = vrot.slane %v3148_v22, %v6619_v27  ;;  %v3170_v46 = vrot.slane %v3147_v21, %v6619_v27  ;;  %v3177_v31 = vrot.slane %v3149_v24, %v6619_v27 }
 0x429   :  { %v2274_v53 = vpop.f32.mrb[25].mxu0  ;;  %v2363_v39 = vpop.f32.mrb[25].mxu1  ;;  %v3213_v19 = vcombine.low %v3191_v42, %v3205_v4  ;;  %v3214_v52 = vcombine.high %v3191_v42, %v3205_v4  ;;  %v3215_v7 = vcombine.low %v3198_v61, %v3212_v60  ;;  %v3216_v47 = vcombine.high %v3198_v61, %v3212_v60 }
 0x42a   :  { %v2276_v8 = vpop.f32.mrb[26].mxu0  ;;  %v2364_v23 = vpop.f32.mrb[26].mxu1  ;;  %v4061_v20 = vcombine.low %v3156_v49, %v3170_v46  ;;  %v4724_v45 = vcombine.high %v3156_v49, %v3170_v46  ;;  %v4063_v43 = vcombine.low %v3163_v40, %v3177_v31  ;;  %v4725_v36 = vcombine.high %v3163_v40, %v3177_v31 }
 0x42b   :  { %v2277_v54 = vpop.f32.mrb[27].mxu0  ;;  %v2365_v34 = vpop.f32.mrb[27].mxu1  ;;  %v3223_v13 = vrot.slane %v3213_v19, %v6619_v27  ;;  %v3230_v12 = vrot.slane %v3215_v7, %v6619_v27  ;;  %v3237_v3 = vrot.slane %v3214_v52, %v6619_v27  ;;  %v2273_v30 = vadd.f32 %v2272_v50, %v6607_v6 }
 0x42c   :  { %v4077_v10 = vrot.slane %v4061_v20, %v6619_v27  ;;  %v4084_v17 = vrot.slane %v4724_v45, %v6619_v27  ;;  %v4091_v48 = vrot.slane %v4063_v43, %v6619_v27  ;;  %v2362_v16 = vadd.f32 %v2361_v33, %v6609_v63 }
 0x42d   :  { %v7113_v2 = vrot.slane %v3216_v47, %v6619_v27  ;;  %v3245_v5 = vcombine.high %v3223_v13, %v3223_v13  ;;  %v3246_v1 = vcombine.high %v3230_v12, %v3230_v12  ;;  %v3247_v26 = vcombine.high %v3237_v3, %v3237_v3 }
 0x42e   :  { %v4092_v51 = vcombine.low %v4070_v28, %v4077_v10  ;;  %v4093_v32 = vcombine.high %v4070_v28, %v4077_v10  ;;  %v4094_v14 = vcombine.low %v4084_v17, %v4091_v48  ;;  %v4095_v58 = vcombine.high %v4084_v17, %v4091_v48 }
 0x42f   :  { %v4128_v35 = vcombine.low %v3223_v13, %v3237_v3  ;;  %v4149_v6 = vrot.slane %v3245_v5, %v6619_v27  ;;  %v4184_v15 = vcombine.low %v3247_v26, %v3230_v12  ;;  %v4185_v55 = vcombine.low %v7113_v2, %v3246_v1 }
 0x430   :  { %v4102_v41 = vrot.slane %v4092_v51, %v6619_v27  ;;  %v4109_v63 = vrot.slane %v4093_v32, %v6619_v27  ;;  %v4116_v0 = vrot.slane %v4094_v14, %v6619_v27  ;;  %v4123_v9 = vrot.slane %v4095_v58, %v6619_v27 }
 0x431   :  { %v4135_v59 = vrot.slane %v4725_v36, %v6619_v27  ;;  %v4142_v29 = vrot.slane %v4128_v35, %v6619_v27  ;;  %v4152_v62 = vcombine.high %v4149_v6, %v4149_v6  ;;  %v7124_v37 = vrot.slane %v4184_v15, %v6619_v27 }
 0x432   :  { %v4124_v18 = vcombine.low %v4102_v41, %v4116_v0  ;;  %v4125_v56 = vcombine.high %v4102_v41, %v4116_v0  ;;  %v4126_v11 = vcombine.low %v4109_v63, %v4123_v9  ;;  %v7127_v60 = vrot.slane %v4185_v55, %v6619_v27 }
 0x433   :  { %v4150_v57 = vcombine.low %v4135_v59, %v4142_v29  ;;  %v4151_v21 = vcombine.high %v4135_v59, %v4142_v29  ;;  %v4180_v22 = vrot.slane %v4152_v62, %v6619_v27  ;;  %v4173_v24 = vrot.slane %v4149_v6, %v6619_v27 }
 0x434   :  { %v4216_v50 = vcombine.low %v7124_v37, %v7127_v60  ;;  %v4217_v33 = vcombine.high %v7124_v37, %v7127_v60  ;;  %v2405_v28 = vmax.f32 %v2362_v16, 0.0  ;;  %v2403_v61 = vmax.f32 %v2273_v30, 0.0 }
 0x435   :  { %v4159_v4 = vrot.slane %v4150_v57, %v6619_v27  ;;  %v4166_v42 = vrot.slane %v4151_v21, %v6619_v27  ;;  %v2275_v39 = vadd.f32 %v2274_v53, %v6612_v38  ;;  %v4524_v23 = vsel %vm4372_vm15, %v4125_v56, -inf }
 0x436   :  { %v3251_v49 = vcombine.high %v2405_v28, %v2405_v28  ;;  %v3272_v53 = vrot.slane %v2405_v28, %v6619_v27  ;;  %v3248_v1 = vcombine.high %v7113_v2, %v7113_v2  ;;  %v4226_v2 = vrot.slane %v4216_v50, %v6619_v27 }
 0x437   :  { %v4181_v40 = vcombine.low %v4159_v4, %v4173_v24  ;;  %v4182_v46 = vcombine.high %v4159_v4, %v4173_v24  ;;  %v4183_v31 = vcombine.low %v4166_v42, %v4180_v22  ;;  %v2404_v8 = vmax.f32 %v2275_v39, 0.0 }
 0x438   :  { %v3279_v19 = vrot.slane %v3251_v49, %v6619_v27 }
 0x439   :  { %v4508_v52 = vsel %vm7447_vm1, %v4181_v40, -inf  ;;  %v4516_v7 = vsel %vm7448_vm14, %v4183_v31, -inf  ;;  %v4525_v47 = vsel %vm4374_vm0, %v4182_v46, -inf  ;;  %v3249_v54 = vcombine.low %v2403_v61, %v2404_v8 }
 0x43a   :  { %v4509_v34 = vmax.f32 %v4124_v18, %v4508_v52  ;;  %v4517_v20 = vmax.f32 %v4126_v11, %v4516_v7  ;;  %v4526_v45 = vmax.f32 %v4524_v23, %v4525_v47  ;;  %v3250_v38 = vcombine.high %v2403_v61, %v2404_v8 }
 0x43b   :  { %v3258_v43 = vrot.slane %v3249_v54, %v6619_v27  ;;  %v4233_v40 = vrot.slane %v4217_v33, %v6619_v27 }
 0x43c   :  { %v4510_v36 = vrot.slane %v4509_v34, 4  ;;  %v4518_v13 = vrot.slane %v4517_v20, 4  ;;  %v4527_v12 = vrot.slane %v4526_v45, 4  ;;  %v3265_v3 = vrot.slane %v3250_v38, %v6619_v27 }
 0x43d   :  { %v3280_v30 = vcombine.low %v3258_v43, %v3272_v53  ;;  %v3281_v10 = vcombine.high %v3258_v43, %v3272_v53 }
 0x43e   :  { %v4511_v17 = vmax.f32 %v4509_v34, %v4510_v36  ;;  %v4519_v48 = vmax.f32 %v4517_v20, %v4518_v13  ;;  %v4528_v16 = vmax.f32 %v4526_v45, %v4527_v12  ;;  %v3282_v5 = vcombine.low %v3265_v3, %v3279_v19 }
 0x43f   :  { %v3283_v26 = vcombine.high %v3265_v3, %v3279_v19  ;;  %v3290_v51 = vrot.slane %v3280_v30, %v6619_v27  ;;  %v3304_v32 = vrot.slane %v3281_v10, %v6619_v27 }
 0x440   :  { %v4512_v14 = vrot.slane %v4511_v17, 2  ;;  %v4529_v58 = vrot.slane %v4528_v16, 2  ;;  %v3297_v35 = vrot.slane %v3282_v5, %v6619_v27  ;;  %v4520_v6 = vrot.slane %v4519_v48, 2 }
 0x441   :  { %v3311_v15 = vrot.slane %v3283_v26, %v6619_v27  ;;  %v3312_v55 = vcombine.high %v3290_v51, %v3290_v51  ;;  %v3314_v41 = vcombine.high %v3304_v32, %v3304_v32  ;;  %v4186_v63 = vcombine.low %v3248_v1, %v3290_v51 }
 0x442   :  { %v3313_v0 = vcombine.high %v3297_v35, %v3297_v35  ;;  %v4513_v9 = vmax.f32 %v4511_v17, %v4512_v14  ;;  %v4521_v59 = vmax.f32 %v4519_v48, %v4520_v6  ;;  %v4530_v29 = vmax.f32 %v4528_v16, %v4529_v58 }
 0x443   :  { %v3315_v62 = vcombine.high %v3311_v15, %v3311_v15  ;;  %v4187_v18 = vcombine.low %v3304_v32, %v3312_v55  ;;  %v4251_v56 = vcombine.low %v3314_v41, %v3297_v35  ;;  %v4208_v24 = vrot.slane %v4186_v63, %v6619_v27 }
 0x444   :  { %v4252_v11 = vcombine.low %v3311_v15, %v3313_v0  ;;  %v4514_v57 = vrot.slane %v4513_v9, 1  ;;  %v4522_v21 = vrot.slane %v4521_v59, 1  ;;  %v4531_v22 = vrot.slane %v4530_v29, 1 }
 0x445   :  { %v4215_v28 = vrot.slane %v4187_v18, %v6619_v27  ;;  %v4259_v4 = vrot.slane %v4251_v56, %v6619_v27  ;;  %v4273_v42 = vrot.slane %v3315_v62, %v6619_v27 }
 0x446   :  { %v4266_v61 = vrot.slane %v4252_v11, %v6619_v27  ;;  %v4515_v39 = vmax.f32 %v4513_v9, %v4514_v57  ;;  %v4523_v49 = vmax.f32 %v4521_v59, %v4522_v21  ;;  %v4532_v50 = vmax.f32 %v4530_v29, %v4531_v22 }
 0x447   :  { %v4218_v46 = vcombine.low %v4208_v24, %v4215_v28  ;;  %v4219_v31 = vcombine.high %v4208_v24, %v4215_v28  ;;  %v4276_v8 = vcombine.high %v4273_v42, %v4273_v42  ;;  %v4297_v34 = vrot.slane %v4273_v42, %v6619_v27 }
 0x448   :  { %v4274_v23 = vcombine.low %v4259_v4, %v4266_v61  ;;  %v4275_v19 = vcombine.high %v4259_v4, %v4266_v61  ;;  %v4588_v52 = vcombine.low %v4515_v39, %v4523_v49  ;;  %v4626_v7 = vrot.slane %v4532_v50, 6 }
 0x449   :  { %v4240_v47 = vrot.slane %v4218_v46, %v6619_v27  ;;  %v4247_v54 = vrot.slane %v4219_v31, %v6619_v27  ;;  %v4304_v20 = vrot.slane %v4276_v8, %v6619_v27 }
 0x44a   :  { %v4283_v45 = vrot.slane %v4274_v23, %v6619_v27  ;;  %v4290_v37 = vrot.slane %v4275_v19, %v6619_v27  ;;  %v4617_v60 = vrot.slane %v4588_v52, 6  ;;  %v4627_v33 = vsel %vm4596_vm5, %v4626_v7, %v7079_v25 }
 0x44b   :  { %v4248_v38 = vcombine.low %v4226_v2, %v4240_v47  ;;  %v4249_v53 = vcombine.high %v4226_v2, %v4240_v47  ;;  %v4250_v43 = vcombine.low %v4233_v40, %v4247_v54  ;;  %v4628_v36 = vsel %vm4598_vm6, %v4626_v7, %v4627_v33 }
 0x44c   :  { %v4305_v13 = vcombine.low %v4283_v45, %v4297_v34  ;;  %v4306_v12 = vcombine.high %v4283_v45, %v4297_v34  ;;  %v4307_v3 = vcombine.low %v4290_v37, %v4304_v20  ;;  %v4618_v30 = vsel %vm4596_vm5, %v4617_v60, %v7086_v44 }
 0x44d   :  { %v4549_v10 = vsel %vm4372_vm15, %v4249_v53, -inf  ;;  %v4619_v17 = vsel %vm4598_vm6, %v4617_v60, %v4618_v30 }
 0x44e   :  { %v4533_v27 = vsel %vm7449_vm4, %v4305_v13, -inf  ;;  %v4541_v48 = vsel %vm7450_vm11, %v4307_v3, -inf  ;;  %v4550_v25 = vsel %vm4374_vm0, %v4306_v12, -inf }
 0x44f   :  { %v4534_v16 = vmax.f32 %v4248_v38, %v4533_v27  ;;  %v4542_v5 = vmax.f32 %v4250_v43, %v4541_v48  ;;  %v4551_v1 = vmax.f32 %v4549_v10, %v4550_v25 }
 0x451   :  { %v4535_v26 = vrot.slane %v4534_v16, 4  ;;  %v4543_v51 = vrot.slane %v4542_v5, 4  ;;  %v4552_v32 = vrot.slane %v4551_v1, 4 }
 0x453   :  { %v4536_v14 = vmax.f32 %v4534_v16, %v4535_v26  ;;  %v4544_v58 = vmax.f32 %v4542_v5, %v4543_v51  ;;  %v4553_v35 = vmax.f32 %v4551_v1, %v4552_v32 }
 0x455   :  { %v4537_v44 = vrot.slane %v4536_v14, 2  ;;  %v4545_v6 = vrot.slane %v4544_v58, 2  ;;  %v4554_v15 = vrot.slane %v4553_v35, 2 }
 0x457   :  { %v4538_v55 = vmax.f32 %v4536_v14, %v4537_v44  ;;  %v4546_v41 = vmax.f32 %v4544_v58, %v4545_v6  ;;  %v4555_v63 = vmax.f32 %v4553_v35, %v4554_v15 }
 0x459   :  { %v4539_v0 = vrot.slane %v4538_v55, 1  ;;  %v4547_v9 = vrot.slane %v4546_v41, 1  ;;  %v4556_v59 = vrot.slane %v4555_v63, 1 }
 0x45b   :  { %v4540_v29 = vmax.f32 %v4538_v55, %v4539_v0  ;;  %v4548_v2 = vmax.f32 %v4546_v41, %v4547_v9  ;;  %v4557_v62 = vmax.f32 %v4555_v63, %v4556_v59 }
 0x45d   :  { %v4589_v18 = vcombine.low %v4540_v29, %v4548_v2  ;;  %v4629_v56 = vrot.slane %v4557_v62, 5 }
 0x45f   :  { %v4620_v11 = vrot.slane %v4589_v18, 5  ;;  %v4630_v57 = vsel %vm4601_vm10, %v4629_v56, %v4628_v36 }
 0x460   :  { %v4631_v21 = vsel %vm4603_vm3, %v4629_v56, %v4630_v57 }
 0x461   :  { %v4621_v22 = vsel %vm4601_vm10, %v4620_v11, %v4619_v17  ;;  %4640 = vst.msk [vmem:[#allocation6 + $0x14] sm:$0xf] %vm4637_vm13, %v4631_v21 }
 0x462   :  { %v4622_v24 = vsel %vm4603_vm3, %v4620_v11, %v4621_v22 }
 0x463   :  { %4639 = vst [vmem:[#allocation6 + $0xc] sm:$0xff] %v4622_v24 }
 0x464   :  { %4827 = shalt.err (!%p4824_p12)
}
 0x465   :  { %s4828_s20 = scalar_lea.hbm %s7201_s3, 384 }
 0x466   :  { %p4829_p13 = scmp.ne.s32.totalorder %s7201_s3, %s4828_s20  ;;  %p4832_p0 = scmp.lt.u32.totalorder %s4828_s20, %s7201_s3 }
 0x468   :  { %p4834_p1 = pnand %p4832_p0, %p4829_p13 }
 0x46a   :  { %4837 = shalt.err (!%p4834_p1)
}
 0x46b   :  { %4652 = dma.vmem_to_hbm [thread:$0]  %s4647_s16, 384, %s7201_s3, [#allocation5], %s4843_s22, %s4843_s22, %s4844_s23  }
 0x46c   :  { %4840 = dma.done.wait [#allocation5], 384  }
 0x46d   :  { %4841 = vsyncadd [#allocation5], 4294966912 }
 0x46e   :  { %4656 = vsyncpa [#allocation4], 1 }
 0x46f   :  { %4657 = vsyncpa [#allocation5], 1 }

</bundles_post_ra>
